<compile_context>
chip_gen: v7x
topology: tpu7x:2x2x1
jax: 0.10.0
libtpu: 0.0.40
codegen_flags: <defaults>
</compile_context>

<pallas_src>
from functools import partial, lru_cache

import jax
import jax.numpy as jnp
from jax import lax
from jax.experimental import pallas as pl
from jax.experimental.pallas import tpu as pltpu


def _round_up(x, m):
    return (x + m - 1) // m * m


def _vmem_limit_bytes():
    """Generation-aware VMEM limit: ~75% of physical capacity, clamped to [32, 96] MiB."""
    cap = 64 * 1024 * 1024
    try:
        cap = int(getattr(pltpu.get_tpu_info(), "vmem_capacity_bytes", cap))
    except Exception:
        pass
    return max(32 * 1024 * 1024, min((cap * 3) // 4, 96 * 1024 * 1024))


def _compiler_params(sem):
    return pltpu.CompilerParams(dimension_semantics=sem,
                                vmem_limit_bytes=_vmem_limit_bytes())


def _default_row_tile():
    # v5e/v6e (128 MiB VMEM) can afford larger streaming tiles than v7x (64 MiB).
    return 1024 if _vmem_limit_bytes() >= 64 * 1024 * 1024 else 512


def _const_spec(shape, single_buffer):
    """BlockSpec for a grid-invariant (resident) operand.  With `single_buffer` we request
    Buffered(1): constant-index blocks gain nothing from double buffering, so this halves
    their VMEM footprint."""
    index_map = lambda *_: (0,) * len(shape)
    if single_buffer:
        return pl.BlockSpec(shape, index_map, pipeline_mode=pl.Buffered(1))
    return pl.BlockSpec(shape, index_map)


@lru_cache(maxsize=None)
def _roll_skew_supported():
    """Probe (once) that pltpu.roll(x, shift, axis=1, stride=1, stride_axis=0) implements
    per-row jnp.roll(row_i, shift + i).  If the strided rotate is unavailable or behaves
    differently on this backend, fall back to the (slow) per-row slice skew."""
    rows, width = 8, 128
    shift = width - 8

    def kern(x_ref, o_ref):
        o_ref[...] = pltpu.roll(x_ref[...], shift, 1, stride=1, stride_axis=0)

    x = jnp.broadcast_to(jnp.arange(width, dtype=jnp.float32)[None, :], (rows, width))
    try:
        out = pl.pallas_call(
            kern, out_shape=jax.ShapeDtypeStruct((rows, width), jnp.float32))(x)
        expect = jnp.stack([jnp.roll(x[i], shift + i) for i in range(rows)])
        return bool(jnp.all(out == expect))
    except Exception:
        return False


# --------------------- Kernel A: fused RPR attention block -------------------

def attention_block_kernel(x_ref, w_in_ref, b_in_ref, er_ref, w_out_ref, b_out_ref,
                           g1_ref, beta1_ref, o_ref, qkv_s, attn_s,
                           *, nhead, use_roll_skew):
    # x_ref : (1, S, E)  f32   one batch element
    # er_ref: (W, Dh)    bf16  [0 ; Er_valid ; 0...], W = round_up(2S, 128)
    x = x_ref[0]                                                    # (S, E) f32 (residual)
    S, E = x.shape
    Dh = E // nhead
    W = er_ref.shape[0]

    # Fused QKV projection (bf16 operands, f32 accumulate).  Dh**-0.5 is pre-folded
    # into the Q weight/bias columns at parameter-prep time.
    qkv_s[...] = (jnp.dot(x.astype(jnp.bfloat16), w_in_ref[...],
                          preferred_element_type=jnp.float32)
                  + b_in_ref[...]).astype(jnp.bfloat16)             # (S, 3E) bf16

    # TODO(synk): for large nhead, iterate heads with lax.fori_loop over an (H,S,Dh)
    #   view to bound vreg live ranges; nhead is small here so the unroll is cheap.
    for h in range(nhead):
        q = qkv_s[:, h * Dh:(h + 1) * Dh]                           # (S, Dh) bf16 (pre-scaled)
        k = qkv_s[:, E + h * Dh:E + (h + 1) * Dh]                   # (S, Dh) bf16
        v = qkv_s[:, 2 * E + h * Dh:2 * E + (h + 1) * Dh]           # (S, Dh) bf16

        # scores = q @ k^T : contract last dims of both (no explicit transpose).
        scores = lax.dot_general(q, k, (((1,), (1,)), ((), ())),
                                 preferred_element_type=jnp.float32)       # (S, S) f32

        # Relative-position bias ("skew"), fully vectorized:
        #   qe[i, m]   = q[i] . Er_ext[m]
        #   srel[i, j] = qe[i, 1 + (S-1) - i + j]     (zero rows give the j > i mask)
        # i.e. row i rolled by (W - S) + i  ->  ONE strided XLU lane rotate instead of
        # S masked single-row stores per head.
        qe = lax.dot_general(q, er_ref[...], (((1,), (1,)), ((), ())),
                             preferred_element_type=jnp.float32)           # (S, W) f32
        if use_roll_skew:
            srel = pltpu.roll(qe, W - S, 1, stride=1, stride_axis=0)[:, :S]
        else:
            # Fallback (probe failed): per-row static slices of the lane-padded qe.
            srel = jnp.concatenate(
                [qe[i:i + 1, S - i:2 * S - i] for i in range(S)], axis=0)

        s = scores + srel                                           # (S, S) f32
        m = jnp.max(s, axis=-1, keepdims=True)
        p = jnp.exp(s - m)
        denom = jnp.sum(p, axis=-1, keepdims=True)                  # (S, 1) f32
        o = lax.dot_general(p.astype(jnp.bfloat16), v, (((1,), (0,)), ((), ())),
                            preferred_element_type=jnp.float32)     # (S, Dh) f32
        # normalize once on the (S, Dh) output; approx reciprocal runs on the EUP slot.
        attn_s[:, h * Dh:(h + 1) * Dh] = (
            o * pl.reciprocal(denom, approx=True)).astype(jnp.bfloat16)

    # output projection + residual + LayerNorm1 (eps=1e-5, torch semantics).
    proj = (jnp.dot(attn_s[...], w_out_ref[...], preferred_element_type=jnp.float32)
            + b_out_ref[...])
    z = x + proj
    mu = jnp.mean(z, axis=-1, keepdims=True)
    var = jnp.mean(jnp.square(z - mu), axis=-1, keepdims=True)
    zn = (z - mu) * lax.rsqrt(var + 1e-5)
    o_ref[0] = zn * g1_ref[...] + beta1_ref[...]


def attention_block_pallas(xb, w_in, b_in, er_ext, w_out, b_out, g1, beta1,
                           nhead, single_buffer_weights):
    B, S, E = xb.shape
    W, Dh = er_ext.shape
    kern = partial(attention_block_kernel, nhead=nhead,
                   use_roll_skew=_roll_skew_supported())
    cs = partial(_const_spec, single_buffer=single_buffer_weights)
    return pl.pallas_call(
        kern,
        out_shape=jax.ShapeDtypeStruct((B, S, E), jnp.float32),
        grid=(B,),
        in_specs=[
            pl.BlockSpec((1, S, E), lambda b: (b, 0, 0)),      # x (per batch element)
            cs((E, 3 * E)),                                    # w_in   (resident, bf16)
            cs((1, 3 * E)),                                    # b_in
            cs((W, Dh)),                                       # Er_ext (resident, bf16)
            cs((E, E)),                                        # w_out  (bf16)
            cs((1, E)),                                        # b_out
            cs((1, E)),                                        # ln1 gamma
            cs((1, E)),                                        # ln1 beta
        ],
        out_specs=pl.BlockSpec((1, S, E), lambda b: (b, 0, 0)),
        scratch_shapes=[
            pltpu.VMEM((S, 3 * E), jnp.bfloat16),              # qkv
            pltpu.VMEM((S, E), jnp.bfloat16),                  # attention heads
        ],
        compiler_params=_compiler_params(("parallel",)),
    )(xb, w_in, b_in, er_ext, w_out, b_out, g1, beta1)


# ----------------- Kernel B: fused FFN + residual + LayerNorm2 ---------------

def ffn_ln_kernel(x_ref, w1_ref, b1_ref, w2_ref, b2_ref, g2_ref, beta2_ref, o_ref):
    x = x_ref[...]                                                   # (tn, E) f32
    h = jnp.dot(x.astype(jnp.bfloat16), w1_ref[...],
                preferred_element_type=jnp.float32) + b1_ref[...]
    h = jnp.maximum(h, 0.0)                                          # ReLU
    # TODO(synk): for very large F on v7x, additionally tile the hidden dim.
    y = jnp.dot(h.astype(jnp.bfloat16), w2_ref[...],
                preferred_element_type=jnp.float32) + b2_ref[...]
    z = x + y                                                        # residual (f32)
    mu = jnp.mean(z, axis=-1, keepdims=True)
    var = jnp.mean(jnp.square(z - mu), axis=-1, keepdims=True)
    zn = (z - mu) * lax.rsqrt(var + 1e-5)
    o_ref[...] = zn * g2_ref[...] + beta2_ref[...]


def ffn_ln_pallas(x2d, w1, b1, w2, b2, g2, beta2, single_buffer_weights, row_tile=512):
    N, E = x2d.shape
    F = w1.shape[1]
    tn = min(N, row_tile)
    cs = partial(_const_spec, single_buffer=single_buffer_weights)
    return pl.pallas_call(
        ffn_ln_kernel,
        out_shape=jax.ShapeDtypeStruct((N, E), jnp.float32),
        grid=(pl.cdiv(N, tn),),
        in_specs=[
            pl.BlockSpec((tn, E), lambda i: (i, 0)),           # activations (row tiles)
            cs((E, F)),                                        # w1 (resident, bf16)
            cs((1, F)),
            cs((F, E)),                                        # w2 (resident, bf16)
            cs((1, E)),
            cs((1, E)),                                        # ln2 gamma
            cs((1, E)),                                        # ln2 beta
        ],
        out_specs=pl.BlockSpec((tn, E), lambda i: (i, 0)),
        compiler_params=_compiler_params(("parallel",)),
    )(x2d, w1, b1, w2, b2, g2, beta2)


# --------------------------------- layer glue --------------------------------

def _forward(src, params, nhead, single_buffer_weights):
    S, B, E = src.shape
    Dh = E // nhead

    er = params["Er"]                                                # (er_len, Dh) bf16
    er_len = er.shape[0]
    assert er_len >= S, "er_len must be >= seq_len (as required by the reference skew)"
    er_valid = er[er_len - S:, :]                                    # (S, Dh)

    # Er_ext = [one leading zero row ; Er_valid ; trailing zeros], lane-padded to W >= 2S.
    # The zero rows implement the (j > i) mask of the reference `_skew`; the leading zero
    # keeps every per-row rotate amount strictly inside (0, W).
    W = max(128, _round_up(2 * S, 128))
    er_ext = jnp.concatenate(
        [jnp.zeros((1, Dh), er.dtype), er_valid,
         jnp.zeros((W - S - 1, Dh), er.dtype)], axis=0)              # (W, Dh)

    # batch-major layout so per-batch blocks are full (S, E) tiles
    xb = jnp.transpose(src, (1, 0, 2))                               # (B, S, E)

    y = attention_block_pallas(
        xb, params["w_in"], params["b_in"], er_ext,
        params["w_out"], params["b_out"], params["ln1_g"], params["ln1_b"],
        nhead, single_buffer_weights)                                # (B, S, E)

    z2d = ffn_ln_pallas(
        y.reshape(B * S, E), params["w1"], params["b1"],
        params["w2"], params["b2"], params["ln2_g"], params["ln2_b"],
        single_buffer_weights, row_tile=_default_row_tile())         # (B*S, E)

    out = jnp.transpose(z2d.reshape(B, S, E), (1, 0, 2))             # (S, B, E)
    return jax.block_until_ready(out)


def transformer_encoder_layer_rpr(src, params, nhead):
    # Prefer single-buffered resident weights (halves their VMEM footprint); fall back
    # transparently if pipeline_mode / Buffered(1) is unsupported on this jax version.
    try:
        return _forward(src, params, nhead, single_buffer_weights=True)
    except Exception:
        return _forward(src, params, nhead, single_buffer_weights=False)


# ------------------------------- parameters ----------------------------------

def init_params(key, d_model, nhead, dim_feedforward, er_len):
    """Raw (torch-equivalent) f32 parameters, already transposed for right-multiplication."""
    E, F_, Dh = d_model, dim_feedforward, d_model // nhead
    ks = jax.random.split(key, 6)
    f32 = jnp.float32
    return dict(
        w_in=jax.random.normal(ks[0], (E, 3 * E), f32) * 0.05,
        b_in=jnp.zeros((1, 3 * E), f32),
        w_out=jax.random.normal(ks[1], (E, E), f32) * 0.05,
        b_out=jnp.zeros((1, E), f32),
        w1=jax.random.normal(ks[2], (E, F_), f32) * 0.05,
        b1=jnp.zeros((1, F_), f32),
        w2=jax.random.normal(ks[3], (F_, E), f32) * 0.05,
        b2=jnp.zeros((1, E), f32),
        ln1_g=jnp.ones((1, E), f32), ln1_b=jnp.zeros((1, E), f32),
        ln2_g=jnp.ones((1, E), f32), ln2_b=jnp.zeros((1, E), f32),
        Er=jax.random.uniform(ks[4], (er_len, Dh), f32),             # torch.rand
    )


def prepare_params(params, d_model, nhead):
    """One-time parameter prep: fold the Dh**-0.5 attention scaling into the Q projection
    (weight + bias) and cast matmul weights to bf16.  Activations are cast in-kernel;
    softmax / LayerNorm math stays f32."""
    E = d_model
    scaling = float(E // nhead) ** -0.5
    p = dict(params)
    q_scale = jnp.concatenate(
        [jnp.full((1, E), scaling, jnp.float32), jnp.ones((1, 2 * E), jnp.float32)], axis=1)
    p["w_in"] = (params["w_in"] * q_scale).astype(jnp.bfloat16)
    p["b_in"] = params["b_in"] * q_scale
    for name in ("w_out", "w1", "w2"):
        p[name] = params[name].astype(jnp.bfloat16)
    p["Er"] = params["Er"].astype(jnp.bfloat16)
    return p


if __name__ == "__main__":
    S, B = 8, 2                 # seq_len, batch
    d_model, nhead = 32, 4
    dim_feedforward = 64
    er_len = 16                 # >= S, as required by the reference skew

    key = jax.random.PRNGKey(0)
    k_src, k_par = jax.random.split(key)
    src = jax.random.normal(k_src, (S, B, d_model), jnp.float32)
    params = prepare_params(
        init_params(k_par, d_model, nhead, dim_feedforward, er_len), d_model, nhead)

    out = transformer_encoder_layer_rpr(src, params, nhead)
    out = jax.block_until_ready(out)
    assert out.shape == (S, B, d_model)
    assert bool(jnp.all(jnp.isfinite(out)))
    print("KERNEL_OK")
</pallas_src>

<mosaic_0001>
module attributes {stable_mosaic.version = 11 : i64} {
  func.func @kern(%arg0: memref<8x128xf32, #tpu.memory_space<vmem>>, %arg1: memref<8x128xf32, #tpu.memory_space<vmem>>) attributes {dimension_semantics = [], scalar_prefetch = 0 : i64, scratch_operands = 0 : i64, tpu.core_type = #tpu.core_type<tc>} {
    %c0 = arith.constant 0 : index
    %c0_0 = arith.constant 0 : index
    %0 = vector.load %arg0[%c0, %c0_0] : memref<8x128xf32, #tpu.memory_space<vmem>>, vector<8x128xf32>
    %c120_i32 = arith.constant 120 : i32
    %1 = tpu.dynamic_rotate %0 by %c120_i32 dim 1 {stride = 1 : si32, stride_dimension = 0 : si32} : vector<8x128xf32>, i32 -> vector<8x128xf32>
    %c0_1 = arith.constant 0 : index
    %c0_2 = arith.constant 0 : index
    %2 = vector.load %arg1[%c0_1, %c0_2] : memref<8x128xf32, #tpu.memory_space<vmem>>, vector<8x128xf32>
    tpu.vector_store %arg1[%c0_1, %c0_2], %1 {strides = array<i32>} : memref<8x128xf32, #tpu.memory_space<vmem>>, vector<8x128xf32>,
    return
  }
}

module attributes {stable_mosaic.version = 11 : i64} {
  func.func @attention_block_kernel(%arg0: i32, %arg1: memref<1x8x32xf32, #tpu.memory_space<vmem>>, %arg2: memref<32x96xbf16, #tpu.memory_space<vmem>>, %arg3: memref<1x96xf32, #tpu.memory_space<vmem>>, %arg4: memref<128x8xbf16, #tpu.memory_space<vmem>>, %arg5: memref<32x32xbf16, #tpu.memory_space<vmem>>, %arg6: memref<1x32xf32, #tpu.memory_space<vmem>>, %arg7: memref<1x32xf32, #tpu.memory_space<vmem>>, %arg8: memref<1x32xf32, #tpu.memory_space<vmem>>, %arg9: memref<1x8x32xf32, #tpu.memory_space<vmem>>, %arg10: memref<8x96xbf16, #tpu.memory_space<vmem>>, %arg11: memref<8x32xbf16, #tpu.memory_space<vmem>>) attributes {dimension_semantics = [#tpu.dimension_semantics<parallel>], iteration_bounds = array<i64: 2>, scalar_prefetch = 0 : i64, scratch_operands = 2 : i64, tpu.core_type = #tpu.core_type<tc>, window_params = [{transform_indices = @transform_0, window_bounds = array<i64: 1, 8, 32>}, {pipeline_mode = #tpu.pipeline_mode<synchronous>, transform_indices = @transform_1, window_bounds = array<i64: 32, 96>}, {pipeline_mode = #tpu.pipeline_mode<synchronous>, transform_indices = @transform_2, window_bounds = array<i64: 1, 96>}, {pipeline_mode = #tpu.pipeline_mode<synchronous>, transform_indices = @transform_3, window_bounds = array<i64: 128, 8>}, {pipeline_mode = #tpu.pipeline_mode<synchronous>, transform_indices = @transform_4, window_bounds = array<i64: 32, 32>}, {pipeline_mode = #tpu.pipeline_mode<synchronous>, transform_indices = @transform_5, window_bounds = array<i64: 1, 32>}, {pipeline_mode = #tpu.pipeline_mode<synchronous>, transform_indices = @transform_6, window_bounds = array<i64: 1, 32>}, {pipeline_mode = #tpu.pipeline_mode<synchronous>, transform_indices = @transform_7, window_bounds = array<i64: 1, 32>}, {transform_indices = @transform_8, window_bounds = array<i64: 1, 8, 32>}]} {
    %c0 = arith.constant 0 : index
    %c0_0 = arith.constant 0 : index
    %c0_1 = arith.constant 0 : index
    %0 = vector.load %arg1[%c0, %c0_0, %c0_1] : memref<1x8x32xf32, #tpu.memory_space<vmem>>, vector<1x8x32xf32>
    %1 = vector.shape_cast %0 : vector<1x8x32xf32> to vector<8x32xf32>
    %2 = arith.truncf %1 : vector<8x32xf32> to vector<8x32xbf16>
    %c0_2 = arith.constant 0 : index
    %c0_3 = arith.constant 0 : index
    %3 = vector.load %arg2[%c0_2, %c0_3] : memref<32x96xbf16, #tpu.memory_space<vmem>>, vector<32x96xbf16>
    %cst = arith.constant dense<0.000000e+00> : vector<8x96xf32>
    %4 = tpu.matmul %2, %3, %cst {dimension_numbers = #tpu.dot_dimension_numbers<[1], [0], [0], [1], [0, 0, 1, 1], [], []>} : vector<8x32xbf16>, vector<32x96xbf16>, vector<8x96xf32> -> vector<8x96xf32>
    %c0_4 = arith.constant 0 : index
    %c0_5 = arith.constant 0 : index
    %5 = vector.load %arg3[%c0_4, %c0_5] : memref<1x96xf32, #tpu.memory_space<vmem>>, vector<1x96xf32>
    %6 = vector.broadcast %5 : vector<1x96xf32> to vector<8x96xf32>
    %7 = arith.addf %4, %6 : vector<8x96xf32>
    %8 = arith.truncf %7 : vector<8x96xf32> to vector<8x96xbf16>
    %c0_6 = arith.constant 0 : index
    %c0_7 = arith.constant 0 : index
    %9 = vector.load %arg10[%c0_6, %c0_7] : memref<8x96xbf16, #tpu.memory_space<vmem>>, vector<8x96xbf16>
    tpu.vector_store %arg10[%c0_6, %c0_7], %8 {strides = array<i32>} : memref<8x96xbf16, #tpu.memory_space<vmem>>, vector<8x96xbf16>,
    %c0_8 = arith.constant 0 : index
    %c0_9 = arith.constant 0 : index
    %10 = vector.load %arg10[%c0_8, %c0_9] : memref<8x96xbf16, #tpu.memory_space<vmem>>, vector<8x8xbf16>
    %c0_10 = arith.constant 0 : index
    %c32 = arith.constant 32 : index
    %11 = vector.load %arg10[%c0_10, %c32] : memref<8x96xbf16, #tpu.memory_space<vmem>>, vector<8x8xbf16>
    %c0_11 = arith.constant 0 : index
    %c64 = arith.constant 64 : index
    %12 = vector.load %arg10[%c0_11, %c64] : memref<8x96xbf16, #tpu.memory_space<vmem>>, vector<8x8xbf16>
    %cst_12 = arith.constant dense<0.000000e+00> : vector<8x8xf32>
    %13 = tpu.matmul %10, %11, %cst_12 {dimension_numbers = #tpu.dot_dimension_numbers<[1], [1], [0], [0], [0, 0, 1, 0], [], []>} : vector<8x8xbf16>, vector<8x8xbf16>, vector<8x8xf32> -> vector<8x8xf32>
    %c0_13 = arith.constant 0 : index
    %c0_14 = arith.constant 0 : index
    %14 = vector.load %arg4[%c0_13, %c0_14] : memref<128x8xbf16, #tpu.memory_space<vmem>>, vector<128x8xbf16>
    %cst_15 = arith.constant dense<0.000000e+00> : vector<8x128xf32>
    %15 = tpu.matmul %10, %14, %cst_15 {dimension_numbers = #tpu.dot_dimension_numbers<[1], [1], [0], [0], [0, 0, 1, 0], [], []>} : vector<8x8xbf16>, vector<128x8xbf16>, vector<8x128xf32> -> vector<8x128xf32>
    %16 = vector.extract_strided_slice %15 {offsets = [0, 8], sizes = [1, 8], strides = [1, 1]} : vector<8x128xf32> to vector<1x8xf32>
    %17 = vector.extract_strided_slice %15 {offsets = [1, 7], sizes = [1, 8], strides = [1, 1]} : vector<8x128xf32> to vector<1x8xf32>
    %18 = vector.extract_strided_slice %15 {offsets = [2, 6], sizes = [1, 8], strides = [1, 1]} : vector<8x128xf32> to vector<1x8xf32>
    %19 = vector.extract_strided_slice %15 {offsets = [3, 5], sizes = [1, 8], strides = [1, 1]} : vector<8x128xf32> to vector<1x8xf32>
    %20 = vector.extract_strided_slice %15 {offsets = [4, 4], sizes = [1, 8], strides = [1, 1]} : vector<8x128xf32> to vector<1x8xf32>
    %21 = vector.extract_strided_slice %15 {offsets = [5, 3], sizes = [1, 8], strides = [1, 1]} : vector<8x128xf32> to vector<1x8xf32>
    %22 = vector.extract_strided_slice %15 {offsets = [6, 2], sizes = [1, 8], strides = [1, 1]} : vector<8x128xf32> to vector<1x8xf32>
    %23 = vector.extract_strided_slice %15 {offsets = [7, 1], sizes = [1, 8], strides = [1, 1]} : vector<8x128xf32> to vector<1x8xf32>
    %24 = tpu.concatenate %16, %17, %18, %19, %20, %21, %22, %23 in 0 : vector<1x8xf32>, vector<1x8xf32>, vector<1x8xf32>, vector<1x8xf32>, vector<1x8xf32>, vector<1x8xf32>, vector<1x8xf32>, vector<1x8xf32> -> vector<8x8xf32>
    %25 = arith.addf %13, %24 : vector<8x8xf32>
    %cst_16 = arith.constant dense<0xFF800000> : vector<8xf32>
    %26 = vector.multi_reduction <maximumf>, %25, %cst_16 [1] : vector<8x8xf32> to vector<8xf32>
    %27 = vector.shape_cast %26 : vector<8xf32> to vector<8x1xf32>
    %28 = vector.broadcast %27 : vector<8x1xf32> to vector<8x8xf32>
    %29 = arith.subf %25, %28 : vector<8x8xf32>
    %30 = math.exp %29 : vector<8x8xf32>
    %cst_17 = arith.constant dense<0.000000e+00> : vector<8xf32>
    %31 = vector.multi_reduction <add>, %30, %cst_17 [1] : vector<8x8xf32> to vector<8xf32>
    %32 = vector.shape_cast %31 : vector<8xf32> to vector<8x1xf32>
    %33 = arith.truncf %30 : vector<8x8xf32> to vector<8x8xbf16>
    %cst_18 = arith.constant dense<0.000000e+00> : vector<8x8xf32>
    %34 = tpu.matmul %33, %12, %cst_18 {dimension_numbers = #tpu.dot_dimension_numbers<[1], [0], [0], [1], [0, 0, 1, 1], [], []>} : vector<8x8xbf16>, vector<8x8xbf16>, vector<8x8xf32> -> vector<8x8xf32>
    %35 = tpu.reciprocal %32 {approx = true} : vector<8x1xf32> -> vector<8x1xf32>
    %36 = vector.broadcast %35 : vector<8x1xf32> to vector<8x8xf32>
    %37 = arith.mulf %34, %36 : vector<8x8xf32>
    %38 = arith.truncf %37 : vector<8x8xf32> to vector<8x8xbf16>
    %c0_19 = arith.constant 0 : index
    %c0_20 = arith.constant 0 : index
    %39 = vector.load %arg11[%c0_19, %c0_20] : memref<8x32xbf16, #tpu.memory_space<vmem>>, vector<8x8xbf16>
    tpu.vector_store %arg11[%c0_19, %c0_20], %38 {strides = array<i32>} : memref<8x32xbf16, #tpu.memory_space<vmem>>, vector<8x8xbf16>,
    %c0_21 = arith.constant 0 : index
    %c8 = arith.constant 8 : index
    %40 = vector.load %arg10[%c0_21, %c8] : memref<8x96xbf16, #tpu.memory_space<vmem>>, vector<8x8xbf16>
    %c0_22 = arith.constant 0 : index
    %c40 = arith.constant 40 : index
    %41 = vector.load %arg10[%c0_22, %c40] : memref<8x96xbf16, #tpu.memory_space<vmem>>, vector<8x8xbf16>
    %c0_23 = arith.constant 0 : index
    %c72 = arith.constant 72 : index
    %42 = vector.load %arg10[%c0_23, %c72] : memref<8x96xbf16, #tpu.memory_space<vmem>>, vector<8x8xbf16>
    %cst_24 = arith.constant dense<0.000000e+00> : vector<8x8xf32>
    %43 = tpu.matmul %40, %41, %cst_24 {dimension_numbers = #tpu.dot_dimension_numbers<[1], [1], [0], [0], [0, 0, 1, 0], [], []>} : vector<8x8xbf16>, vector<8x8xbf16>, vector<8x8xf32> -> vector<8x8xf32>
    %c0_25 = arith.constant 0 : index
    %c0_26 = arith.constant 0 : index
    %44 = vector.load %arg4[%c0_25, %c0_26] : memref<128x8xbf16, #tpu.memory_space<vmem>>, vector<128x8xbf16>
    %cst_27 = arith.constant dense<0.000000e+00> : vector<8x128xf32>
    %45 = tpu.matmul %40, %44, %cst_27 {dimension_numbers = #tpu.dot_dimension_numbers<[1], [1], [0], [0], [0, 0, 1, 0], [], []>} : vector<8x8xbf16>, vector<128x8xbf16>, vector<8x128xf32> -> vector<8x128xf32>
    %46 = vector.extract_strided_slice %45 {offsets = [0, 8], sizes = [1, 8], strides = [1, 1]} : vector<8x128xf32> to vector<1x8xf32>
    %47 = vector.extract_strided_slice %45 {offsets = [1, 7], sizes = [1, 8], strides = [1, 1]} : vector<8x128xf32> to vector<1x8xf32>
    %48 = vector.extract_strided_slice %45 {offsets = [2, 6], sizes = [1, 8], strides = [1, 1]} : vector<8x128xf32> to vector<1x8xf32>
    %49 = vector.extract_strided_slice %45 {offsets = [3, 5], sizes = [1, 8], strides = [1, 1]} : vector<8x128xf32> to vector<1x8xf32>
    %50 = vector.extract_strided_slice %45 {offsets = [4, 4], sizes = [1, 8], strides = [1, 1]} : vector<8x128xf32> to vector<1x8xf32>
    %51 = vector.extract_strided_slice %45 {offsets = [5, 3], sizes = [1, 8], strides = [1, 1]} : vector<8x128xf32> to vector<1x8xf32>
    %52 = vector.extract_strided_slice %45 {offsets = [6, 2], sizes = [1, 8], strides = [1, 1]} : vector<8x128xf32> to vector<1x8xf32>
    %53 = vector.extract_strided_slice %45 {offsets = [7, 1], sizes = [1, 8], strides = [1, 1]} : vector<8x128xf32> to vector<1x8xf32>
    %54 = tpu.concatenate %46, %47, %48, %49, %50, %51, %52, %53 in 0 : vector<1x8xf32>, vector<1x8xf32>, vector<1x8xf32>, vector<1x8xf32>, vector<1x8xf32>, vector<1x8xf32>, vector<1x8xf32>, vector<1x8xf32> -> vector<8x8xf32>
    %55 = arith.addf %43, %54 : vector<8x8xf32>
    %cst_28 = arith.constant dense<0xFF800000> : vector<8xf32>
    %56 = vector.multi_reduction <maximumf>, %55, %cst_28 [1] : vector<8x8xf32> to vector<8xf32>
    %57 = vector.shape_cast %56 : vector<8xf32> to vector<8x1xf32>
    %58 = vector.broadcast %57 : vector<8x1xf32> to vector<8x8xf32>
    %59 = arith.subf %55, %58 : vector<8x8xf32>
    %60 = math.exp %59 : vector<8x8xf32>
    %cst_29 = arith.constant dense<0.000000e+00> : vector<8xf32>
    %61 = vector.multi_reduction <add>, %60, %cst_29 [1] : vector<8x8xf32> to vector<8xf32>
    %62 = vector.shape_cast %61 : vector<8xf32> to vector<8x1xf32>
    %63 = arith.truncf %60 : vector<8x8xf32> to vector<8x8xbf16>
    %cst_30 = arith.constant dense<0.000000e+00> : vector<8x8xf32>
    %64 = tpu.matmul %63, %42, %cst_30 {dimension_numbers = #tpu.dot_dimension_numbers<[1], [0], [0], [1], [0, 0, 1, 1], [], []>} : vector<8x8xbf16>, vector<8x8xbf16>, vector<8x8xf32> -> vector<8x8xf32>
    %65 = tpu.reciprocal %62 {approx = true} : vector<8x1xf32> -> vector<8x1xf32>
    %66 = vector.broadcast %65 : vector<8x1xf32> to vector<8x8xf32>
    %67 = arith.mulf %64, %66 : vector<8x8xf32>
    %68 = arith.truncf %67 : vector<8x8xf32> to vector<8x8xbf16>
    %c0_31 = arith.constant 0 : index
    %c8_32 = arith.constant 8 : index
    %69 = vector.load %arg11[%c0_31, %c8_32] : memref<8x32xbf16, #tpu.memory_space<vmem>>, vector<8x8xbf16>
    tpu.vector_store %arg11[%c0_31, %c8_32], %68 {strides = array<i32>} : memref<8x32xbf16, #tpu.memory_space<vmem>>, vector<8x8xbf16>,
    %c0_33 = arith.constant 0 : index
    %c16 = arith.constant 16 : index
    %70 = vector.load %arg10[%c0_33, %c16] : memref<8x96xbf16, #tpu.memory_space<vmem>>, vector<8x8xbf16>
    %c0_34 = arith.constant 0 : index
    %c48 = arith.constant 48 : index
    %71 = vector.load %arg10[%c0_34, %c48] : memref<8x96xbf16, #tpu.memory_space<vmem>>, vector<8x8xbf16>
    %c0_35 = arith.constant 0 : index
    %c80 = arith.constant 80 : index
    %72 = vector.load %arg10[%c0_35, %c80] : memref<8x96xbf16, #tpu.memory_space<vmem>>, vector<8x8xbf16>
    %cst_36 = arith.constant dense<0.000000e+00> : vector<8x8xf32>
    %73 = tpu.matmul %70, %71, %cst_36 {dimension_numbers = #tpu.dot_dimension_numbers<[1], [1], [0], [0], [0, 0, 1, 0], [], []>} : vector<8x8xbf16>, vector<8x8xbf16>, vector<8x8xf32> -> vector<8x8xf32>
    %c0_37 = arith.constant 0 : index
    %c0_38 = arith.constant 0 : index
    %74 = vector.load %arg4[%c0_37, %c0_38] : memref<128x8xbf16, #tpu.memory_space<vmem>>, vector<128x8xbf16>
    %cst_39 = arith.constant dense<0.000000e+00> : vector<8x128xf32>
    %75 = tpu.matmul %70, %74, %cst_39 {dimension_numbers = #tpu.dot_dimension_numbers<[1], [1], [0], [0], [0, 0, 1, 0], [], []>} : vector<8x8xbf16>, vector<128x8xbf16>, vector<8x128xf32> -> vector<8x128xf32>
    %76 = vector.extract_strided_slice %75 {offsets = [0, 8], sizes = [1, 8], strides = [1, 1]} : vector<8x128xf32> to vector<1x8xf32>
    %77 = vector.extract_strided_slice %75 {offsets = [1, 7], sizes = [1, 8], strides = [1, 1]} : vector<8x128xf32> to vector<1x8xf32>
    %78 = vector.extract_strided_slice %75 {offsets = [2, 6], sizes = [1, 8], strides = [1, 1]} : vector<8x128xf32> to vector<1x8xf32>
    %79 = vector.extract_strided_slice %75 {offsets = [3, 5], sizes = [1, 8], strides = [1, 1]} : vector<8x128xf32> to vector<1x8xf32>
    %80 = vector.extract_strided_slice %75 {offsets = [4, 4], sizes = [1, 8], strides = [1, 1]} : vector<8x128xf32> to vector<1x8xf32>
    %81 = vector.extract_strided_slice %75 {offsets = [5, 3], sizes = [1, 8], strides = [1, 1]} : vector<8x128xf32> to vector<1x8xf32>
    %82 = vector.extract_strided_slice %75 {offsets = [6, 2], sizes = [1, 8], strides = [1, 1]} : vector<8x128xf32> to vector<1x8xf32>
    %83 = vector.extract_strided_slice %75 {offsets = [7, 1], sizes = [1, 8], strides = [1, 1]} : vector<8x128xf32> to vector<1x8xf32>
    %84 = tpu.concatenate %76, %77, %78, %79, %80, %81, %82, %83 in 0 : vector<1x8xf32>, vector<1x8xf32>, vector<1x8xf32>, vector<1x8xf32>, vector<1x8xf32>, vector<1x8xf32>, vector<1x8xf32>, vector<1x8xf32> -> vector<8x8xf32>
    %85 = arith.addf %73, %84 : vector<8x8xf32>
    %cst_40 = arith.constant dense<0xFF800000> : vector<8xf32>
    %86 = vector.multi_reduction <maximumf>, %85, %cst_40 [1] : vector<8x8xf32> to vector<8xf32>
    %87 = vector.shape_cast %86 : vector<8xf32> to vector<8x1xf32>
    %88 = vector.broadcast %87 : vector<8x1xf32> to vector<8x8xf32>
    %89 = arith.subf %85, %88 : vector<8x8xf32>
    %90 = math.exp %89 : vector<8x8xf32>
    %cst_41 = arith.constant dense<0.000000e+00> : vector<8xf32>
    %91 = vector.multi_reduction <add>, %90, %cst_41 [1] : vector<8x8xf32> to vector<8xf32>
    %92 = vector.shape_cast %91 : vector<8xf32> to vector<8x1xf32>
    %93 = arith.truncf %90 : vector<8x8xf32> to vector<8x8xbf16>
    %cst_42 = arith.constant dense<0.000000e+00> : vector<8x8xf32>
    %94 = tpu.matmul %93, %72, %cst_42 {dimension_numbers = #tpu.dot_dimension_numbers<[1], [0], [0], [1], [0, 0, 1, 1], [], []>} : vector<8x8xbf16>, vector<8x8xbf16>, vector<8x8xf32> -> vector<8x8xf32>
    %95 = tpu.reciprocal %92 {approx = true} : vector<8x1xf32> -> vector<8x1xf32>
    %96 = vector.broadcast %95 : vector<8x1xf32> to vector<8x8xf32>
    %97 = arith.mulf %94, %96 : vector<8x8xf32>
    %98 = arith.truncf %97 : vector<8x8xf32> to vector<8x8xbf16>
    %c0_43 = arith.constant 0 : index
    %c16_44 = arith.constant 16 : index
    %99 = vector.load %arg11[%c0_43, %c16_44] : memref<8x32xbf16, #tpu.memory_space<vmem>>, vector<8x8xbf16>
    tpu.vector_store %arg11[%c0_43, %c16_44], %98 {strides = array<i32>} : memref<8x32xbf16, #tpu.memory_space<vmem>>, vector<8x8xbf16>,
    %c0_45 = arith.constant 0 : index
    %c24 = arith.constant 24 : index
    %100 = vector.load %arg10[%c0_45, %c24] : memref<8x96xbf16, #tpu.memory_space<vmem>>, vector<8x8xbf16>
    %c0_46 = arith.constant 0 : index
    %c56 = arith.constant 56 : index
    %101 = vector.load %arg10[%c0_46, %c56] : memref<8x96xbf16, #tpu.memory_space<vmem>>, vector<8x8xbf16>
    %c0_47 = arith.constant 0 : index
    %c88 = arith.constant 88 : index
    %102 = vector.load %arg10[%c0_47, %c88] : memref<8x96xbf16, #tpu.memory_space<vmem>>, vector<8x8xbf16>
    %cst_48 = arith.constant dense<0.000000e+00> : vector<8x8xf32>
    %103 = tpu.matmul %100, %101, %cst_48 {dimension_numbers = #tpu.dot_dimension_numbers<[1], [1], [0], [0], [0, 0, 1, 0], [], []>} : vector<8x8xbf16>, vector<8x8xbf16>, vector<8x8xf32> -> vector<8x8xf32>
    %c0_49 = arith.constant 0 : index
    %c0_50 = arith.constant 0 : index
    %104 = vector.load %arg4[%c0_49, %c0_50] : memref<128x8xbf16, #tpu.memory_space<vmem>>, vector<128x8xbf16>
    %cst_51 = arith.constant dense<0.000000e+00> : vector<8x128xf32>
    %105 = tpu.matmul %100, %104, %cst_51 {dimension_numbers = #tpu.dot_dimension_numbers<[1], [1], [0], [0], [0, 0, 1, 0], [], []>} : vector<8x8xbf16>, vector<128x8xbf16>, vector<8x128xf32> -> vector<8x128xf32>
    %106 = vector.extract_strided_slice %105 {offsets = [0, 8], sizes = [1, 8], strides = [1, 1]} : vector<8x128xf32> to vector<1x8xf32>
    %107 = vector.extract_strided_slice %105 {offsets = [1, 7], sizes = [1, 8], strides = [1, 1]} : vector<8x128xf32> to vector<1x8xf32>
    %108 = vector.extract_strided_slice %105 {offsets = [2, 6], sizes = [1, 8], strides = [1, 1]} : vector<8x128xf32> to vector<1x8xf32>
    %109 = vector.extract_strided_slice %105 {offsets = [3, 5], sizes = [1, 8], strides = [1, 1]} : vector<8x128xf32> to vector<1x8xf32>
    %110 = vector.extract_strided_slice %105 {offsets = [4, 4], sizes = [1, 8], strides = [1, 1]} : vector<8x128xf32> to vector<1x8xf32>
    %111 = vector.extract_strided_slice %105 {offsets = [5, 3], sizes = [1, 8], strides = [1, 1]} : vector<8x128xf32> to vector<1x8xf32>
    %112 = vector.extract_strided_slice %105 {offsets = [6, 2], sizes = [1, 8], strides = [1, 1]} : vector<8x128xf32> to vector<1x8xf32>
    %113 = vector.extract_strided_slice %105 {offsets = [7, 1], sizes = [1, 8], strides = [1, 1]} : vector<8x128xf32> to vector<1x8xf32>
    %114 = tpu.concatenate %106, %107, %108, %109, %110, %111, %112, %113 in 0 : vector<1x8xf32>, vector<1x8xf32>, vector<1x8xf32>, vector<1x8xf32>, vector<1x8xf32>, vector<1x8xf32>, vector<1x8xf32>, vector<1x8xf32> -> vector<8x8xf32>
    %115 = arith.addf %103, %114 : vector<8x8xf32>
    %cst_52 = arith.constant dense<0xFF800000> : vector<8xf32>
    %116 = vector.multi_reduction <maximumf>, %115, %cst_52 [1] : vector<8x8xf32> to vector<8xf32>
    %117 = vector.shape_cast %116 : vector<8xf32> to vector<8x1xf32>
    %118 = vector.broadcast %117 : vector<8x1xf32> to vector<8x8xf32>
    %119 = arith.subf %115, %118 : vector<8x8xf32>
    %120 = math.exp %119 : vector<8x8xf32>
    %cst_53 = arith.constant dense<0.000000e+00> : vector<8xf32>
    %121 = vector.multi_reduction <add>, %120, %cst_53 [1] : vector<8x8xf32> to vector<8xf32>
    %122 = vector.shape_cast %121 : vector<8xf32> to vector<8x1xf32>
    %123 = arith.truncf %120 : vector<8x8xf32> to vector<8x8xbf16>
    %cst_54 = arith.constant dense<0.000000e+00> : vector<8x8xf32>
    %124 = tpu.matmul %123, %102, %cst_54 {dimension_numbers = #tpu.dot_dimension_numbers<[1], [0], [0], [1], [0, 0, 1, 1], [], []>} : vector<8x8xbf16>, vector<8x8xbf16>, vector<8x8xf32> -> vector<8x8xf32>
    %125 = tpu.reciprocal %122 {approx = true} : vector<8x1xf32> -> vector<8x1xf32>
    %126 = vector.broadcast %125 : vector<8x1xf32> to vector<8x8xf32>
    %127 = arith.mulf %124, %126 : vector<8x8xf32>
    %128 = arith.truncf %127 : vector<8x8xf32> to vector<8x8xbf16>
    %c0_55 = arith.constant 0 : index
    %c24_56 = arith.constant 24 : index
    %129 = vector.load %arg11[%c0_55, %c24_56] : memref<8x32xbf16, #tpu.memory_space<vmem>>, vector<8x8xbf16>
    tpu.vector_store %arg11[%c0_55, %c24_56], %128 {strides = array<i32>} : memref<8x32xbf16, #tpu.memory_space<vmem>>, vector<8x8xbf16>,
    %c0_57 = arith.constant 0 : index
    %c0_58 = arith.constant 0 : index
    %130 = vector.load %arg11[%c0_57, %c0_58] : memref<8x32xbf16, #tpu.memory_space<vmem>>, vector<8x32xbf16>
    %c0_59 = arith.constant 0 : index
    %c0_60 = arith.constant 0 : index
    %131 = vector.load %arg5[%c0_59, %c0_60] : memref<32x32xbf16, #tpu.memory_space<vmem>>, vector<32x32xbf16>
    %cst_61 = arith.constant dense<0.000000e+00> : vector<8x32xf32>
    %132 = tpu.matmul %130, %131, %cst_61 {dimension_numbers = #tpu.dot_dimension_numbers<[1], [0], [0], [1], [0, 0, 1, 1], [], []>} : vector<8x32xbf16>, vector<32x32xbf16>, vector<8x32xf32> -> vector<8x32xf32>
    %c0_62 = arith.constant 0 : index
    %c0_63 = arith.constant 0 : index
    %133 = vector.load %arg6[%c0_62, %c0_63] : memref<1x32xf32, #tpu.memory_space<vmem>>, vector<1x32xf32>
    %134 = vector.broadcast %133 : vector<1x32xf32> to vector<8x32xf32>
    %135 = arith.addf %132, %134 : vector<8x32xf32>
    %136 = arith.addf %1, %135 : vector<8x32xf32>
    %cst_64 = arith.constant dense<0.000000e+00> : vector<8xf32>
    %137 = vector.multi_reduction <add>, %136, %cst_64 [1] : vector<8x32xf32> to vector<8xf32>
    %138 = vector.shape_cast %137 : vector<8xf32> to vector<8x1xf32>
    %cst_65 = arith.constant 3.200000e+01 : f32
    %139 = vector.broadcast %cst_65 : f32 to vector<8x1xf32>
    %140 = arith.divf %138, %139 : vector<8x1xf32>
    %141 = vector.broadcast %140 : vector<8x1xf32> to vector<8x32xf32>
    %142 = arith.subf %136, %141 : vector<8x32xf32>
    %143 = arith.mulf %142, %142 : vector<8x32xf32>
    %cst_66 = arith.constant dense<0.000000e+00> : vector<8xf32>
    %144 = vector.multi_reduction <add>, %143, %cst_66 [1] : vector<8x32xf32> to vector<8xf32>
    %145 = vector.shape_cast %144 : vector<8xf32> to vector<8x1xf32>
    %cst_67 = arith.constant 3.200000e+01 : f32
    %146 = vector.broadcast %cst_67 : f32 to vector<8x1xf32>
    %147 = arith.divf %145, %146 : vector<8x1xf32>
    %148 = vector.broadcast %140 : vector<8x1xf32> to vector<8x32xf32>
    %149 = arith.subf %136, %148 : vector<8x32xf32>
    %cst_68 = arith.constant 9.99999974E-6 : f32
    %150 = vector.broadcast %cst_68 : f32 to vector<8x1xf32>
    %151 = arith.addf %147, %150 : vector<8x1xf32>
    %152 = math.rsqrt %151 : vector<8x1xf32>
    %153 = vector.broadcast %152 : vector<8x1xf32> to vector<8x32xf32>
    %154 = arith.mulf %149, %153 : vector<8x32xf32>
    %c0_69 = arith.constant 0 : index
    %c0_70 = arith.constant 0 : index
    %155 = vector.load %arg7[%c0_69, %c0_70] : memref<1x32xf32, #tpu.memory_space<vmem>>, vector<1x32xf32>
    %156 = vector.broadcast %155 : vector<1x32xf32> to vector<8x32xf32>
    %157 = arith.mulf %154, %156 : vector<8x32xf32>
    %c0_71 = arith.constant 0 : index
    %c0_72 = arith.constant 0 : index
    %158 = vector.load %arg8[%c0_71, %c0_72] : memref<1x32xf32, #tpu.memory_space<vmem>>, vector<1x32xf32>
    %159 = vector.broadcast %158 : vector<1x32xf32> to vector<8x32xf32>
    %160 = arith.addf %157, %159 : vector<8x32xf32>
    %c0_73 = arith.constant 0 : index
    %c0_74 = arith.constant 0 : index
    %c0_75 = arith.constant 0 : index
    %161 = vector.load %arg9[%c0_73, %c0_74, %c0_75] : memref<1x8x32xf32, #tpu.memory_space<vmem>>, vector<1x8x32xf32>
    %162 = vector.shape_cast %161 : vector<1x8x32xf32> to vector<8x32xf32>
    %163 = vector.shape_cast %160 : vector<8x32xf32> to vector<1x8x32xf32>
    tpu.vector_store %arg9[%c0_73, %c0_74, %c0_75], %163 {strides = array<i32>} : memref<1x8x32xf32, #tpu.memory_space<vmem>>, vector<1x8x32xf32>,
    return
  }
  func.func @transform_0(%arg0: i32) -> (i32, i32, i32) {
    %c0_i32 = arith.constant 0 : i32
    %c0_i32_0 = arith.constant 0 : i32
    %c0_i32_1 = arith.constant 0 : i32
    return %arg0, %c0_i32, %c0_i32_0 : i32, i32, i32
  }
  func.func @transform_1(%arg0: i32) -> (i32, i32) {
    %c0_i32 = arith.constant 0 : i32
    %c0_i32_0 = arith.constant 0 : i32
    %c0_i32_1 = arith.constant 0 : i32
    return %c0_i32, %c0_i32_0 : i32, i32
  }
  func.func @transform_2(%arg0: i32) -> (i32, i32) {
    %c0_i32 = arith.constant 0 : i32
    %c0_i32_0 = arith.constant 0 : i32
    %c0_i32_1 = arith.constant 0 : i32
    return %c0_i32, %c0_i32_0 : i32, i32
  }
  func.func @transform_3(%arg0: i32) -> (i32, i32) {
    %c0_i32 = arith.constant 0 : i32
    %c0_i32_0 = arith.constant 0 : i32
    %c0_i32_1 = arith.constant 0 : i32
    return %c0_i32, %c0_i32_0 : i32, i32
  }
  func.func @transform_4(%arg0: i32) -> (i32, i32) {
    %c0_i32 = arith.constant 0 : i32
    %c0_i32_0 = arith.constant 0 : i32
    %c0_i32_1 = arith.constant 0 : i32
    return %c0_i32, %c0_i32_0 : i32, i32
  }
  func.func @transform_5(%arg0: i32) -> (i32, i32) {
    %c0_i32 = arith.constant 0 : i32
    %c0_i32_0 = arith.constant 0 : i32
    %c0_i32_1 = arith.constant 0 : i32
    return %c0_i32, %c0_i32_0 : i32, i32
  }
  func.func @transform_6(%arg0: i32) -> (i32, i32) {
    %c0_i32 = arith.constant 0 : i32
    %c0_i32_0 = arith.constant 0 : i32
    %c0_i32_1 = arith.constant 0 : i32
    return %c0_i32, %c0_i32_0 : i32, i32
  }
  func.func @transform_7(%arg0: i32) -> (i32, i32) {
    %c0_i32 = arith.constant 0 : i32
    %c0_i32_0 = arith.constant 0 : i32
    %c0_i32_1 = arith.constant 0 : i32
    return %c0_i32, %c0_i32_0 : i32, i32
  }
  func.func @transform_8(%arg0: i32) -> (i32, i32, i32) {
    %c0_i32 = arith.constant 0 : i32
    %c0_i32_0 = arith.constant 0 : i32
    %c0_i32_1 = arith.constant 0 : i32
    return %arg0, %c0_i32, %c0_i32_0 : i32, i32, i32
  }
}

module attributes {stable_mosaic.version = 11 : i64} {
  func.func @attention_block_kernel(%arg0: i32, %arg1: memref<1x8x32xf32, #tpu.memory_space<vmem>>, %arg2: memref<32x96xbf16, #tpu.memory_space<vmem>>, %arg3: memref<1x96xf32, #tpu.memory_space<vmem>>, %arg4: memref<128x8xbf16, #tpu.memory_space<vmem>>, %arg5: memref<32x32xbf16, #tpu.memory_space<vmem>>, %arg6: memref<1x32xf32, #tpu.memory_space<vmem>>, %arg7: memref<1x32xf32, #tpu.memory_space<vmem>>, %arg8: memref<1x32xf32, #tpu.memory_space<vmem>>, %arg9: memref<1x8x32xf32, #tpu.memory_space<vmem>>, %arg10: memref<8x96xbf16, #tpu.memory_space<vmem>>, %arg11: memref<8x32xbf16, #tpu.memory_space<vmem>>) attributes {dimension_semantics = [#tpu.dimension_semantics<parallel>], iteration_bounds = array<i64: 2>, scalar_prefetch = 0 : i64, scratch_operands = 2 : i64, tpu.core_type = #tpu.core_type<tc>, window_params = [{transform_indices = @transform_0, window_bounds = array<i64: 1, 8, 32>}, {pipeline_mode = #tpu.pipeline_mode<synchronous>, transform_indices = @transform_1, window_bounds = array<i64: 32, 96>}, {pipeline_mode = #tpu.pipeline_mode<synchronous>, transform_indices = @transform_2, window_bounds = array<i64: 1, 96>}, {pipeline_mode = #tpu.pipeline_mode<synchronous>, transform_indices = @transform_3, window_bounds = array<i64: 128, 8>}, {pipeline_mode = #tpu.pipeline_mode<synchronous>, transform_indices = @transform_4, window_bounds = array<i64: 32, 32>}, {pipeline_mode = #tpu.pipeline_mode<synchronous>, transform_indices = @transform_5, window_bounds = array<i64: 1, 32>}, {pipeline_mode = #tpu.pipeline_mode<synchronous>, transform_indices = @transform_6, window_bounds = array<i64: 1, 32>}, {pipeline_mode = #tpu.pipeline_mode<synchronous>, transform_indices = @transform_7, window_bounds = array<i64: 1, 32>}, {transform_indices = @transform_8, window_bounds = array<i64: 1, 8, 32>}]} {
    %c0 = arith.constant 0 : index
    %c0_0 = arith.constant 0 : index
    %c0_1 = arith.constant 0 : index
    %0 = vector.load %arg1[%c0, %c0_0, %c0_1] : memref<1x8x32xf32, #tpu.memory_space<vmem>>, vector<1x8x32xf32>
    %1 = vector.shape_cast %0 : vector<1x8x32xf32> to vector<8x32xf32>
    %2 = arith.truncf %1 : vector<8x32xf32> to vector<8x32xbf16>
    %c0_2 = arith.constant 0 : index
    %c0_3 = arith.constant 0 : index
    %3 = vector.load %arg2[%c0_2, %c0_3] : memref<32x96xbf16, #tpu.memory_space<vmem>>, vector<32x96xbf16>
    %cst = arith.constant dense<0.000000e+00> : vector<8x96xf32>
    %4 = tpu.matmul %2, %3, %cst {dimension_numbers = #tpu.dot_dimension_numbers<[1], [0], [0], [1], [0, 0, 1, 1], [], []>} : vector<8x32xbf16>, vector<32x96xbf16>, vector<8x96xf32> -> vector<8x96xf32>
    %c0_4 = arith.constant 0 : index
    %c0_5 = arith.constant 0 : index
    %5 = vector.load %arg3[%c0_4, %c0_5] : memref<1x96xf32, #tpu.memory_space<vmem>>, vector<1x96xf32>
    %6 = vector.broadcast %5 : vector<1x96xf32> to vector<8x96xf32>
    %7 = arith.addf %4, %6 : vector<8x96xf32>
    %8 = arith.truncf %7 : vector<8x96xf32> to vector<8x96xbf16>
    %c0_6 = arith.constant 0 : index
    %c0_7 = arith.constant 0 : index
    %9 = vector.load %arg10[%c0_6, %c0_7] : memref<8x96xbf16, #tpu.memory_space<vmem>>, vector<8x96xbf16>
    tpu.vector_store %arg10[%c0_6, %c0_7], %8 {strides = array<i32>} : memref<8x96xbf16, #tpu.memory_space<vmem>>, vector<8x96xbf16>,
    %c0_8 = arith.constant 0 : index
    %c0_9 = arith.constant 0 : index
    %10 = vector.load %arg10[%c0_8, %c0_9] : memref<8x96xbf16, #tpu.memory_space<vmem>>, vector<8x8xbf16>
    %c0_10 = arith.constant 0 : index
    %c32 = arith.constant 32 : index
    %11 = vector.load %arg10[%c0_10, %c32] : memref<8x96xbf16, #tpu.memory_space<vmem>>, vector<8x8xbf16>
    %c0_11 = arith.constant 0 : index
    %c64 = arith.constant 64 : index
    %12 = vector.load %arg10[%c0_11, %c64] : memref<8x96xbf16, #tpu.memory_space<vmem>>, vector<8x8xbf16>
    %cst_12 = arith.constant dense<0.000000e+00> : vector<8x8xf32>
    %13 = tpu.matmul %10, %11, %cst_12 {dimension_numbers = #tpu.dot_dimension_numbers<[1], [1], [0], [0], [0, 0, 1, 0], [], []>} : vector<8x8xbf16>, vector<8x8xbf16>, vector<8x8xf32> -> vector<8x8xf32>
    %c0_13 = arith.constant 0 : index
    %c0_14 = arith.constant 0 : index
    %14 = vector.load %arg4[%c0_13, %c0_14] : memref<128x8xbf16, #tpu.memory_space<vmem>>, vector<128x8xbf16>
    %cst_15 = arith.constant dense<0.000000e+00> : vector<8x128xf32>
    %15 = tpu.matmul %10, %14, %cst_15 {dimension_numbers = #tpu.dot_dimension_numbers<[1], [1], [0], [0], [0, 0, 1, 0], [], []>} : vector<8x8xbf16>, vector<128x8xbf16>, vector<8x128xf32> -> vector<8x128xf32>
    %16 = vector.extract_strided_slice %15 {offsets = [0, 8], sizes = [1, 8], strides = [1, 1]} : vector<8x128xf32> to vector<1x8xf32>
    %17 = vector.extract_strided_slice %15 {offsets = [1, 7], sizes = [1, 8], strides = [1, 1]} : vector<8x128xf32> to vector<1x8xf32>
    %18 = vector.extract_strided_slice %15 {offsets = [2, 6], sizes = [1, 8], strides = [1, 1]} : vector<8x128xf32> to vector<1x8xf32>
    %19 = vector.extract_strided_slice %15 {offsets = [3, 5], sizes = [1, 8], strides = [1, 1]} : vector<8x128xf32> to vector<1x8xf32>
    %20 = vector.extract_strided_slice %15 {offsets = [4, 4], sizes = [1, 8], strides = [1, 1]} : vector<8x128xf32> to vector<1x8xf32>
    %21 = vector.extract_strided_slice %15 {offsets = [5, 3], sizes = [1, 8], strides = [1, 1]} : vector<8x128xf32> to vector<1x8xf32>
    %22 = vector.extract_strided_slice %15 {offsets = [6, 2], sizes = [1, 8], strides = [1, 1]} : vector<8x128xf32> to vector<1x8xf32>
    %23 = vector.extract_strided_slice %15 {offsets = [7, 1], sizes = [1, 8], strides = [1, 1]} : vector<8x128xf32> to vector<1x8xf32>
    %24 = tpu.concatenate %16, %17, %18, %19, %20, %21, %22, %23 in 0 : vector<1x8xf32>, vector<1x8xf32>, vector<1x8xf32>, vector<1x8xf32>, vector<1x8xf32>, vector<1x8xf32>, vector<1x8xf32>, vector<1x8xf32> -> vector<8x8xf32>
    %25 = arith.addf %13, %24 : vector<8x8xf32>
    %cst_16 = arith.constant dense<0xFF800000> : vector<8xf32>
    %26 = vector.multi_reduction <maximumf>, %25, %cst_16 [1] : vector<8x8xf32> to vector<8xf32>
    %27 = vector.shape_cast %26 : vector<8xf32> to vector<8x1xf32>
    %28 = vector.broadcast %27 : vector<8x1xf32> to vector<8x8xf32>
    %29 = arith.subf %25, %28 : vector<8x8xf32>
    %30 = math.exp %29 : vector<8x8xf32>
    %cst_17 = arith.constant dense<0.000000e+00> : vector<8xf32>
    %31 = vector.multi_reduction <add>, %30, %cst_17 [1] : vector<8x8xf32> to vector<8xf32>
    %32 = vector.shape_cast %31 : vector<8xf32> to vector<8x1xf32>
    %33 = arith.truncf %30 : vector<8x8xf32> to vector<8x8xbf16>
    %cst_18 = arith.constant dense<0.000000e+00> : vector<8x8xf32>
    %34 = tpu.matmul %33, %12, %cst_18 {dimension_numbers = #tpu.dot_dimension_numbers<[1], [0], [0], [1], [0, 0, 1, 1], [], []>} : vector<8x8xbf16>, vector<8x8xbf16>, vector<8x8xf32> -> vector<8x8xf32>
    %35 = tpu.reciprocal %32 {approx = true} : vector<8x1xf32> -> vector<8x1xf32>
    %36 = vector.broadcast %35 : vector<8x1xf32> to vector<8x8xf32>
    %37 = arith.mulf %34, %36 : vector<8x8xf32>
    %38 = arith.truncf %37 : vector<8x8xf32> to vector<8x8xbf16>
    %c0_19 = arith.constant 0 : index
    %c0_20 = arith.constant 0 : index
    %39 = vector.load %arg11[%c0_19, %c0_20] : memref<8x32xbf16, #tpu.memory_space<vmem>>, vector<8x8xbf16>
    tpu.vector_store %arg11[%c0_19, %c0_20], %38 {strides = array<i32>} : memref<8x32xbf16, #tpu.memory_space<vmem>>, vector<8x8xbf16>,
    %c0_21 = arith.constant 0 : index
    %c8 = arith.constant 8 : index
    %40 = vector.load %arg10[%c0_21, %c8] : memref<8x96xbf16, #tpu.memory_space<vmem>>, vector<8x8xbf16>
    %c0_22 = arith.constant 0 : index
    %c40 = arith.constant 40 : index
    %41 = vector.load %arg10[%c0_22, %c40] : memref<8x96xbf16, #tpu.memory_space<vmem>>, vector<8x8xbf16>
    %c0_23 = arith.constant 0 : index
    %c72 = arith.constant 72 : index
    %42 = vector.load %arg10[%c0_23, %c72] : memref<8x96xbf16, #tpu.memory_space<vmem>>, vector<8x8xbf16>
    %cst_24 = arith.constant dense<0.000000e+00> : vector<8x8xf32>
    %43 = tpu.matmul %40, %41, %cst_24 {dimension_numbers = #tpu.dot_dimension_numbers<[1], [1], [0], [0], [0, 0, 1, 0], [], []>} : vector<8x8xbf16>, vector<8x8xbf16>, vector<8x8xf32> -> vector<8x8xf32>
    %c0_25 = arith.constant 0 : index
    %c0_26 = arith.constant 0 : index
    %44 = vector.load %arg4[%c0_25, %c0_26] : memref<128x8xbf16, #tpu.memory_space<vmem>>, vector<128x8xbf16>
    %cst_27 = arith.constant dense<0.000000e+00> : vector<8x128xf32>
    %45 = tpu.matmul %40, %44, %cst_27 {dimension_numbers = #tpu.dot_dimension_numbers<[1], [1], [0], [0], [0, 0, 1, 0], [], []>} : vector<8x8xbf16>, vector<128x8xbf16>, vector<8x128xf32> -> vector<8x128xf32>
    %46 = vector.extract_strided_slice %45 {offsets = [0, 8], sizes = [1, 8], strides = [1, 1]} : vector<8x128xf32> to vector<1x8xf32>
    %47 = vector.extract_strided_slice %45 {offsets = [1, 7], sizes = [1, 8], strides = [1, 1]} : vector<8x128xf32> to vector<1x8xf32>
    %48 = vector.extract_strided_slice %45 {offsets = [2, 6], sizes = [1, 8], strides = [1, 1]} : vector<8x128xf32> to vector<1x8xf32>
    %49 = vector.extract_strided_slice %45 {offsets = [3, 5], sizes = [1, 8], strides = [1, 1]} : vector<8x128xf32> to vector<1x8xf32>
    %50 = vector.extract_strided_slice %45 {offsets = [4, 4], sizes = [1, 8], strides = [1, 1]} : vector<8x128xf32> to vector<1x8xf32>
    %51 = vector.extract_strided_slice %45 {offsets = [5, 3], sizes = [1, 8], strides = [1, 1]} : vector<8x128xf32> to vector<1x8xf32>
    %52 = vector.extract_strided_slice %45 {offsets = [6, 2], sizes = [1, 8], strides = [1, 1]} : vector<8x128xf32> to vector<1x8xf32>
    %53 = vector.extract_strided_slice %45 {offsets = [7, 1], sizes = [1, 8], strides = [1, 1]} : vector<8x128xf32> to vector<1x8xf32>
    %54 = tpu.concatenate %46, %47, %48, %49, %50, %51, %52, %53 in 0 : vector<1x8xf32>, vector<1x8xf32>, vector<1x8xf32>, vector<1x8xf32>, vector<1x8xf32>, vector<1x8xf32>, vector<1x8xf32>, vector<1x8xf32> -> vector<8x8xf32>
    %55 = arith.addf %43, %54 : vector<8x8xf32>
    %cst_28 = arith.constant dense<0xFF800000> : vector<8xf32>
    %56 = vector.multi_reduction <maximumf>, %55, %cst_28 [1] : vector<8x8xf32> to vector<8xf32>
    %57 = vector.shape_cast %56 : vector<8xf32> to vector<8x1xf32>
    %58 = vector.broadcast %57 : vector<8x1xf32> to vector<8x8xf32>
    %59 = arith.subf %55, %58 : vector<8x8xf32>
    %60 = math.exp %59 : vector<8x8xf32>
    %cst_29 = arith.constant dense<0.000000e+00> : vector<8xf32>
    %61 = vector.multi_reduction <add>, %60, %cst_29 [1] : vector<8x8xf32> to vector<8xf32>
    %62 = vector.shape_cast %61 : vector<8xf32> to vector<8x1xf32>
    %63 = arith.truncf %60 : vector<8x8xf32> to vector<8x8xbf16>
    %cst_30 = arith.constant dense<0.000000e+00> : vector<8x8xf32>
    %64 = tpu.matmul %63, %42, %cst_30 {dimension_numbers = #tpu.dot_dimension_numbers<[1], [0], [0], [1], [0, 0, 1, 1], [], []>} : vector<8x8xbf16>, vector<8x8xbf16>, vector<8x8xf32> -> vector<8x8xf32>
    %65 = tpu.reciprocal %62 {approx = true} : vector<8x1xf32> -> vector<8x1xf32>
    %66 = vector.broadcast %65 : vector<8x1xf32> to vector<8x8xf32>
    %67 = arith.mulf %64, %66 : vector<8x8xf32>
    %68 = arith.truncf %67 : vector<8x8xf32> to vector<8x8xbf16>
    %c0_31 = arith.constant 0 : index
    %c8_32 = arith.constant 8 : index
    %69 = vector.load %arg11[%c0_31, %c8_32] : memref<8x32xbf16, #tpu.memory_space<vmem>>, vector<8x8xbf16>
    tpu.vector_store %arg11[%c0_31, %c8_32], %68 {strides = array<i32>} : memref<8x32xbf16, #tpu.memory_space<vmem>>, vector<8x8xbf16>,
    %c0_33 = arith.constant 0 : index
    %c16 = arith.constant 16 : index
    %70 = vector.load %arg10[%c0_33, %c16] : memref<8x96xbf16, #tpu.memory_space<vmem>>, vector<8x8xbf16>
    %c0_34 = arith.constant 0 : index
    %c48 = arith.constant 48 : index
    %71 = vector.load %arg10[%c0_34, %c48] : memref<8x96xbf16, #tpu.memory_space<vmem>>, vector<8x8xbf16>
    %c0_35 = arith.constant 0 : index
    %c80 = arith.constant 80 : index
    %72 = vector.load %arg10[%c0_35, %c80] : memref<8x96xbf16, #tpu.memory_space<vmem>>, vector<8x8xbf16>
    %cst_36 = arith.constant dense<0.000000e+00> : vector<8x8xf32>
    %73 = tpu.matmul %70, %71, %cst_36 {dimension_numbers = #tpu.dot_dimension_numbers<[1], [1], [0], [0], [0, 0, 1, 0], [], []>} : vector<8x8xbf16>, vector<8x8xbf16>, vector<8x8xf32> -> vector<8x8xf32>
    %c0_37 = arith.constant 0 : index
    %c0_38 = arith.constant 0 : index
    %74 = vector.load %arg4[%c0_37, %c0_38] : memref<128x8xbf16, #tpu.memory_space<vmem>>, vector<128x8xbf16>
    %cst_39 = arith.constant dense<0.000000e+00> : vector<8x128xf32>
    %75 = tpu.matmul %70, %74, %cst_39 {dimension_numbers = #tpu.dot_dimension_numbers<[1], [1], [0], [0], [0, 0, 1, 0], [], []>} : vector<8x8xbf16>, vector<128x8xbf16>, vector<8x128xf32> -> vector<8x128xf32>
    %76 = vector.extract_strided_slice %75 {offsets = [0, 8], sizes = [1, 8], strides = [1, 1]} : vector<8x128xf32> to vector<1x8xf32>
    %77 = vector.extract_strided_slice %75 {offsets = [1, 7], sizes = [1, 8], strides = [1, 1]} : vector<8x128xf32> to vector<1x8xf32>
    %78 = vector.extract_strided_slice %75 {offsets = [2, 6], sizes = [1, 8], strides = [1, 1]} : vector<8x128xf32> to vector<1x8xf32>
    %79 = vector.extract_strided_slice %75 {offsets = [3, 5], sizes = [1, 8], strides = [1, 1]} : vector<8x128xf32> to vector<1x8xf32>
    %80 = vector.extract_strided_slice %75 {offsets = [4, 4], sizes = [1, 8], strides = [1, 1]} : vector<8x128xf32> to vector<1x8xf32>
    %81 = vector.extract_strided_slice %75 {offsets = [5, 3], sizes = [1, 8], strides = [1, 1]} : vector<8x128xf32> to vector<1x8xf32>
    %82 = vector.extract_strided_slice %75 {offsets = [6, 2], sizes = [1, 8], strides = [1, 1]} : vector<8x128xf32> to vector<1x8xf32>
    %83 = vector.extract_strided_slice %75 {offsets = [7, 1], sizes = [1, 8], strides = [1, 1]} : vector<8x128xf32> to vector<1x8xf32>
    %84 = tpu.concatenate %76, %77, %78, %79, %80, %81, %82, %83 in 0 : vector<1x8xf32>, vector<1x8xf32>, vector<1x8xf32>, vector<1x8xf32>, vector<1x8xf32>, vector<1x8xf32>, vector<1x8xf32>, vector<1x8xf32> -> vector<8x8xf32>
    %85 = arith.addf %73, %84 : vector<8x8xf32>
    %cst_40 = arith.constant dense<0xFF800000> : vector<8xf32>
    %86 = vector.multi_reduction <maximumf>, %85, %cst_40 [1] : vector<8x8xf32> to vector<8xf32>
    %87 = vector.shape_cast %86 : vector<8xf32> to vector<8x1xf32>
    %88 = vector.broadcast %87 : vector<8x1xf32> to vector<8x8xf32>
    %89 = arith.subf %85, %88 : vector<8x8xf32>
    %90 = math.exp %89 : vector<8x8xf32>
    %cst_41 = arith.constant dense<0.000000e+00> : vector<8xf32>
    %91 = vector.multi_reduction <add>, %90, %cst_41 [1] : vector<8x8xf32> to vector<8xf32>
    %92 = vector.shape_cast %91 : vector<8xf32> to vector<8x1xf32>
    %93 = arith.truncf %90 : vector<8x8xf32> to vector<8x8xbf16>
    %cst_42 = arith.constant dense<0.000000e+00> : vector<8x8xf32>
    %94 = tpu.matmul %93, %72, %cst_42 {dimension_numbers = #tpu.dot_dimension_numbers<[1], [0], [0], [1], [0, 0, 1, 1], [], []>} : vector<8x8xbf16>, vector<8x8xbf16>, vector<8x8xf32> -> vector<8x8xf32>
    %95 = tpu.reciprocal %92 {approx = true} : vector<8x1xf32> -> vector<8x1xf32>
    %96 = vector.broadcast %95 : vector<8x1xf32> to vector<8x8xf32>
    %97 = arith.mulf %94, %96 : vector<8x8xf32>
    %98 = arith.truncf %97 : vector<8x8xf32> to vector<8x8xbf16>
    %c0_43 = arith.constant 0 : index
    %c16_44 = arith.constant 16 : index
    %99 = vector.load %arg11[%c0_43, %c16_44] : memref<8x32xbf16, #tpu.memory_space<vmem>>, vector<8x8xbf16>
    tpu.vector_store %arg11[%c0_43, %c16_44], %98 {strides = array<i32>} : memref<8x32xbf16, #tpu.memory_space<vmem>>, vector<8x8xbf16>,
    %c0_45 = arith.constant 0 : index
    %c24 = arith.constant 24 : index
    %100 = vector.load %arg10[%c0_45, %c24] : memref<8x96xbf16, #tpu.memory_space<vmem>>, vector<8x8xbf16>
    %c0_46 = arith.constant 0 : index
    %c56 = arith.constant 56 : index
    %101 = vector.load %arg10[%c0_46, %c56] : memref<8x96xbf16, #tpu.memory_space<vmem>>, vector<8x8xbf16>
    %c0_47 = arith.constant 0 : index
    %c88 = arith.constant 88 : index
    %102 = vector.load %arg10[%c0_47, %c88] : memref<8x96xbf16, #tpu.memory_space<vmem>>, vector<8x8xbf16>
    %cst_48 = arith.constant dense<0.000000e+00> : vector<8x8xf32>
    %103 = tpu.matmul %100, %101, %cst_48 {dimension_numbers = #tpu.dot_dimension_numbers<[1], [1], [0], [0], [0, 0, 1, 0], [], []>} : vector<8x8xbf16>, vector<8x8xbf16>, vector<8x8xf32> -> vector<8x8xf32>
    %c0_49 = arith.constant 0 : index
    %c0_50 = arith.constant 0 : index
    %104 = vector.load %arg4[%c0_49, %c0_50] : memref<128x8xbf16, #tpu.memory_space<vmem>>, vector<128x8xbf16>
    %cst_51 = arith.constant dense<0.000000e+00> : vector<8x128xf32>
    %105 = tpu.matmul %100, %104, %cst_51 {dimension_numbers = #tpu.dot_dimension_numbers<[1], [1], [0], [0], [0, 0, 1, 0], [], []>} : vector<8x8xbf16>, vector<128x8xbf16>, vector<8x128xf32> -> vector<8x128xf32>
    %106 = vector.extract_strided_slice %105 {offsets = [0, 8], sizes = [1, 8], strides = [1, 1]} : vector<8x128xf32> to vector<1x8xf32>
    %107 = vector.extract_strided_slice %105 {offsets = [1, 7], sizes = [1, 8], strides = [1, 1]} : vector<8x128xf32> to vector<1x8xf32>
    %108 = vector.extract_strided_slice %105 {offsets = [2, 6], sizes = [1, 8], strides = [1, 1]} : vector<8x128xf32> to vector<1x8xf32>
    %109 = vector.extract_strided_slice %105 {offsets = [3, 5], sizes = [1, 8], strides = [1, 1]} : vector<8x128xf32> to vector<1x8xf32>
    %110 = vector.extract_strided_slice %105 {offsets = [4, 4], sizes = [1, 8], strides = [1, 1]} : vector<8x128xf32> to vector<1x8xf32>
    %111 = vector.extract_strided_slice %105 {offsets = [5, 3], sizes = [1, 8], strides = [1, 1]} : vector<8x128xf32> to vector<1x8xf32>
    %112 = vector.extract_strided_slice %105 {offsets = [6, 2], sizes = [1, 8], strides = [1, 1]} : vector<8x128xf32> to vector<1x8xf32>
    %113 = vector.extract_strided_slice %105 {offsets = [7, 1], sizes = [1, 8], strides = [1, 1]} : vector<8x128xf32> to vector<1x8xf32>
    %114 = tpu.concatenate %106, %107, %108, %109, %110, %111, %112, %113 in 0 : vector<1x8xf32>, vector<1x8xf32>, vector<1x8xf32>, vector<1x8xf32>, vector<1x8xf32>, vector<1x8xf32>, vector<1x8xf32>, vector<1x8xf32> -> vector<8x8xf32>
    %115 = arith.addf %103, %114 : vector<8x8xf32>
    %cst_52 = arith.constant dense<0xFF800000> : vector<8xf32>
    %116 = vector.multi_reduction <maximumf>, %115, %cst_52 [1] : vector<8x8xf32> to vector<8xf32>
    %117 = vector.shape_cast %116 : vector<8xf32> to vector<8x1xf32>
    %118 = vector.broadcast %117 : vector<8x1xf32> to vector<8x8xf32>
    %119 = arith.subf %115, %118 : vector<8x8xf32>
    %120 = math.exp %119 : vector<8x8xf32>
    %cst_53 = arith.constant dense<0.000000e+00> : vector<8xf32>
    %121 = vector.multi_reduction <add>, %120, %cst_53 [1] : vector<8x8xf32> to vector<8xf32>
    %122 = vector.shape_cast %121 : vector<8xf32> to vector<8x1xf32>
    %123 = arith.truncf %120 : vector<8x8xf32> to vector<8x8xbf16>
    %cst_54 = arith.constant dense<0.000000e+00> : vector<8x8xf32>
    %124 = tpu.matmul %123, %102, %cst_54 {dimension_numbers = #tpu.dot_dimension_numbers<[1], [0], [0], [1], [0, 0, 1, 1], [], []>} : vector<8x8xbf16>, vector<8x8xbf16>, vector<8x8xf32> -> vector<8x8xf32>
    %125 = tpu.reciprocal %122 {approx = true} : vector<8x1xf32> -> vector<8x1xf32>
    %126 = vector.broadcast %125 : vector<8x1xf32> to vector<8x8xf32>
    %127 = arith.mulf %124, %126 : vector<8x8xf32>
    %128 = arith.truncf %127 : vector<8x8xf32> to vector<8x8xbf16>
    %c0_55 = arith.constant 0 : index
    %c24_56 = arith.constant 24 : index
    %129 = vector.load %arg11[%c0_55, %c24_56] : memref<8x32xbf16, #tpu.memory_space<vmem>>, vector<8x8xbf16>
    tpu.vector_store %arg11[%c0_55, %c24_56], %128 {strides = array<i32>} : memref<8x32xbf16, #tpu.memory_space<vmem>>, vector<8x8xbf16>,
    %c0_57 = arith.constant 0 : index
    %c0_58 = arith.constant 0 : index
    %130 = vector.load %arg11[%c0_57, %c0_58] : memref<8x32xbf16, #tpu.memory_space<vmem>>, vector<8x32xbf16>
    %c0_59 = arith.constant 0 : index
    %c0_60 = arith.constant 0 : index
    %131 = vector.load %arg5[%c0_59, %c0_60] : memref<32x32xbf16, #tpu.memory_space<vmem>>, vector<32x32xbf16>
    %cst_61 = arith.constant dense<0.000000e+00> : vector<8x32xf32>
    %132 = tpu.matmul %130, %131, %cst_61 {dimension_numbers = #tpu.dot_dimension_numbers<[1], [0], [0], [1], [0, 0, 1, 1], [], []>} : vector<8x32xbf16>, vector<32x32xbf16>, vector<8x32xf32> -> vector<8x32xf32>
    %c0_62 = arith.constant 0 : index
    %c0_63 = arith.constant 0 : index
    %133 = vector.load %arg6[%c0_62, %c0_63] : memref<1x32xf32, #tpu.memory_space<vmem>>, vector<1x32xf32>
    %134 = vector.broadcast %133 : vector<1x32xf32> to vector<8x32xf32>
    %135 = arith.addf %132, %134 : vector<8x32xf32>
    %136 = arith.addf %1, %135 : vector<8x32xf32>
    %cst_64 = arith.constant dense<0.000000e+00> : vector<8xf32>
    %137 = vector.multi_reduction <add>, %136, %cst_64 [1] : vector<8x32xf32> to vector<8xf32>
    %138 = vector.shape_cast %137 : vector<8xf32> to vector<8x1xf32>
    %cst_65 = arith.constant 3.200000e+01 : f32
    %139 = vector.broadcast %cst_65 : f32 to vector<8x1xf32>
    %140 = arith.divf %138, %139 : vector<8x1xf32>
    %141 = vector.broadcast %140 : vector<8x1xf32> to vector<8x32xf32>
    %142 = arith.subf %136, %141 : vector<8x32xf32>
    %143 = arith.mulf %142, %142 : vector<8x32xf32>
    %cst_66 = arith.constant dense<0.000000e+00> : vector<8xf32>
    %144 = vector.multi_reduction <add>, %143, %cst_66 [1] : vector<8x32xf32> to vector<8xf32>
    %145 = vector.shape_cast %144 : vector<8xf32> to vector<8x1xf32>
    %cst_67 = arith.constant 3.200000e+01 : f32
    %146 = vector.broadcast %cst_67 : f32 to vector<8x1xf32>
    %147 = arith.divf %145, %146 : vector<8x1xf32>
    %148 = vector.broadcast %140 : vector<8x1xf32> to vector<8x32xf32>
    %149 = arith.subf %136, %148 : vector<8x32xf32>
    %cst_68 = arith.constant 9.99999974E-6 : f32
    %150 = vector.broadcast %cst_68 : f32 to vector<8x1xf32>
    %151 = arith.addf %147, %150 : vector<8x1xf32>
    %152 = math.rsqrt %151 : vector<8x1xf32>
    %153 = vector.broadcast %152 : vector<8x1xf32> to vector<8x32xf32>
    %154 = arith.mulf %149, %153 : vector<8x32xf32>
    %c0_69 = arith.constant 0 : index
    %c0_70 = arith.constant 0 : index
    %155 = vector.load %arg7[%c0_69, %c0_70] : memref<1x32xf32, #tpu.memory_space<vmem>>, vector<1x32xf32>
    %156 = vector.broadcast %155 : vector<1x32xf32> to vector<8x32xf32>
    %157 = arith.mulf %154, %156 : vector<8x32xf32>
    %c0_71 = arith.constant 0 : index
    %c0_72 = arith.constant 0 : index
    %158 = vector.load %arg8[%c0_71, %c0_72] : memref<1x32xf32, #tpu.memory_space<vmem>>, vector<1x32xf32>
    %159 = vector.broadcast %158 : vector<1x32xf32> to vector<8x32xf32>
    %160 = arith.addf %157, %159 : vector<8x32xf32>
    %c0_73 = arith.constant 0 : index
    %c0_74 = arith.constant 0 : index
    %c0_75 = arith.constant 0 : index
    %161 = vector.load %arg9[%c0_73, %c0_74, %c0_75] : memref<1x8x32xf32, #tpu.memory_space<vmem>>, vector<1x8x32xf32>
    %162 = vector.shape_cast %161 : vector<1x8x32xf32> to vector<8x32xf32>
    %163 = vector.shape_cast %160 : vector<8x32xf32> to vector<1x8x32xf32>
    tpu.vector_store %arg9[%c0_73, %c0_74, %c0_75], %163 {strides = array<i32>} : memref<1x8x32xf32, #tpu.memory_space<vmem>>, vector<1x8x32xf32>,
    return
  }
  func.func @transform_0(%arg0: i32) -> (i32, i32, i32) {
    %c0_i32 = arith.constant 0 : i32
    %c0_i32_0 = arith.constant 0 : i32
    %c0_i32_1 = arith.constant 0 : i32
    return %arg0, %c0_i32, %c0_i32_0 : i32, i32, i32
  }
  func.func @transform_1(%arg0: i32) -> (i32, i32) {
    %c0_i32 = arith.constant 0 : i32
    %c0_i32_0 = arith.constant 0 : i32
    %c0_i32_1 = arith.constant 0 : i32
    return %c0_i32, %c0_i32_0 : i32, i32
  }
  func.func @transform_2(%arg0: i32) -> (i32, i32) {
    %c0_i32 = arith.constant 0 : i32
    %c0_i32_0 = arith.constant 0 : i32
    %c0_i32_1 = arith.constant 0 : i32
    return %c0_i32, %c0_i32_0 : i32, i32
  }
  func.func @transform_3(%arg0: i32) -> (i32, i32) {
    %c0_i32 = arith.constant 0 : i32
    %c0_i32_0 = arith.constant 0 : i32
    %c0_i32_1 = arith.constant 0 : i32
    return %c0_i32, %c0_i32_0 : i32, i32
  }
  func.func @transform_4(%arg0: i32) -> (i32, i32) {
    %c0_i32 = arith.constant 0 : i32
    %c0_i32_0 = arith.constant 0 : i32
    %c0_i32_1 = arith.constant 0 : i32
    return %c0_i32, %c0_i32_0 : i32, i32
  }
  func.func @transform_5(%arg0: i32) -> (i32, i32) {
    %c0_i32 = arith.constant 0 : i32
    %c0_i32_0 = arith.constant 0 : i32
    %c0_i32_1 = arith.constant 0 : i32
    return %c0_i32, %c0_i32_0 : i32, i32
  }
  func.func @transform_6(%arg0: i32) -> (i32, i32) {
    %c0_i32 = arith.constant 0 : i32
    %c0_i32_0 = arith.constant 0 : i32
    %c0_i32_1 = arith.constant 0 : i32
    return %c0_i32, %c0_i32_0 : i32, i32
  }
  func.func @transform_7(%arg0: i32) -> (i32, i32) {
    %c0_i32 = arith.constant 0 : i32
    %c0_i32_0 = arith.constant 0 : i32
    %c0_i32_1 = arith.constant 0 : i32
    return %c0_i32, %c0_i32_0 : i32, i32
  }
  func.func @transform_8(%arg0: i32) -> (i32, i32, i32) {
    %c0_i32 = arith.constant 0 : i32
    %c0_i32_0 = arith.constant 0 : i32
    %c0_i32_1 = arith.constant 0 : i32
    return %arg0, %c0_i32, %c0_i32_0 : i32, i32, i32
  }
}

</mosaic_0001>

<bundles_post_ra>
// kernel: tpu_custom_call.1
= control target key start
LH: loop header
LB: loop body
LE: loop exit
PB: predicated region body
PF: predicated region fallthrough
CT: control target
= control target key end

     0   :  { %6 = vsyncpa [#allocation3], 0  ;;  %s130_s0 = inlined_call_operand.hbm [shape: f32[8,128], index: 0, kind: input, shape index: {}]   ;;  %s131_s1 = inlined_call_operand.hbm [shape: f32[8,128], index: 1, kind: output, shape index: {}]  }
   0x1   :  { %7 = vsyncpa [#allocation4], 0  ;;  %s93_s6 = smov [#allocation2]   ;;  %s45_s10 = scalar_lea.hbm %s130_s0, 128 }
   0x2   :  { %s14_s7 = sshll.u32 %s93_s6, 4  ;;  %p46_p0 = scmp.ne.s32.totalorder %s130_s0, %s45_s10  ;;  %s15_s7 = int_to_ptr.vmem [resolvable:$true] %s14_s7 }
   0x3   :  { %p49_p1 = scmp.lt.u32.totalorder %s45_s10, %s130_s0 }
   0x5   :  { %p51_p2 = pnand %p49_p1, %p46_p0 }
   0x7   :  { %54 = shalt.err (!%p51_p2)
}
   0x8   :  { %s55_s15 = scalar_lea.vmem %s15_s7, 128  ;;  %p60_p4 = scmp.lt.s32.totalorder %s15_s7, %s15_s7 }
   0x9   :  { %p56_p3 = scmp.ne.s32.totalorder %s15_s7, %s55_s15  ;;  %p61_p5 = scmp.lt.s32.totalorder %s55_s15, %s55_s15 }
   0xb   :  { %p62_p6 = por %p61_p5, %p60_p4 }
   0xd   :  { %p63_p7 = pnand %p62_p6, %p56_p3 }
   0xf   :  { %66 = shalt.err (!%p63_p7)
}
  0x10   :  { %17 = dma.hbm_to_vmem [thread:$0]  %s130_s0, 128, %s15_s7, [#allocation3]  }
  0x11   :  { %89 = dma.done.wait [#allocation3], 128  }
  0x12   :  { %90 = vsyncadd [#allocation3], 4294967168  ;;  %v21_v0 = vld [vmem:[#allocation2] sm:$0xff]  ;;  %s94_s18 = smov 376   ;;  %s95_s19 = smov [#allocation5]  }
  0x13   :  { %24 = vrot.lane.b32.xlu0 %v21_v0, %s94_s18  ;;  %s33_s20 = sshll.u32 %s95_s19, 4  ;;  %s34_s20 = int_to_ptr.vmem [resolvable:$true] %s33_s20 }
  0x14   :  { %s67_s21 = scalar_lea.vmem %s34_s20, 128  ;;  %p72_p9 = scmp.lt.s32.totalorder %s34_s20, %s34_s20 }
  0x15   :  { %p68_p8 = scmp.ne.s32.totalorder %s34_s20, %s67_s21  ;;  %p73_p10 = scmp.lt.s32.totalorder %s67_s21, %s67_s21 }
  0x17   :  { %p74_p11 = por %p73_p10, %p72_p9 }
  0x19   :  { %p75_p12 = pnand %p74_p11, %p68_p8 }
  0x85   :  { %v25_v1 = vpop.permute.xlu0 %24 }
  0x86   :  { %26 = vst [vmem:[#allocation5] sm:$0xff] %v25_v1 }
  0x87   :  { %78 = shalt.err (!%p75_p12)
}
  0x88   :  { %s79_s0 = scalar_lea.hbm %s131_s1, 128 }
  0x89   :  { %p80_p13 = scmp.ne.s32.totalorder %s131_s1, %s79_s0  ;;  %p83_p0 = scmp.lt.u32.totalorder %s79_s0, %s131_s1 }
  0x8b   :  { %p85_p1 = pnand %p83_p0, %p80_p13 }
  0x8d   :  { %88 = shalt.err (!%p85_p1)
}
  0x8e   :  { %36 = dma.vmem_to_hbm [thread:$0]  %s34_s20, 128, %s131_s1, [#allocation4]  }
  0x8f   :  { %91 = dma.done.wait [#allocation4], 128  }
  0x90   :  { %92 = vsyncadd [#allocation4], 4294967168 }
  0x91   :  { %40 = vsyncpa [#allocation3], 1 }
  0x92   :  { %41 = vsyncpa [#allocation4], 1 }

// kernel: tpu_custom_call.1
= control target key start
LH: loop header
LB: loop body
LE: loop exit
PB: predicated region body
PF: predicated region fallthrough
CT: control target
= control target key end

     0   :  { %13 = vsyncpa [#allocation5], 0  ;;  %s2652_s0 = inlined_call_operand.vmem [shape: f32[2,8,32], index: 0, kind: input, shape index: {}]   ;;  %s2653_s1 = inlined_call_operand.vmem [shape: bf16[32,96], index: 1, kind: input, shape index: {}]   ;;  %s2654_s2 = inlined_call_operand.vmem [shape: f32[1,96], index: 2, kind: input, shape index: {}]   ;;  %s2655_s3 = inlined_call_operand.vmem [shape: bf16[128,8], index: 3, kind: input, shape index: {}]   ;;  %s2656_s4 = inlined_call_operand.vmem [shape: bf16[32,32], index: 4, kind: input, shape index: {}]   ;;  %s2657_s5 = inlined_call_operand.vmem [shape: f32[1,32], index: 5, kind: input, shape index: {}]   ;;  %s2658_s6 = inlined_call_operand.vmem [shape: f32[1,32], index: 6, kind: input, shape index: {}]   ;;  %s2659_s7 = inlined_call_operand.vmem [shape: f32[1,32], index: 7, kind: input, shape index: {}]   ;;  %s2660_s8 = inlined_call_operand.hbm [shape: f32[2,8,32], index: 8, kind: output, shape index: {}]  }
   0x1   :  { %15 = vsyncpa [#allocation5 + $0x1], 0  ;;  %s2180_s27 = smov 0   ;;  %s2182_s28 = smov 0  }
   0x2   :  { %s2184_s29 = smov 0   ;;  %s2186_s30 = smov 0  }
   0x3 LB: > { %s2201_s9 = sadd.s32 4294967295, %s2109_s30   ;;  %s1650_s10 = sadd.s32 4294967294, %s2109_s30   ;;  %s2109_s30 = sphi %s2186_s30, %s2682_s30   ;;  %s2105_s29 = sphi %s2184_s29, %s2681_s29   ;;  %s2101_s28 = sphi %s2182_s28, %s2680_s28   ;;  %s2097_s27 = sphi %s2180_s27, %s2679_s27  }
   0x4   : > { %s2205_s11 = sadd.s32 1, %s2109_s30   ;;  %s201_s12 = sadd.s32 1, %s2105_s29 }
   0x5   : > { %s198_s13 = ssub.s32 %s2109_s30, %s2205_s11  ;;  %p211_p0 = scmp.ne.s32.totalorder %s2105_s29, %s2101_s28 }
   0x6   : > { %p199_p1 = scmp.eq.s32.totalorder %s198_s13, 0  ;;  %p212_p2 = scmp.eq.s32.totalorder %s2201_s9, 1 }
   0x7   : > { %p217_p3 = scmp.ne.s32.totalorder %s2101_s28, %s2097_s27  ;;  %p218_p4 = scmp.eq.s32.totalorder %s1650_s10, 1 }
   0x8   : > { %s2216_s14 = scalar_select %p199_p1, %s2105_s29, %s201_s12  }
   0x9   : > { %p2218_p5 = por %p212_p2, %p211_p0  ;;  %p2222_p6 = por %p218_p4, %p217_p3 }
   0xa   : > { %p1653_p7 = scmp.ge.s32.totalorder %s2109_s30, 1  ;;  %p264_p8 = scmp.lt.s32.totalorder %s2109_s30, 3 }
   0xc   : > { %p265_p9 = pnand %p1653_p7, %p264_p8 }
   0xd   : > { %v1988_v0 = vld [vmem:[%s2653_s1] sm:$0xff] (!%p265_p9)   ;;  %v2111_v1 = vmov (!%p265_p9), 0.0   ;;  %v1989_v2 = vld [vmem:[%s2653_s1 + $0x8] sm:$0xff] (!%p265_p9)   ;;  %vm2112_vm0 = vmmov (!%p265_p9), 0   ;;  %p297_p10 = scmp.lt.s32.totalorder (!%p265_p9), %s2201_s9, 1  ;;  %vm431_vm1 = vcmask (!%p265_p9), 64512  }
   0xe   : > { %268 = sbr.rel (%p265_p9) target bundleno = 3820 (0xeec), region = 52  ;;  %1782 = vmatprep.subr.bf16.mxu0 (!%p265_p9), %v2111_v1  ;;  %1790 = vmatprep.subr.bf16.mxu1 (!%p265_p9), %v2111_v1  ;;  %v1990_v3 = vld [vmem:[%s2655_s3] sm:$0xff] (!%p265_p9)   ;;  %v1991_v5 = vld [vmem:[%s2655_s3 + $0x8] sm:$0xff] (!%p265_p9)   ;;  %v1992_v6 = vld [vmem:[%s2655_s3 + $0x10] sm:$0xff] (!%p265_p9)   ;;  %vm327_vm2 = vcmask (!%p265_p9), 261120   ;;  %vm372_vm3 = vcmask (!%p265_p9), 781312  }
   0xf   : > { %1783 = vmatpush3.bf16.msra.mxu0 (!%p265_p9), %v1988_v0  ;;  %1786 = vmatprep.mubr.msk.bf16.mxu0 (!%p265_p9), %vm2112_vm0, %v2111_v1  ;;  %v436_v4 = vsel (!%p265_p9), %vm431_vm1, %v1990_v3, 0  ;;  %v1993_v7 = vld [vmem:[%s2655_s3 + $0x18] sm:$0xff] (!%p265_p9)   ;;  %v439_v10 = vsel (!%p265_p9), %vm431_vm1, %v1991_v5, 0  ;;  %v442_v11 = vsel (!%p265_p9), %vm431_vm1, %v1992_v6, 0  ;;  %v1994_v13 = vld [vmem:[%s2655_s3 + $0x20] sm:$0xff] (!%p265_p9)   ;;  %v1995_v15 = vld [vmem:[%s2655_s3 + $0x28] sm:$0xff] (!%p265_p9)  }
  0x10   : > { %1784 = vmatprep.subr.bf16.mxu0 (!%p265_p9), %v2111_v1  ;;  %1806 = vmatprep.mubr.msk.bf16.mxu1 (!%p265_p9), %vm2112_vm0, %v2111_v1  ;;  %v445_v12 = vsel (!%p265_p9), %vm431_vm1, %v1993_v7, 0  ;;  %v448_v14 = vsel (!%p265_p9), %vm431_vm1, %v1994_v13, 0  ;;  %v451_v16 = vsel (!%p265_p9), %vm431_vm1, %v1995_v15, 0  ;;  %v1996_v17 = vld [vmem:[%s2655_s3 + $0x30] sm:$0xff] (!%p265_p9)   ;;  %v1997_v19 = vld [vmem:[%s2655_s3 + $0x38] sm:$0xff] (!%p265_p9)   ;;  %s2113_s18 = smov (!%p265_p9), 96  }
  0x11   : > { %1791 = vmatpush3.bf16.xpose.msra.mxu1 (!%p265_p9), %v436_v4  ;;  %v454_v18 = vsel (!%p265_p9), %vm431_vm1, %v1996_v17, 0  ;;  %v457_v20 = vsel (!%p265_p9), %vm431_vm1, %v1997_v19, 0  ;;  %v1656_v21 = vld [vmem:[%s2654_s2] ss:$0 sm:$0xff] (!%p265_p9)  ;;  %s2114_s19 = smov (!%p265_p9), 2   ;;  %s2115_s21 = smov (!%p265_p9), 1  }
  0x12   : > { %1792 = vmatprep.subr.bf16.mxu1 (!%p265_p9), %v2111_v1  ;;  %s2670_s22 = smov (!%p265_p9), 3   ;;  %s2667_s24 = smov (!%p265_p9), 5   ;;  %vm521_vm4 = vcmask (!%p265_p9), 1040384   ;;  %vm523_vm5 = vcmask (!%p265_p9), 1041408   ;;  %vm525_vm6 = vcmask (!%p265_p9), 1042432   ;;  %vm527_vm7 = vcmask (!%p265_p9), 1043456  }
  0x13   : > { %1785 = vmatpush3.bf16.msra.mxu0 (!%p265_p9), %v1989_v2  ;;  %s2663_s25 = smov (!%p265_p9), 6   ;;  %vm529_vm8 = vcmask (!%p265_p9), 1044480   ;;  %vm531_vm9 = vcmask (!%p265_p9), 1045504   ;;  %vm533_vm10 = vcmask (!%p265_p9), 1046528   ;;  %s2661_s10 = smov (!%p265_p9), 120   ;;  %v2000_v3 = vld [vmem:[%s2655_s3] sm:$0xff] (!%p265_p9)  }
  0x14   : > { %1810 = vmatprep.subr.bf16.mxu0 (!%p265_p9), %v2111_v1  ;;  %s2122_s12 = smov (!%p265_p9), 64   ;;  %s2123_s13 = smov (!%p265_p9), 88   ;;  %v716_v6 = vsel (!%p265_p9), %vm431_vm1, %v2000_v3, 0  ;;  %v2001_v7 = vld [vmem:[%s2655_s3 + $0x8] sm:$0xff] (!%p265_p9)   ;;  %v2004_v13 = vld [vmem:[%s2655_s3 + $0x20] sm:$0xff] (!%p265_p9)   ;;  %v2006_v17 = vld [vmem:[%s2655_s3 + $0x30] sm:$0xff] (!%p265_p9)  }
  0x15   : > { %s298_s23 = scalar_select %p297_p10, %s2201_s9, 1  ;;  %v2005_v15 = vld [vmem:[%s2655_s3 + $0x28] sm:$0xff]   ;;  %v2007_v19 = vld [vmem:[%s2655_s3 + $0x38] sm:$0xff]   ;;  %vm648_vm11 = vcmask 60416   ;;  %vm924_vm12 = vcmask 126016   ;;  %vm1200_vm13 = vcmask 191616  }
  0x16   : > { %s2124_s17 = smov 56   ;;  %vm1476_vm14 = vcmask 257216  }
  0x17   : > { %s1655_s26 = sshll.u32 %s298_s23, 3  ;;  %s2669_s23 = smov 4  }
  0x18   : > { %s2259_s20 = scalar_lea.vmem %s2652_s0, %s1655_s26  ;;  %s2665_s26 = smov 7  }
  0x19   : > { %v302_v8 = vld [vmem:[%s2259_s20] sm:$0xff]  ;;  %1793 = vmatpush3.bf16.xpose.msra.mxu1 %v439_v10 }
  0x1a   : > { %v303_v9 = vpack.c.bf16 %v302_v8, %v302_v8  ;;  %1794 = vmatprep.subr.bf16.mxu1 %v2111_v1  ;;  %v719_v8 = vsel %vm431_vm1, %v2001_v7, 0  ;;  %v2011_v7 = vld [vmem:[%s2655_s3 + $0x10] sm:$0xff]  }
  0x1c   : > { %1787 = vmatmul.mubr.msk.bf16.vlgmr.msra.gmra.mrb[0].mxu0 %vm327_vm2, %v303_v9  ;;  %v2002_v9 = vld [vmem:[%s2655_s3 + $0x10] sm:$0xff]  }
  0x1d   : > { %1812 = vmatprep.mubr.msk.bf16.mxu0 %vm2112_vm0, %v2111_v1  ;;  %v722_v10 = vsel %vm431_vm1, %v2002_v9, 0  ;;  %v2012_v9 = vld [vmem:[%s2655_s3 + $0x18] sm:$0xff]  }
  0x21   : > { %1795 = vmatpush3.bf16.xpose.msra.mxu1 %v442_v11  ;;  %v2003_v11 = vld [vmem:[%s2655_s3 + $0x18] sm:$0xff]  }
  0x22   : > { %1796 = vmatprep.subr.bf16.mxu1 %v2111_v1 }
  0x29   : > { %1797 = vmatpush3.bf16.xpose.msra.mxu1 %v445_v12  ;;  %v725_v12 = vsel %vm431_vm1, %v2003_v11, 0  ;;  %v2013_v11 = vld [vmem:[%s2655_s3 + $0x20] sm:$0xff]  }
  0x2a   : > { %1798 = vmatprep.subr.bf16.mxu1 %v2111_v1 }
  0x31   : > { %1799 = vmatpush3.bf16.xpose.msra.mxu1 %v448_v14  ;;  %v728_v14 = vsel %vm431_vm1, %v2004_v13, 0  ;;  %v2014_v13 = vld [vmem:[%s2655_s3 + $0x28] sm:$0xff]  }
  0x32   : > { %1800 = vmatprep.subr.bf16.mxu1 %v2111_v1 }
  0x39   : > { %1801 = vmatpush3.bf16.xpose.msra.mxu1 %v451_v16  ;;  %v731_v16 = vsel %vm431_vm1, %v2005_v15, 0  ;;  %v2015_v15 = vld [vmem:[%s2655_s3 + $0x30] sm:$0xff]  }
  0x3a   : > { %1802 = vmatprep.subr.bf16.mxu1 %v2111_v1 }
  0x41   : > { %1803 = vmatpush3.bf16.xpose.msra.mxu1 %v454_v18  ;;  %v734_v18 = vsel %vm431_vm1, %v2006_v17, 0  ;;  %v2016_v17 = vld [vmem:[%s2655_s3 + $0x38] sm:$0xff]  }
  0x42   : > { %1804 = vmatprep.subr.bf16.mxu1 %v2111_v1 }
  0x49   : > { %1805 = vmatpush3.bf16.xpose.msra.mxu1 %v457_v20  ;;  %v737_v20 = vsel %vm431_vm1, %v2007_v19, 0 }
  0x4a   : > { %1842 = vmatprep.subr.bf16.mxu1 %v2111_v1 }
  0xef   : > { %v365_v22 = vpop.f32.mrb[0].mxu0 }
  0xf0   : > { %v366_v23 = vadd.f32 %v1656_v21, %v365_v22  ;;  %v1788_v24 = vpop.f32.mrb[1].mxu0 }
  0xf1   : > { %v368_v25 = vpop.f32.mrb[2].mxu0 }
  0xf2   : > { %v371_v26 = vpack.c.bf16 %v366_v23, %v366_v23  ;;  %v1789_v27 = vpop.f32.mrb[3].mxu0 }
  0xf4   : > { %373 = vst.msk [vmem:[#allocation2] sm:$0xf] %vm372_vm3, %v371_v26 }
  0xfb   : > { %v374_v28 = vld [vmem:[#allocation2] sm:$0xf] }
  0xfc   : > { %1807 = vmatmul.mubr.msk.bf16.vlgmr.msra.gmra.mrb[0].mxu1 %vm431_vm1, %v374_v28  ;;  %v1669_v29 = vcombine.low %v374_v28, %v374_v28  ;;  %v2319_v54 = vld [vmem:[#allocation2] ss:$0 sps:$4 sm:$0xff]  }
  0xfd   : > { %1844 = vmatprep.mubr.msk.bf16.mxu1 %vm2112_vm0, %v2111_v1 }
  0xfe   : > { %538 = vrot.lane.b32.xlu0 %v1669_v29, %s2113_s18  ;;  %s2125_s18 = smov 112  }
 0x170   : > { %v539_v30 = vpop.permute.xlu0 %538 }
 0x171   : > { %v545_v31 = vsel %vm431_vm1, %v539_v30, 0 }
 0x172   : > { %1811 = vmatpush3.bf16.xpose.msra.mxu0 %v545_v31 }
 0x173   : > { %1816 = vmatprep.subr.bf16.mxu0 %v2111_v1 }
 0x179   : > { %1813 = vmatmul.mubr.msk.bf16.vlgmr.msra.gmra.mrb[4].mxu0 %vm431_vm1, %v374_v28 }
 0x17a   : > { %1818 = vmatprep.mubr.msk.bf16.mxu0 %vm2112_vm0, %v2111_v1 }
 0x1cf   : > { %v493_v32 = vpop.f32.mrb[0].mxu1 }
 0x1d0   : > { %503 = vrot.lane.b32.xlu1 %v493_v32, %s2114_s19  ;;  %500 = vrot.lane.b32.xlu0 %v493_v32, %s2115_s21  ;;  %v1808_v33 = vpop.f32.mrb[1].mxu1 }
 0x1d1   : > { %v496_v34 = vpop.f32.mrb[2].mxu1  ;;  %v2388_v33 = vld [vmem:[#allocation2] ss:$0 sps:$4 sm:$0xff]  }
 0x1d2   : > { %v1809_v35 = vpop.f32.mrb[3].mxu1 }
 0x1d4   : > { %506 = vrot.lane.b32.xlu1 %v493_v32, %s2670_s22  ;;  %509 = vrot.lane.b32.xlu0 %v493_v32, %s2669_s23 }
 0x1d8   : > { %512 = vrot.lane.b32.xlu1 %v493_v32, %s2667_s24  ;;  %515 = vrot.lane.b32.xlu0 %v493_v32, %s2663_s25  ;;  %s2126_s25 = smov 80  }
 0x1dc   : > { %518 = vrot.lane.b32.xlu1 %v493_v32, %s2665_s26 }
 0x242   : > { %v504_v36 = vpop.permute.xlu1 %503  ;;  %v501_v37 = vpop.permute.xlu0 %500 }
 0x243   : > { %v522_v38 = vsel %vm521_vm4, %v493_v32, %v501_v37 }
 0x244   : > { %v524_v40 = vsel %vm523_vm5, %v522_v38, %v504_v36 }
 0x246   : > { %v507_v39 = vpop.permute.xlu1 %506  ;;  %v510_v41 = vpop.permute.xlu0 %509 }
 0x247   : > { %v526_v42 = vsel %vm525_vm6, %v524_v40, %v507_v39 }
 0x248   : > { %v528_v43 = vsel %vm527_vm7, %v526_v42, %v510_v41 }
 0x24a   : > { %v513_v44 = vpop.permute.xlu1 %512  ;;  %v516_v46 = vpop.permute.xlu0 %515 }
 0x24b   : > { %v530_v45 = vsel %vm529_vm8, %v528_v43, %v513_v44 }
 0x24c   : > { %v581_v47 = vpop.f32.mrb[4].mxu0  ;;  %v532_v49 = vsel %vm531_vm9, %v530_v45, %v516_v46 }
 0x24d   : > { %v1814_v48 = vpop.f32.mrb[5].mxu0 }
 0x24e   : > { %v519_v50 = vpop.permute.xlu1 %518  ;;  %v584_v51 = vpop.f32.mrb[6].mxu0 }
 0x24f   : > { %v1815_v52 = vpop.f32.mrb[7].mxu0  ;;  %v534_v53 = vsel %vm533_vm10, %v532_v49, %v519_v50 }
 0x250   : > { %541 = vrot.lane.b32.xlu0 %v534_v53, %s2661_s10 }
 0x254   : > { %597 = vrot.lane.b32.xlu0 %v1669_v29, %s2122_s12  ;;  %s2674_s12 = smov 120  }
 0x258   : > { %670 = vrot.lane.b32.xlu0 %v2319_v54, %s2661_s10  ;;  %s2673_s10 = smov 6  }
 0x25c   : > { %808 = vrot.lane.b32.xlu0 %v2319_v54, %s2123_s13  ;;  %s2127_s13 = smov 48  }
 0x2c2   : > { %v542_v55 = vpop.permute.xlu0 %541 }
 0x2c3   : > { %v582_v56 = vadd.f32 %v581_v47, %v542_v55 }
 0x2c5   : > { %v587_v57 = vsel %vm431_vm1, %v582_v56, -inf }
 0x2c6   : > { %v598_v58 = vpop.permute.xlu0 %597  ;;  %588 = vmax.xlane.f32.xlu1 %v587_v57 }
 0x2c7   : > { %v603_v59 = vsel %vm527_vm7, %v598_v58, 0 }
 0x2c8   : > { %1817 = vmatpush3.bf16.msra.mxu0 %v603_v59 }
 0x2c9   : > { %1822 = vmatprep.subr.bf16.mxu0 %v2111_v1 }
 0x2ca   : > { %v671_v60 = vpop.permute.xlu0 %670 }
 0x2ce   : > { %v809_v61 = vpop.permute.xlu0 %808 }
 0x2cf   : > { %v815_v62 = vsel %vm431_vm1, %v809_v61, 0 }
 0x2d0   : > { %1843 = vmatpush3.bf16.xpose.msra.mxu1 %v815_v62 }
 0x2d1   : > { %1848 = vmatprep.subr.bf16.mxu1 %v2111_v1 }
 0x2d7   : > { %1845 = vmatmul.mubr.msk.bf16.vlgmr.msra.gmra.mrb[4].mxu1 %vm431_vm1, %v671_v60 }
 0x2d8   : > { %1850 = vmatprep.mubr.msk.bf16.mxu1 %vm2112_vm0, %v2111_v1 }
 0x353   : > { %v589_v63 = vpop.xlane.xlu1 %588 }
 0x354   : > { %v590_v0 = vsub.f32 %v582_v56, %v589_v63  ;;  %v2009_v63 = vld [vmem:[%s2655_s3] sm:$0xff]  }
 0x355   : > { %v992_v3 = vsel %vm431_vm1, %v2009_v63, 0 }
 0x356   : > { %v591_v2 = vmul.f32 1.442695, %v590_v0 }
 0x358   : > { %2028 = vpow2.f32 %v591_v2 }
 0x362   : > { %v2335_v4 = vpop.eup %2028 }
 0x363   : > { %v596_v5 = vpack.c.bf16 %v2335_v4, %v2335_v4 }
 0x365   : > { %1819 = vmatmul.mubr.msk.bf16.vlgmr.msra.gmra.mrb[8].mxu0 %vm431_vm1, %v596_v5  ;;  %v2010_v5 = vld [vmem:[%s2655_s3 + $0x8] sm:$0xff]  }
 0x366   : > { %1823 = vmatpush3.bf16.xpose.msra.mxu0 %v716_v6  ;;  %1838 = vmatprep.mubr.msk.bf16.mxu0 %vm2112_vm0, %v2111_v1  ;;  %v995_v6 = vsel %vm431_vm1, %v2010_v5, 0  ;;  %v2021_v5 = vld [vmem:[%s2655_s3 + $0x18] sm:$0xff]  }
 0x367   : > { %1824 = vmatprep.subr.bf16.mxu0 %v2111_v1 }
 0x36e   : > { %1825 = vmatpush3.bf16.xpose.msra.mxu0 %v719_v8  ;;  %v998_v8 = vsel %vm431_vm1, %v2011_v7, 0  ;;  %v2022_v7 = vld [vmem:[%s2655_s3 + $0x20] sm:$0xff]  }
 0x36f   : > { %1826 = vmatprep.subr.bf16.mxu0 %v2111_v1 }
 0x376   : > { %1827 = vmatpush3.bf16.xpose.msra.mxu0 %v722_v10  ;;  %v1001_v10 = vsel %vm431_vm1, %v2012_v9, 0  ;;  %v2023_v9 = vld [vmem:[%s2655_s3 + $0x28] sm:$0xff]  }
 0x377   : > { %1828 = vmatprep.subr.bf16.mxu0 %v2111_v1 }
 0x37e   : > { %1829 = vmatpush3.bf16.xpose.msra.mxu0 %v725_v12  ;;  %v1004_v12 = vsel %vm431_vm1, %v2013_v11, 0  ;;  %v2024_v11 = vld [vmem:[%s2655_s3 + $0x30] sm:$0xff]  }
 0x37f   : > { %1830 = vmatprep.subr.bf16.mxu0 %v2111_v1 }
 0x386   : > { %1831 = vmatpush3.bf16.xpose.msra.mxu0 %v728_v14  ;;  %v1007_v14 = vsel %vm431_vm1, %v2014_v13, 0  ;;  %v2025_v13 = vld [vmem:[%s2655_s3 + $0x38] sm:$0xff]  }
 0x387   : > { %1832 = vmatprep.subr.bf16.mxu0 %v2111_v1 }
 0x38e   : > { %1833 = vmatpush3.bf16.xpose.msra.mxu0 %v731_v16  ;;  %v1010_v16 = vsel %vm431_vm1, %v2015_v15, 0 }
 0x38f   : > { %1834 = vmatprep.subr.bf16.mxu0 %v2111_v1 }
 0x396   : > { %1835 = vmatpush3.bf16.xpose.msra.mxu0 %v734_v18  ;;  %v1013_v18 = vsel %vm431_vm1, %v2016_v17, 0 }
 0x397   : > { %1836 = vmatprep.subr.bf16.mxu0 %v2111_v1 }
 0x39e   : > { %1837 = vmatpush3.bf16.xpose.msra.mxu0 %v737_v20 }
 0x39f   : > { %1874 = vmatprep.subr.bf16.mxu0 %v2111_v1 }
 0x3a5   : > { %1839 = vmatmul.mubr.msk.bf16.vlgmr.msra.gmra.mrb[12].mxu0 %vm431_vm1, %v671_v60 }
 0x3a6   : > { %1876 = vmatprep.mubr.msk.bf16.mxu0 %vm2112_vm0, %v2111_v1 }
 0x3aa   : > { %v851_v21 = vpop.f32.mrb[4].mxu1 }
 0x3ab   : > { %v1846_v22 = vpop.f32.mrb[5].mxu1 }
 0x3ac   : > { %v854_v23 = vpop.f32.mrb[6].mxu1 }
 0x3ad   : > { %v1847_v24 = vpop.f32.mrb[7].mxu1 }
 0x438   : > { %v2382_v25 = vpop.f32.mrb[8].mxu0 }
 0x439   : > { %v1820_v26 = vpop.f32.mrb[9].mxu0 }
 0x43a   : > { %v642_v27 = vpop.f32.mrb[10].mxu0 }
 0x43b   : > { %v1821_v28 = vpop.f32.mrb[11].mxu0 }
 0x43c   : > { %v2474_v28 = vld [vmem:[#allocation2] ss:$0 sps:$4 sm:$0xff]  }
 0x478   : > { %v773_v29 = vpop.f32.mrb[12].mxu0 }
 0x479   : > { %798 = vrot.lane.b32.xlu1 %v773_v29, %s2665_s26  ;;  %780 = vrot.lane.b32.xlu0 %v773_v29, %s2115_s21  ;;  %v1840_v30 = vpop.f32.mrb[13].mxu0  ;;  %s2675_s26 = smov 5  }
 0x47a   : > { %v776_v31 = vpop.f32.mrb[14].mxu0 }
 0x47b   : > { %v1841_v32 = vpop.f32.mrb[15].mxu0 }
 0x47d   : > { %867 = vrot.lane.b32.xlu1 %v2319_v54, %s2124_s17  ;;  %783 = vrot.lane.b32.xlu0 %v773_v29, %s2114_s19  ;;  %s2128_s17 = smov 104  }
 0x481   : > { %946 = vrot.lane.b32.xlu1 %v2388_v33, %s2125_s18  ;;  %786 = vrot.lane.b32.xlu0 %v773_v29, %s2670_s22  ;;  %s2676_s18 = smov 7  }
 0x485   : > { %1084 = vrot.lane.b32.xlu1 %v2388_v33, %s2126_s25  ;;  %789 = vrot.lane.b32.xlu0 %v773_v29, %s2669_s23  ;;  %s2130_s25 = smov 40  }
 0x489   : > { %792 = vrot.lane.b32.xlu0 %v773_v29, %s2667_s24  ;;  %s2129_s24 = smov 72  }
 0x48d   : > { %795 = vrot.lane.b32.xlu0 %v773_v29, %s2673_s10 }
 0x4eb   : > { %v799_v34 = vpop.permute.xlu1 %798  ;;  %v781_v35 = vpop.permute.xlu0 %780 }
 0x4ec   : > { %v801_v44 = vsel %vm521_vm4, %v773_v29, %v781_v35 }
 0x4ef   : > { %v868_v36 = vpop.permute.xlu1 %867  ;;  %v784_v37 = vpop.permute.xlu0 %783 }
 0x4f0   : > { %v873_v38 = vsel %vm527_vm7, %v868_v36, 0  ;;  %v802_v46 = vsel %vm523_vm5, %v801_v44, %v784_v37 }
 0x4f1   : > { %1849 = vmatpush3.bf16.msra.mxu1 %v873_v38 }
 0x4f2   : > { %1854 = vmatprep.subr.bf16.mxu1 %v2111_v1 }
 0x4f3   : > { %v2398_v39 = vpop.permute.xlu1 %946  ;;  %v787_v40 = vpop.permute.xlu0 %786 }
 0x4f4   : > { %v803_v47 = vsel %vm525_vm6, %v802_v46, %v787_v40 }
 0x4f7   : > { %v1085_v41 = vpop.permute.xlu1 %1084  ;;  %v790_v42 = vpop.permute.xlu0 %789 }
 0x4f8   : > { %v1091_v43 = vsel %vm431_vm1, %v1085_v41, 0  ;;  %v804_v48 = vsel %vm527_vm7, %v803_v47, %v790_v42 }
 0x4f9   : > { %1875 = vmatpush3.bf16.xpose.msra.mxu0 %v1091_v43 }
 0x4fa   : > { %1880 = vmatprep.subr.bf16.mxu0 %v2111_v1 }
 0x4fb   : > { %v793_v45 = vpop.permute.xlu0 %792 }
 0x4fc   : > { %v805_v49 = vsel %vm529_vm8, %v804_v48, %v793_v45 }
 0x4ff   : > { %v796_v50 = vpop.permute.xlu0 %795 }
 0x500   : > { %v806_v51 = vsel %vm531_vm9, %v805_v49, %v796_v50  ;;  %1877 = vmatmul.mubr.msk.bf16.vlgmr.msra.gmra.mrb[16].mxu0 %vm431_vm1, %v2398_v39 }
 0x501   : > { %v807_v52 = vsel %vm533_vm10, %v806_v51, %v799_v34  ;;  %1882 = vmatprep.mubr.msk.bf16.mxu0 %vm2112_vm0, %v2111_v1 }
 0x502   : > { %811 = vrot.lane.b32.xlu0 %v807_v52, %s2674_s12 }
 0x574   : > { %v812_v53 = vpop.permute.xlu0 %811 }
 0x575   : > { %v852_v54 = vadd.f32 %v851_v21, %v812_v53 }
 0x577   : > { %v857_v55 = vsel %vm431_vm1, %v852_v54, -inf }
 0x578   : > { %858 = vmax.xlane.f32.xlu0 %v857_v55 }
 0x5d3   : > { %v2415_v56 = vpop.f32.mrb[16].mxu0 }
 0x5d4   : > { %v1878_v57 = vpop.f32.mrb[17].mxu0 }
 0x5d5   : > { %v1130_v58 = vpop.f32.mrb[18].mxu0 }
 0x5d6   : > { %v1879_v59 = vpop.f32.mrb[19].mxu0 }
 0x5d7   : > { %v2018_v59 = vld [vmem:[%s2655_s3] sm:$0xff]  }
 0x605   : > { %v859_v60 = vpop.xlane.xlu0 %858 }
 0x606   : > { %v860_v61 = vsub.f32 %v852_v54, %v859_v60 }
 0x608   : > { %v861_v62 = vmul.f32 1.442695, %v860_v61  ;;  %v1268_v61 = vsel %vm431_vm1, %v2018_v59, 0 }
 0x60a   : > { %2030 = vpow2.f32 %v861_v62  ;;  %v2019_v62 = vld [vmem:[%s2655_s3 + $0x8] sm:$0xff]  }
 0x60b   : > { %v1271_v63 = vsel %vm431_vm1, %v2019_v62, 0 }
 0x614   : > { %v2420_v0 = vpop.eup %2030 }
 0x615   : > { %v866_v2 = vpack.c.bf16 %v2420_v0, %v2420_v0 }
 0x617   : > { %1851 = vmatmul.mubr.msk.bf16.vlgmr.msra.gmra.mrb[8].mxu1 %vm431_vm1, %v866_v2  ;;  %v2020_v2 = vld [vmem:[%s2655_s3 + $0x10] sm:$0xff]  }
 0x618   : > { %1855 = vmatpush3.bf16.xpose.msra.mxu1 %v992_v3  ;;  %1870 = vmatprep.mubr.msk.bf16.mxu1 %vm2112_vm0, %v2111_v1  ;;  %v1274_v3 = vsel %vm431_vm1, %v2020_v2, 0 }
 0x619   : > { %1856 = vmatprep.subr.bf16.mxu1 %v2111_v1 }
 0x620   : > { %1857 = vmatpush3.bf16.xpose.msra.mxu1 %v995_v6  ;;  %v1277_v6 = vsel %vm431_vm1, %v2021_v5, 0  ;;  %v2027_v5 = vld [vmem:[%s2656_s4 + $0x8] sm:$0xff]  }
 0x621   : > { %1858 = vmatprep.subr.bf16.mxu1 %v2111_v1 }
 0x628   : > { %1859 = vmatpush3.bf16.xpose.msra.mxu1 %v998_v8  ;;  %v1280_v8 = vsel %vm431_vm1, %v2022_v7, 0 }
 0x629   : > { %1860 = vmatprep.subr.bf16.mxu1 %v2111_v1 }
 0x630   : > { %1861 = vmatpush3.bf16.xpose.msra.mxu1 %v1001_v10  ;;  %v1283_v10 = vsel %vm431_vm1, %v2023_v9, 0 }
 0x631   : > { %1862 = vmatprep.subr.bf16.mxu1 %v2111_v1 }
 0x638   : > { %1863 = vmatpush3.bf16.xpose.msra.mxu1 %v1004_v12  ;;  %v1286_v12 = vsel %vm431_vm1, %v2024_v11, 0 }
 0x639   : > { %1864 = vmatprep.subr.bf16.mxu1 %v2111_v1 }
 0x640   : > { %1865 = vmatpush3.bf16.xpose.msra.mxu1 %v1007_v14  ;;  %v1289_v14 = vsel %vm431_vm1, %v2025_v13, 0 }
 0x641   : > { %1866 = vmatprep.subr.bf16.mxu1 %v2111_v1 }
 0x648   : > { %1867 = vmatpush3.bf16.xpose.msra.mxu1 %v1010_v16 }
 0x649   : > { %1868 = vmatprep.subr.bf16.mxu1 %v2111_v1 }
 0x650   : > { %1869 = vmatpush3.bf16.xpose.msra.mxu1 %v1013_v18 }
 0x651   : > { %1906 = vmatprep.subr.bf16.mxu1 %v2111_v1 }
 0x657   : > { %1871 = vmatmul.mubr.msk.bf16.vlgmr.msra.gmra.mrb[12].mxu1 %vm431_vm1, %v2398_v39 }
 0x658   : > { %1908 = vmatprep.mubr.msk.bf16.mxu1 %vm2112_vm0, %v2111_v1 }
 0x6ea   : > { %v2468_v19 = vpop.f32.mrb[8].mxu1 }
 0x6eb   : > { %v1852_v20 = vpop.f32.mrb[9].mxu1 }
 0x6ec   : > { %v912_v21 = vpop.f32.mrb[10].mxu1 }
 0x6ed   : > { %v1853_v22 = vpop.f32.mrb[11].mxu1 }
 0x72a   : > { %v1049_v23 = vpop.f32.mrb[12].mxu1 }
 0x72b   : > { %1065 = vrot.lane.b32.xlu0 %v1049_v23, %s2669_s23  ;;  %1056 = vrot.lane.b32.xlu1 %v1049_v23, %s2115_s21  ;;  %v1872_v24 = vpop.f32.mrb[13].mxu1  ;;  %s2133_s23 = smov 24  }
 0x72c   : > { %v1052_v26 = vpop.f32.mrb[14].mxu1  ;;  %v863_v24 = vsel %vm431_vm1, %v2420_v0, 0.0 }
 0x72d   : > { %v1873_v27 = vpop.f32.mrb[15].mxu1 }
 0x72f   : > { %1143 = vrot.lane.b32.xlu0 %v2388_v33, %s2127_s13  ;;  %1059 = vrot.lane.b32.xlu1 %v1049_v23, %s2114_s19  ;;  %s2677_s13 = smov 3  }
 0x733   : > { %1222 = vrot.lane.b32.xlu0 %v2474_v28, %s2128_s17  ;;  %1062 = vrot.lane.b32.xlu1 %v1049_v23, %s2670_s22  ;;  %s2678_s22 = smov 4  }
 0x737   : > { %1360 = vrot.lane.b32.xlu0 %v2474_v28, %s2129_s24  ;;  %1068 = vrot.lane.b32.xlu1 %v1049_v23, %s2675_s26 }
 0x73b   : > { %1071 = vrot.lane.b32.xlu1 %v1049_v23, %s2673_s10 }
 0x73f   : > { %1074 = vrot.lane.b32.xlu1 %v1049_v23, %s2676_s18 }
 0x79d   : > { %v1066_v29 = vpop.permute.xlu0 %1065  ;;  %v1057_v30 = vpop.permute.xlu1 %1056 }
 0x79e   : > { %v1077_v38 = vsel %vm521_vm4, %v1049_v23, %v1057_v30 }
 0x7a1   : > { %v1144_v31 = vpop.permute.xlu0 %1143  ;;  %v1060_v32 = vpop.permute.xlu1 %1059 }
 0x7a2   : > { %v1149_v33 = vsel %vm527_vm7, %v1144_v31, 0  ;;  %v1078_v40 = vsel %vm523_vm5, %v1077_v38, %v1060_v32 }
 0x7a3   : > { %1881 = vmatpush3.bf16.msra.mxu0 %v1149_v33 }
 0x7a4   : > { %1886 = vmatprep.subr.bf16.mxu0 %v2111_v1 }
 0x7a5   : > { %v2484_v34 = vpop.permute.xlu0 %1222  ;;  %v1063_v35 = vpop.permute.xlu1 %1062 }
 0x7a6   : > { %v1079_v41 = vsel %vm525_vm6, %v1078_v40, %v1063_v35 }
 0x7a7   : > { %v1080_v43 = vsel %vm527_vm7, %v1079_v41, %v1066_v29 }
 0x7a9   : > { %v1361_v36 = vpop.permute.xlu0 %1360  ;;  %v1069_v37 = vpop.permute.xlu1 %1068 }
 0x7aa   : > { %v1367_v39 = vsel %vm431_vm1, %v1361_v36, 0  ;;  %v1081_v44 = vsel %vm529_vm8, %v1080_v43, %v1069_v37 }
 0x7ab   : > { %1907 = vmatpush3.bf16.xpose.msra.mxu1 %v1367_v39 }
 0x7ac   : > { %1912 = vmatprep.subr.bf16.mxu1 %v2111_v1 }
 0x7ad   : > { %v1072_v42 = vpop.permute.xlu1 %1071 }
 0x7ae   : > { %v1082_v45 = vsel %vm531_vm9, %v1081_v44, %v1072_v42 }
 0x7b1   : > { %v1075_v46 = vpop.permute.xlu1 %1074 }
 0x7b2   : > { %1909 = vmatmul.mubr.msk.bf16.vlgmr.msra.gmra.mrb[16].mxu1 %vm431_vm1, %v2484_v34  ;;  %v1083_v47 = vsel %vm533_vm10, %v1082_v45, %v1075_v46 }
 0x7b3   : > { %1087 = vrot.lane.b32.xlu1 %v1083_v47, %s2674_s12  ;;  %1914 = vmatprep.mubr.msk.bf16.mxu1 %vm2112_vm0, %v2111_v1 }
 0x825   : > { %v1088_v48 = vpop.permute.xlu1 %1087 }
 0x826   : > { %v1128_v49 = vadd.f32 %v2415_v56, %v1088_v48 }
 0x828   : > { %v1133_v50 = vsel %vm431_vm1, %v1128_v49, -inf }
 0x829   : > { %1134 = vmax.xlane.f32.xlu1 %v1133_v50 }
 0x885   : > { %v2502_v51 = vpop.f32.mrb[16].mxu1 }
 0x886   : > { %v1910_v52 = vpop.f32.mrb[17].mxu1 }
 0x887   : > { %v1406_v53 = vpop.f32.mrb[18].mxu1 }
 0x888   : > { %v1911_v54 = vpop.f32.mrb[19].mxu1 }
 0x8b6   : > { %v1135_v55 = vpop.xlane.xlu1 %1134 }
 0x8b7   : > { %v1136_v57 = vsub.f32 %v1128_v49, %v1135_v55  ;;  %v593_v55 = vsel %vm431_vm1, %v2335_v4, 0.0 }
 0x8b9   : > { %v1137_v58 = vmul.f32 1.442695, %v1136_v57 }
 0x8bb   : > { %2032 = vpow2.f32 %v1137_v58 }
 0x8c5   : > { %v2507_v60 = vpop.eup %2032 }
 0x8c6   : > { %v1142_v56 = vpack.c.bf16 %v2507_v60, %v2507_v60  ;;  %v1139_v44 = vsel %vm431_vm1, %v2507_v60, 0.0 }
 0x8c8   : > { %1883 = vmatmul.mubr.msk.bf16.vlgmr.msra.gmra.mrb[20].mxu0 %vm431_vm1, %v1142_v56 }
 0x8c9   : > { %1887 = vmatpush3.bf16.xpose.msra.mxu0 %v1268_v61  ;;  %1902 = vmatprep.mubr.msk.bf16.mxu0 %vm2112_vm0, %v2111_v1 }
 0x8ca   : > { %1888 = vmatprep.subr.bf16.mxu0 %v2111_v1 }
 0x8d1   : > { %1889 = vmatpush3.bf16.xpose.msra.mxu0 %v1271_v63 }
 0x8d2   : > { %1890 = vmatprep.subr.bf16.mxu0 %v2111_v1 }
 0x8d9   : > { %1891 = vmatpush3.bf16.xpose.msra.mxu0 %v1274_v3 }
 0x8da   : > { %1892 = vmatprep.subr.bf16.mxu0 %v2111_v1 }
 0x8e1   : > { %1893 = vmatpush3.bf16.xpose.msra.mxu0 %v1277_v6 }
 0x8e2   : > { %1894 = vmatprep.subr.bf16.mxu0 %v2111_v1 }
 0x8e9   : > { %1895 = vmatpush3.bf16.xpose.msra.mxu0 %v1280_v8 }
 0x8ea   : > { %1896 = vmatprep.subr.bf16.mxu0 %v2111_v1 }
 0x8f1   : > { %1897 = vmatpush3.bf16.xpose.msra.mxu0 %v1283_v10 }
 0x8f2   : > { %1898 = vmatprep.subr.bf16.mxu0 %v2111_v1 }
 0x8f9   : > { %1899 = vmatpush3.bf16.xpose.msra.mxu0 %v1286_v12 }
 0x8fa   : > { %1900 = vmatprep.subr.bf16.mxu0 %v2111_v1 }
 0x901   : > { %1901 = vmatpush3.bf16.xpose.msra.mxu0 %v1289_v14 }
 0x908   : > { %1903 = vmatmul.mubr.msk.bf16.vlgmr.msra.gmra.mrb[24].mxu0 %vm431_vm1, %v2484_v34 }
 0x99b   : > { %v1185_v15 = vpop.f32.mrb[20].mxu0 }
 0x99c   : > { %v1884_v16 = vpop.f32.mrb[21].mxu0 }
 0x99d   : > { %v1188_v17 = vpop.f32.mrb[22].mxu0 }
 0x99e   : > { %v1885_v18 = vpop.f32.mrb[23].mxu0 }
 0x9db   : > { %v1325_v20 = vpop.f32.mrb[24].mxu0 }
 0x9dc   : > { %1350 = vrot.lane.b32.xlu1 %v1325_v20, %s2676_s18  ;;  %1332 = vrot.lane.b32.xlu0 %v1325_v20, %s2115_s21  ;;  %v1904_v21 = vpop.f32.mrb[25].mxu0  ;;  %s2132_s21 = smov 8  }
 0x9dd   : > { %v1328_v22 = vpop.f32.mrb[26].mxu0 }
 0x9de   : > { %v1905_v23 = vpop.f32.mrb[27].mxu0 }
 0x9e0   : > { %1419 = vrot.lane.b32.xlu1 %v2474_v28, %s2130_s25  ;;  %1335 = vrot.lane.b32.xlu0 %v1325_v20, %s2114_s19  ;;  %s2131_s19 = smov 16   ;;  %s294_s25 = sand.u32 1, %s2101_s28  }
 0x9e1   : > { %s1578_s24 = scalar_lea.sflag [#allocation5], %s294_s25 }
 0x9e4   : > { %1338 = vrot.lane.b32.xlu0 %v1325_v20, %s2677_s13  ;;  %s1654_s13 = sshll.u32 %s294_s25, 3 }
 0x9e8   : > { %1341 = vrot.lane.b32.xlu0 %v1325_v20, %s2678_s22 }
 0x9ec   : > { %1344 = vrot.lane.b32.xlu0 %v1325_v20, %s2675_s26 }
 0x9f0   : > { %1347 = vrot.lane.b32.xlu0 %v1325_v20, %s2673_s10  ;;  %s1718_s10 = sshll.u32 %s2201_s9, 7  ;;  %s2134_s9 = smov [#allocation4]  }
 0x9f1   : > { %s2609_s17 = scalar_lea.hbm %s2660_s8, %s1718_s10 }
 0xa04   : > { %864 = vadd.xlane.f32.xlu1 %v863_v24 }
 0xa4e   : > { %v1351_v26 = vpop.permute.xlu1 %1350  ;;  %v1333_v27 = vpop.permute.xlu0 %1332 }
 0xa4f   : > { %v1353_v33 = vsel %vm521_vm4, %v1325_v20, %v1333_v27  ;;  %v2046_v20 = vld [vmem:[%s2259_s20] sm:$0xff] }
 0xa52   : > { %v1420_v29 = vpop.permute.xlu1 %1419  ;;  %v1336_v30 = vpop.permute.xlu0 %1335 }
 0xa53   : > { %v1425_v28 = vsel %vm527_vm7, %v1420_v29, 0  ;;  %v1354_v35 = vsel %vm523_vm5, %v1353_v33, %v1336_v30  ;;  %v1715_v33 = vld [vmem:[%s2658_s6] ss:$0 sm:$0xff] }
 0xa54   : > { %1913 = vmatpush3.bf16.msra.mxu1 %v1425_v28 }
 0xa55   : > { %1918 = vmatprep.subr.bf16.mxu1 %v2111_v1 }
 0xa56   : > { %v1339_v31 = vpop.permute.xlu0 %1338 }
 0xa57   : > { %v1355_v36 = vsel %vm525_vm6, %v1354_v35, %v1339_v31  ;;  %v1716_v35 = vld [vmem:[%s2659_s7] ss:$0 sm:$0xff] }
 0xa5a   : > { %v1342_v32 = vpop.permute.xlu0 %1341 }
 0xa5b   : > { %v1356_v0 = vsel %vm527_vm7, %v1355_v36, %v1342_v32 }
 0xa5e   : > { %v1345_v34 = vpop.permute.xlu0 %1344 }
 0xa5f   : > { %v1357_v37 = vsel %vm529_vm8, %v1356_v0, %v1345_v34 }
 0xa62   : > { %v1348_v38 = vpop.permute.xlu0 %1347 }
 0xa63   : > { %v1358_v39 = vsel %vm531_vm9, %v1357_v37, %v1348_v38 }
 0xa64   : > { %v1359_v40 = vsel %vm533_vm10, %v1358_v39, %v1351_v26 }
 0xa65   : > { %1363 = vrot.lane.b32.xlu0 %v1359_v40, %s2674_s12  ;;  %s296_s12 = scalar_lea.vmem [#allocation4], %s1654_s13  ;;  %s2051_s13 = sshll.u32 %s2134_s9, 4  ;;  %s2052_s13 = int_to_ptr.vmem [resolvable:$false] %s2051_s13 }
 0xa66   : > { %s1591_s26 = sshll.u32 %s296_s12, 4  ;;  %s2053_s22 = scalar_lea.vmem %s2052_s13, 256  ;;  %s2611_s26 = int_to_ptr.vmem [resolvable:$true] %s1591_s26 }
 0xa67   : > { %s2047_s20 = scalar_lea.vmem %s2611_s26, 128  ;;  %p2054_p0 = scmp.lt.s32.totalorder %s2611_s26, %s2052_s13 }
 0xa68   : > { %p2048_p11 = scmp.ne.s32.totalorder %s2611_s26, %s2047_s20  ;;  %p2055_p1 = scmp.lt.s32.totalorder %s2053_s22, %s2047_s20 }
 0xa6a   : > { %p2049_p12 = pnand %p2048_p11, %p2218_p5  ;;  %p2056_p2 = por %p2055_p1, %p2054_p0 }
 0xa6c   : > { %p2050_p13 = pneg %p2049_p12 }
 0xa6e   : > { %p2057_p3 = pnand %p2056_p2, %p2050_p13 }
 0xa91   : > { %v865_v57 = vpop.xlane.xlu1 %864 }
 0xad7   : > { %v1364_v41 = vpop.permute.xlu0 %1363 }
 0xad8   : > { %v1404_v42 = vadd.f32 %v2502_v51, %v1364_v41 }
 0xada   : > { %v1409_v43 = vsel %vm431_vm1, %v1404_v42, -inf }
 0xadb   : > { %1410 = vmax.xlane.f32.xlu0 %v1409_v43 }
 0xadf   : > { %1140 = vadd.xlane.f32.xlu0 %v1139_v44 }
 0xb68   : > { %v1411_v45 = vpop.xlane.xlu0 %1410 }
 0xb69   : > { %v1412_v46 = vsub.f32 %v1404_v42, %v1411_v45 }
 0xb6b   : > { %v1413_v47 = vmul.f32 1.442695, %v1412_v46 }
 0xb6c   : > { %v1141_v48 = vpop.xlane.xlu0 %1140 }
 0xb6d   : > { %2034 = vpow2.f32 %v1413_v47 }
 0xb6e   : > { %2036 = vrcp.f32 %v1141_v48 }
 0xb6f   : > { %2038 = vrcp.f32 %v865_v57 }
 0xb77   : > { %v2035_v49 = vpop.eup %2034 }
 0xb78   : > { %v2037_v50 = vpop.eup %2036  ;;  %v1415_v52 = vsel %vm431_vm1, %v2035_v49, 0.0  ;;  %v1418_v53 = vpack.c.bf16 %v2035_v49, %v2035_v49 }
 0xb79   : > { %1416 = vadd.xlane.f32.xlu0 %v1415_v52  ;;  %v1192_v51 = vmul.f32 %v2037_v50, %v1185_v15  ;;  %v2039_v58 = vpop.eup %2038 }
 0xb7a   : > { %1915 = vmatmul.mubr.msk.bf16.vlgmr.msra.gmra.mrb[20].mxu1 %vm431_vm1, %v1418_v53  ;;  %v916_v59 = vmul.f32 %v2039_v58, %v2468_v19  ;;  %v2026_v19 = vld [vmem:[%s2656_s4] sm:$0xff]  }
 0xb7b   : > { %v1722_v54 = vpack.c.bf16 %v1192_v51, %v1192_v51  ;;  %1922 = vmatprep.mubr.msk.bf16.mxu1 %vm2112_vm0, %v2111_v1  ;;  %1919 = vmatpush3.bf16.msra.mxu1 %v2026_v19 }
 0xb7c   : > { %v1721_v60 = vpack.c.bf16 %v916_v59, %v916_v59  ;;  %1920 = vmatprep.subr.bf16.mxu1 %v2111_v1  ;;  %v1711_v1 = vld [vmem:[%s2657_s5] ss:$0 sm:$0xff] }
 0xb7d   : > { %1197 = vrot.lane.b32.xlu1 %v1722_v54, %s2131_s19  ;;  %594 = vadd.xlane.f32.xlu0 %v593_v55 }
 0xb7f   : > { %1921 = vmatpush3.bf16.msra.mxu1 %v2027_v5 }
 0xb93   : > { %921 = vrot.lane.b32.xlu0 %v1721_v60, %s2132_s21 }
 0xbef   : > { %v1198_v3 = vpop.permute.xlu1 %1197 }
 0xc06   : > { %v1417_v56 = vpop.xlane.xlu0 %1416 }
 0xc0a   : > { %v595_v61 = vpop.xlane.xlu0 %594 }
 0xc0b   : > { %2040 = vrcp.f32 %v595_v61 }
 0xc0c   : > { %2042 = vrcp.f32 %v1417_v56 }
 0xc0e   : > { %v922_v4 = vpop.permute.xlu0 %921 }
 0xc15   : > { %v2041_v62 = vpop.eup %2040 }
 0xc16   : > { %v646_v63 = vmul.f32 %v2041_v62, %v2382_v25  ;;  %v2043_v25 = vpop.eup %2042 }
 0xc18   : > { %v647_v2 = vpack.c.bf16 %v646_v63, %v646_v63 }
 0xc1a   : > { %649 = vst.msk [vmem:[#allocation3] sm:$0xf] %vm648_vm11, %v647_v2 }
 0xc1b   : > { %925 = vst.msk [vmem:[#allocation3] sm:$0xf] %vm924_vm12, %v922_v4 }
 0xc1c   : > { %1201 = vst.msk [vmem:[#allocation3] sm:$0xf] %vm1200_vm13, %v1198_v3 }
 0xc4d   : > { %v1461_v6 = vpop.f32.mrb[20].mxu1 }
 0xc4e   : > { %v1468_v7 = vmul.f32 %v2043_v25, %v1461_v6  ;;  %v1916_v8 = vpop.f32.mrb[21].mxu1 }
 0xc4f   : > { %v1464_v9 = vpop.f32.mrb[22].mxu1 }
 0xc50   : > { %v1723_v10 = vpack.c.bf16 %v1468_v7, %v1468_v7  ;;  %v1917_v11 = vpop.f32.mrb[23].mxu1 }
 0xc52   : > { %1473 = vrot.lane.b32.xlu0 %v1723_v10, %s2133_s23 }
 0xcc4   : > { %v1474_v12 = vpop.permute.xlu0 %1473 }
 0xcc5   : > { %1477 = vst.msk [vmem:[#allocation3] sm:$0xf] %vm1476_vm14, %v1474_v12 }
 0xccc   : > { %v1478_v13 = vld [vmem:[#allocation3] sm:$0xf] }
 0xccd   : > { %1923 = vmatmul.mubr.msk.bf16.vlgmr.msra.gmra.mrb[24].mxu1 %vm327_vm2, %v1478_v13 }
 0xda0   : > { %v1539_v14 = vpop.f32.mrb[24].mxu1 }
 0xda1   : > { %v1540_v15 = vadd.f32 %v1711_v1, %v1539_v14  ;;  %v1924_v16 = vpop.f32.mrb[25].mxu1 }
 0xda2   : > { %v1542_v17 = vpop.f32.mrb[26].mxu1 }
 0xda3   : > { %v1925_v18 = vpop.f32.mrb[27].mxu1  ;;  %v1545_v21 = vadd.f32 %v2046_v20, %v1540_v15 }
 0xda5   : > { %v1546_v22 = vsel %vm327_vm2, %v1545_v21, 0.0 }
 0xda6   : > { %1547 = vadd.xlane.f32.xlu1 %v1546_v22 }
 0xe33   : > { %v1548_v23 = vpop.xlane.xlu1 %1547 }
 0xe34   : > { %v1550_v24 = vmul.f32 0.03125, %v1548_v23 }
 0xe36   : > { %v1551_v26 = vsub.f32 %v1545_v21, %v1550_v24 }
 0xe38   : > { %v1552_v27 = vmul.f32 %v1551_v26, %v1551_v26 }
 0xe3a   : > { %v1553_v29 = vsel %vm327_vm2, %v1552_v27, 0.0 }
 0xe3b   : > { %1554 = vadd.xlane.f32.xlu0 %v1553_v29 }
 0xec8   : > { %v1555_v30 = vpop.xlane.xlu0 %1554 }
 0xec9   : > { %v1556_v28 = vmul.f32 0.03125, %v1555_v30 }
 0xecb   : > { %v1557_v31 = vadd.f32 1e-05, %v1556_v28 }
 0xecd   : > { %2044 = vrsqrt.f32 %v1557_v31 }
 0xed7   : > { %v2045_v32 = vpop.eup %2044 }
 0xed8   : > { %v1559_v34 = vmul.f32 %v2045_v32, %v1551_v26 }
 0xeda   : > { %v1567_v36 = vmul.f32 %v1715_v33, %v1559_v34 }
 0xedc   : > { %v1575_v0 = vadd.f32 %v1716_v35, %v1567_v36 }
 0xede   : > { %1576 = vst.msk [vmem:[%s296_s12] sm:$0xff] %vm327_vm2, %v1575_v0 }
 0xedf   : > { %2060 = shalt.err (!%p2057_p3)
}
 0xee0   : > { %s2061_s25 = scalar_lea.hbm %s2609_s17, 128  ;;  %s2065_s10 = scalar_lea.hbm %s2660_s8, 256 }
 0xee1   : > { %p2062_p4 = scmp.ne.s32.totalorder %s2609_s17, %s2061_s25  ;;  %p2066_p9 = scmp.lt.u32.totalorder %s2609_s17, %s2660_s8 }
 0xee2   : > { %p2067_p10 = scmp.lt.u32.totalorder %s2065_s10, %s2061_s25  ;;  %p2069_p12 = scmp.lt.u32.totalorder %s2061_s25, %s2609_s17 }
 0xee3   : > { %p2063_p7 = pnand %p2062_p4, %p2218_p5 }
 0xee4   : > { %p2068_p11 = por %p2067_p10, %p2066_p9 }
 0xee5   : > { %p2064_p8 = pneg %p2063_p7 }
 0xee6   : > { %p2070_p13 = por %p2069_p12, %p2068_p11 }
 0xee8   : > { %p2071_p0 = pnand %p2070_p13, %p2064_p8 }
 0xeea   : > { %2074 = shalt.err (!%p2071_p0)
}
 0xeeb   : > { %1926 = dma.vmem_to_hbm [thread:$0]  (%p2218_p5), %s2611_s26, 128, %s2609_s17, %s1578_s24  }
 0xeec PF: > { %p1932_p1 = scmp.ge.s32.totalorder %s2109_s30, 2  ;;  %s1603_s23 = sand.u32 1, %s2097_s27  }
 0xeed   : > { %s1604_s20 = scalar_lea.sflag [#allocation5], %s1603_s23 }
 0xeee   : > { %p1929_p2 = pnand %p1932_p1, %p2222_p6 }
 0xef0   : > { %2092 = dma.done.wait (!%p1929_p2), %s1604_s20, 128  }
 0xef1   : > { %2094 = vsyncadd (!%p1929_p2), %s1604_s20, 4294967168  ;;  %p18_p3 = scmp.ge.s32.totalorder %s2205_s11, 4   ;;  %s2679_s27 = smov %s2101_s28 }
 0xef2   : > { %s2680_s28 = smov %s2105_s29  ;;  %s2681_s29 = smov %s2216_s14 }
 0xef3   : > { %s2682_s30 = smov %s2205_s11  ;;  %20 = sbr.rel (!%p18_p3) target bundleno = 3 (0x3), region = 87 }
 0xefa   :  { %1609 = vsyncpa [#allocation5], 1 }
 0xefb   :  { %1611 = vsyncpa [#allocation5 + $0x1], 1 }

// kernel: tpu_custom_call.1
= control target key start
LH: loop header
LB: loop body
LE: loop exit
PB: predicated region body
PF: predicated region fallthrough
CT: control target
= control target key end

     0   :  { %13 = vsyncpa [#allocation5], 0  ;;  %s2652_s0 = inlined_call_operand.vmem [shape: f32[2,8,32], index: 0, kind: input, shape index: {}]   ;;  %s2653_s1 = inlined_call_operand.vmem [shape: bf16[32,96], index: 1, kind: input, shape index: {}]   ;;  %s2654_s2 = inlined_call_operand.vmem [shape: f32[1,96], index: 2, kind: input, shape index: {}]   ;;  %s2655_s3 = inlined_call_operand.vmem [shape: bf16[128,8], index: 3, kind: input, shape index: {}]   ;;  %s2656_s4 = inlined_call_operand.vmem [shape: bf16[32,32], index: 4, kind: input, shape index: {}]   ;;  %s2657_s5 = inlined_call_operand.vmem [shape: f32[1,32], index: 5, kind: input, shape index: {}]   ;;  %s2658_s6 = inlined_call_operand.vmem [shape: f32[1,32], index: 6, kind: input, shape index: {}]   ;;  %s2659_s7 = inlined_call_operand.vmem [shape: f32[1,32], index: 7, kind: input, shape index: {}]   ;;  %s2660_s8 = inlined_call_operand.hbm [shape: f32[2,8,32], index: 8, kind: output, shape index: {}]  }
   0x1   :  { %15 = vsyncpa [#allocation5 + $0x1], 0  ;;  %s2180_s27 = smov 0   ;;  %s2182_s28 = smov 0  }
   0x2   :  { %s2184_s29 = smov 0   ;;  %s2186_s30 = smov 0  }
   0x3 LB: > { %s2201_s9 = sadd.s32 4294967295, %s2109_s30   ;;  %s1650_s10 = sadd.s32 4294967294, %s2109_s30   ;;  %s2109_s30 = sphi %s2186_s30, %s2682_s30   ;;  %s2105_s29 = sphi %s2184_s29, %s2681_s29   ;;  %s2101_s28 = sphi %s2182_s28, %s2680_s28   ;;  %s2097_s27 = sphi %s2180_s27, %s2679_s27  }
   0x4   : > { %s2205_s11 = sadd.s32 1, %s2109_s30   ;;  %s201_s12 = sadd.s32 1, %s2105_s29 }
   0x5   : > { %s198_s13 = ssub.s32 %s2109_s30, %s2205_s11  ;;  %p211_p0 = scmp.ne.s32.totalorder %s2105_s29, %s2101_s28 }
   0x6   : > { %p199_p1 = scmp.eq.s32.totalorder %s198_s13, 0  ;;  %p212_p2 = scmp.eq.s32.totalorder %s2201_s9, 1 }
   0x7   : > { %p217_p3 = scmp.ne.s32.totalorder %s2101_s28, %s2097_s27  ;;  %p218_p4 = scmp.eq.s32.totalorder %s1650_s10, 1 }
   0x8   : > { %s2216_s14 = scalar_select %p199_p1, %s2105_s29, %s201_s12  }
   0x9   : > { %p2218_p5 = por %p212_p2, %p211_p0  ;;  %p2222_p6 = por %p218_p4, %p217_p3 }
   0xa   : > { %p1653_p7 = scmp.ge.s32.totalorder %s2109_s30, 1  ;;  %p264_p8 = scmp.lt.s32.totalorder %s2109_s30, 3 }
   0xc   : > { %p265_p9 = pnand %p1653_p7, %p264_p8 }
   0xd   : > { %v1988_v0 = vld [vmem:[%s2653_s1] sm:$0xff] (!%p265_p9)   ;;  %v2111_v1 = vmov (!%p265_p9), 0.0   ;;  %v1989_v2 = vld [vmem:[%s2653_s1 + $0x8] sm:$0xff] (!%p265_p9)   ;;  %vm2112_vm0 = vmmov (!%p265_p9), 0   ;;  %p297_p10 = scmp.lt.s32.totalorder (!%p265_p9), %s2201_s9, 1  ;;  %vm431_vm1 = vcmask (!%p265_p9), 64512  }
   0xe   : > { %268 = sbr.rel (%p265_p9) target bundleno = 3820 (0xeec), region = 52  ;;  %1782 = vmatprep.subr.bf16.mxu0 (!%p265_p9), %v2111_v1  ;;  %1790 = vmatprep.subr.bf16.mxu1 (!%p265_p9), %v2111_v1  ;;  %v1990_v3 = vld [vmem:[%s2655_s3] sm:$0xff] (!%p265_p9)   ;;  %v1991_v5 = vld [vmem:[%s2655_s3 + $0x8] sm:$0xff] (!%p265_p9)   ;;  %v1992_v6 = vld [vmem:[%s2655_s3 + $0x10] sm:$0xff] (!%p265_p9)   ;;  %vm327_vm2 = vcmask (!%p265_p9), 261120   ;;  %vm372_vm3 = vcmask (!%p265_p9), 781312  }
   0xf   : > { %1783 = vmatpush3.bf16.msra.mxu0 (!%p265_p9), %v1988_v0  ;;  %1786 = vmatprep.mubr.msk.bf16.mxu0 (!%p265_p9), %vm2112_vm0, %v2111_v1  ;;  %v436_v4 = vsel (!%p265_p9), %vm431_vm1, %v1990_v3, 0  ;;  %v1993_v7 = vld [vmem:[%s2655_s3 + $0x18] sm:$0xff] (!%p265_p9)   ;;  %v439_v10 = vsel (!%p265_p9), %vm431_vm1, %v1991_v5, 0  ;;  %v442_v11 = vsel (!%p265_p9), %vm431_vm1, %v1992_v6, 0  ;;  %v1994_v13 = vld [vmem:[%s2655_s3 + $0x20] sm:$0xff] (!%p265_p9)   ;;  %v1995_v15 = vld [vmem:[%s2655_s3 + $0x28] sm:$0xff] (!%p265_p9)  }
  0x10   : > { %1784 = vmatprep.subr.bf16.mxu0 (!%p265_p9), %v2111_v1  ;;  %1806 = vmatprep.mubr.msk.bf16.mxu1 (!%p265_p9), %vm2112_vm0, %v2111_v1  ;;  %v445_v12 = vsel (!%p265_p9), %vm431_vm1, %v1993_v7, 0  ;;  %v448_v14 = vsel (!%p265_p9), %vm431_vm1, %v1994_v13, 0  ;;  %v451_v16 = vsel (!%p265_p9), %vm431_vm1, %v1995_v15, 0  ;;  %v1996_v17 = vld [vmem:[%s2655_s3 + $0x30] sm:$0xff] (!%p265_p9)   ;;  %v1997_v19 = vld [vmem:[%s2655_s3 + $0x38] sm:$0xff] (!%p265_p9)   ;;  %s2113_s18 = smov (!%p265_p9), 96  }
  0x11   : > { %1791 = vmatpush3.bf16.xpose.msra.mxu1 (!%p265_p9), %v436_v4  ;;  %v454_v18 = vsel (!%p265_p9), %vm431_vm1, %v1996_v17, 0  ;;  %v457_v20 = vsel (!%p265_p9), %vm431_vm1, %v1997_v19, 0  ;;  %v1656_v21 = vld [vmem:[%s2654_s2] ss:$0 sm:$0xff] (!%p265_p9)  ;;  %s2114_s19 = smov (!%p265_p9), 2   ;;  %s2115_s21 = smov (!%p265_p9), 1  }
  0x12   : > { %1792 = vmatprep.subr.bf16.mxu1 (!%p265_p9), %v2111_v1  ;;  %s2670_s22 = smov (!%p265_p9), 3   ;;  %s2667_s24 = smov (!%p265_p9), 5   ;;  %vm521_vm4 = vcmask (!%p265_p9), 1040384   ;;  %vm523_vm5 = vcmask (!%p265_p9), 1041408   ;;  %vm525_vm6 = vcmask (!%p265_p9), 1042432   ;;  %vm527_vm7 = vcmask (!%p265_p9), 1043456  }
  0x13   : > { %1785 = vmatpush3.bf16.msra.mxu0 (!%p265_p9), %v1989_v2  ;;  %s2663_s25 = smov (!%p265_p9), 6   ;;  %vm529_vm8 = vcmask (!%p265_p9), 1044480   ;;  %vm531_vm9 = vcmask (!%p265_p9), 1045504   ;;  %vm533_vm10 = vcmask (!%p265_p9), 1046528   ;;  %s2661_s10 = smov (!%p265_p9), 120   ;;  %v2000_v3 = vld [vmem:[%s2655_s3] sm:$0xff] (!%p265_p9)  }
  0x14   : > { %1810 = vmatprep.subr.bf16.mxu0 (!%p265_p9), %v2111_v1  ;;  %s2122_s12 = smov (!%p265_p9), 64   ;;  %s2123_s13 = smov (!%p265_p9), 88   ;;  %v716_v6 = vsel (!%p265_p9), %vm431_vm1, %v2000_v3, 0  ;;  %v2001_v7 = vld [vmem:[%s2655_s3 + $0x8] sm:$0xff] (!%p265_p9)   ;;  %v2004_v13 = vld [vmem:[%s2655_s3 + $0x20] sm:$0xff] (!%p265_p9)   ;;  %v2006_v17 = vld [vmem:[%s2655_s3 + $0x30] sm:$0xff] (!%p265_p9)  }
  0x15   : > { %s298_s23 = scalar_select %p297_p10, %s2201_s9, 1  ;;  %v2005_v15 = vld [vmem:[%s2655_s3 + $0x28] sm:$0xff]   ;;  %v2007_v19 = vld [vmem:[%s2655_s3 + $0x38] sm:$0xff]   ;;  %vm648_vm11 = vcmask 60416   ;;  %vm924_vm12 = vcmask 126016   ;;  %vm1200_vm13 = vcmask 191616  }
  0x16   : > { %s2124_s17 = smov 56   ;;  %vm1476_vm14 = vcmask 257216  }
  0x17   : > { %s1655_s26 = sshll.u32 %s298_s23, 3  ;;  %s2669_s23 = smov 4  }
  0x18   : > { %s2259_s20 = scalar_lea.vmem %s2652_s0, %s1655_s26  ;;  %s2665_s26 = smov 7  }
  0x19   : > { %v302_v8 = vld [vmem:[%s2259_s20] sm:$0xff]  ;;  %1793 = vmatpush3.bf16.xpose.msra.mxu1 %v439_v10 }
  0x1a   : > { %v303_v9 = vpack.c.bf16 %v302_v8, %v302_v8  ;;  %1794 = vmatprep.subr.bf16.mxu1 %v2111_v1  ;;  %v719_v8 = vsel %vm431_vm1, %v2001_v7, 0  ;;  %v2011_v7 = vld [vmem:[%s2655_s3 + $0x10] sm:$0xff]  }
  0x1c   : > { %1787 = vmatmul.mubr.msk.bf16.vlgmr.msra.gmra.mrb[0].mxu0 %vm327_vm2, %v303_v9  ;;  %v2002_v9 = vld [vmem:[%s2655_s3 + $0x10] sm:$0xff]  }
  0x1d   : > { %1812 = vmatprep.mubr.msk.bf16.mxu0 %vm2112_vm0, %v2111_v1  ;;  %v722_v10 = vsel %vm431_vm1, %v2002_v9, 0  ;;  %v2012_v9 = vld [vmem:[%s2655_s3 + $0x18] sm:$0xff]  }
  0x21   : > { %1795 = vmatpush3.bf16.xpose.msra.mxu1 %v442_v11  ;;  %v2003_v11 = vld [vmem:[%s2655_s3 + $0x18] sm:$0xff]  }
  0x22   : > { %1796 = vmatprep.subr.bf16.mxu1 %v2111_v1 }
  0x29   : > { %1797 = vmatpush3.bf16.xpose.msra.mxu1 %v445_v12  ;;  %v725_v12 = vsel %vm431_vm1, %v2003_v11, 0  ;;  %v2013_v11 = vld [vmem:[%s2655_s3 + $0x20] sm:$0xff]  }
  0x2a   : > { %1798 = vmatprep.subr.bf16.mxu1 %v2111_v1 }
  0x31   : > { %1799 = vmatpush3.bf16.xpose.msra.mxu1 %v448_v14  ;;  %v728_v14 = vsel %vm431_vm1, %v2004_v13, 0  ;;  %v2014_v13 = vld [vmem:[%s2655_s3 + $0x28] sm:$0xff]  }
  0x32   : > { %1800 = vmatprep.subr.bf16.mxu1 %v2111_v1 }
  0x39   : > { %1801 = vmatpush3.bf16.xpose.msra.mxu1 %v451_v16  ;;  %v731_v16 = vsel %vm431_vm1, %v2005_v15, 0  ;;  %v2015_v15 = vld [vmem:[%s2655_s3 + $0x30] sm:$0xff]  }
  0x3a   : > { %1802 = vmatprep.subr.bf16.mxu1 %v2111_v1 }
  0x41   : > { %1803 = vmatpush3.bf16.xpose.msra.mxu1 %v454_v18  ;;  %v734_v18 = vsel %vm431_vm1, %v2006_v17, 0  ;;  %v2016_v17 = vld [vmem:[%s2655_s3 + $0x38] sm:$0xff]  }
  0x42   : > { %1804 = vmatprep.subr.bf16.mxu1 %v2111_v1 }
  0x49   : > { %1805 = vmatpush3.bf16.xpose.msra.mxu1 %v457_v20  ;;  %v737_v20 = vsel %vm431_vm1, %v2007_v19, 0 }
  0x4a   : > { %1842 = vmatprep.subr.bf16.mxu1 %v2111_v1 }
  0xef   : > { %v365_v22 = vpop.f32.mrb[0].mxu0 }
  0xf0   : > { %v366_v23 = vadd.f32 %v1656_v21, %v365_v22  ;;  %v1788_v24 = vpop.f32.mrb[1].mxu0 }
  0xf1   : > { %v368_v25 = vpop.f32.mrb[2].mxu0 }
  0xf2   : > { %v371_v26 = vpack.c.bf16 %v366_v23, %v366_v23  ;;  %v1789_v27 = vpop.f32.mrb[3].mxu0 }
  0xf4   : > { %373 = vst.msk [vmem:[#allocation2] sm:$0xf] %vm372_vm3, %v371_v26 }
  0xfb   : > { %v374_v28 = vld [vmem:[#allocation2] sm:$0xf] }
  0xfc   : > { %1807 = vmatmul.mubr.msk.bf16.vlgmr.msra.gmra.mrb[0].mxu1 %vm431_vm1, %v374_v28  ;;  %v1669_v29 = vcombine.low %v374_v28, %v374_v28  ;;  %v2319_v54 = vld [vmem:[#allocation2] ss:$0 sps:$4 sm:$0xff]  }
  0xfd   : > { %1844 = vmatprep.mubr.msk.bf16.mxu1 %vm2112_vm0, %v2111_v1 }
  0xfe   : > { %538 = vrot.lane.b32.xlu0 %v1669_v29, %s2113_s18  ;;  %s2125_s18 = smov 112  }
 0x170   : > { %v539_v30 = vpop.permute.xlu0 %538 }
 0x171   : > { %v545_v31 = vsel %vm431_vm1, %v539_v30, 0 }
 0x172   : > { %1811 = vmatpush3.bf16.xpose.msra.mxu0 %v545_v31 }
 0x173   : > { %1816 = vmatprep.subr.bf16.mxu0 %v2111_v1 }
 0x179   : > { %1813 = vmatmul.mubr.msk.bf16.vlgmr.msra.gmra.mrb[4].mxu0 %vm431_vm1, %v374_v28 }
 0x17a   : > { %1818 = vmatprep.mubr.msk.bf16.mxu0 %vm2112_vm0, %v2111_v1 }
 0x1cf   : > { %v493_v32 = vpop.f32.mrb[0].mxu1 }
 0x1d0   : > { %503 = vrot.lane.b32.xlu1 %v493_v32, %s2114_s19  ;;  %500 = vrot.lane.b32.xlu0 %v493_v32, %s2115_s21  ;;  %v1808_v33 = vpop.f32.mrb[1].mxu1 }
 0x1d1   : > { %v496_v34 = vpop.f32.mrb[2].mxu1  ;;  %v2388_v33 = vld [vmem:[#allocation2] ss:$0 sps:$4 sm:$0xff]  }
 0x1d2   : > { %v1809_v35 = vpop.f32.mrb[3].mxu1 }
 0x1d4   : > { %506 = vrot.lane.b32.xlu1 %v493_v32, %s2670_s22  ;;  %509 = vrot.lane.b32.xlu0 %v493_v32, %s2669_s23 }
 0x1d8   : > { %512 = vrot.lane.b32.xlu1 %v493_v32, %s2667_s24  ;;  %515 = vrot.lane.b32.xlu0 %v493_v32, %s2663_s25  ;;  %s2126_s25 = smov 80  }
 0x1dc   : > { %518 = vrot.lane.b32.xlu1 %v493_v32, %s2665_s26 }
 0x242   : > { %v504_v36 = vpop.permute.xlu1 %503  ;;  %v501_v37 = vpop.permute.xlu0 %500 }
 0x243   : > { %v522_v38 = vsel %vm521_vm4, %v493_v32, %v501_v37 }
 0x244   : > { %v524_v40 = vsel %vm523_vm5, %v522_v38, %v504_v36 }
 0x246   : > { %v507_v39 = vpop.permute.xlu1 %506  ;;  %v510_v41 = vpop.permute.xlu0 %509 }
 0x247   : > { %v526_v42 = vsel %vm525_vm6, %v524_v40, %v507_v39 }
 0x248   : > { %v528_v43 = vsel %vm527_vm7, %v526_v42, %v510_v41 }
 0x24a   : > { %v513_v44 = vpop.permute.xlu1 %512  ;;  %v516_v46 = vpop.permute.xlu0 %515 }
 0x24b   : > { %v530_v45 = vsel %vm529_vm8, %v528_v43, %v513_v44 }
 0x24c   : > { %v581_v47 = vpop.f32.mrb[4].mxu0  ;;  %v532_v49 = vsel %vm531_vm9, %v530_v45, %v516_v46 }
 0x24d   : > { %v1814_v48 = vpop.f32.mrb[5].mxu0 }
 0x24e   : > { %v519_v50 = vpop.permute.xlu1 %518  ;;  %v584_v51 = vpop.f32.mrb[6].mxu0 }
 0x24f   : > { %v1815_v52 = vpop.f32.mrb[7].mxu0  ;;  %v534_v53 = vsel %vm533_vm10, %v532_v49, %v519_v50 }
 0x250   : > { %541 = vrot.lane.b32.xlu0 %v534_v53, %s2661_s10 }
 0x254   : > { %597 = vrot.lane.b32.xlu0 %v1669_v29, %s2122_s12  ;;  %s2674_s12 = smov 120  }
 0x258   : > { %670 = vrot.lane.b32.xlu0 %v2319_v54, %s2661_s10  ;;  %s2673_s10 = smov 6  }
 0x25c   : > { %808 = vrot.lane.b32.xlu0 %v2319_v54, %s2123_s13  ;;  %s2127_s13 = smov 48  }
 0x2c2   : > { %v542_v55 = vpop.permute.xlu0 %541 }
 0x2c3   : > { %v582_v56 = vadd.f32 %v581_v47, %v542_v55 }
 0x2c5   : > { %v587_v57 = vsel %vm431_vm1, %v582_v56, -inf }
 0x2c6   : > { %v598_v58 = vpop.permute.xlu0 %597  ;;  %588 = vmax.xlane.f32.xlu1 %v587_v57 }
 0x2c7   : > { %v603_v59 = vsel %vm527_vm7, %v598_v58, 0 }
 0x2c8   : > { %1817 = vmatpush3.bf16.msra.mxu0 %v603_v59 }
 0x2c9   : > { %1822 = vmatprep.subr.bf16.mxu0 %v2111_v1 }
 0x2ca   : > { %v671_v60 = vpop.permute.xlu0 %670 }
 0x2ce   : > { %v809_v61 = vpop.permute.xlu0 %808 }
 0x2cf   : > { %v815_v62 = vsel %vm431_vm1, %v809_v61, 0 }
 0x2d0   : > { %1843 = vmatpush3.bf16.xpose.msra.mxu1 %v815_v62 }
 0x2d1   : > { %1848 = vmatprep.subr.bf16.mxu1 %v2111_v1 }
 0x2d7   : > { %1845 = vmatmul.mubr.msk.bf16.vlgmr.msra.gmra.mrb[4].mxu1 %vm431_vm1, %v671_v60 }
 0x2d8   : > { %1850 = vmatprep.mubr.msk.bf16.mxu1 %vm2112_vm0, %v2111_v1 }
 0x353   : > { %v589_v63 = vpop.xlane.xlu1 %588 }
 0x354   : > { %v590_v0 = vsub.f32 %v582_v56, %v589_v63  ;;  %v2009_v63 = vld [vmem:[%s2655_s3] sm:$0xff]  }
 0x355   : > { %v992_v3 = vsel %vm431_vm1, %v2009_v63, 0 }
 0x356   : > { %v591_v2 = vmul.f32 1.442695, %v590_v0 }
 0x358   : > { %2028 = vpow2.f32 %v591_v2 }
 0x362   : > { %v2335_v4 = vpop.eup %2028 }
 0x363   : > { %v596_v5 = vpack.c.bf16 %v2335_v4, %v2335_v4 }
 0x365   : > { %1819 = vmatmul.mubr.msk.bf16.vlgmr.msra.gmra.mrb[8].mxu0 %vm431_vm1, %v596_v5  ;;  %v2010_v5 = vld [vmem:[%s2655_s3 + $0x8] sm:$0xff]  }
 0x366   : > { %1823 = vmatpush3.bf16.xpose.msra.mxu0 %v716_v6  ;;  %1838 = vmatprep.mubr.msk.bf16.mxu0 %vm2112_vm0, %v2111_v1  ;;  %v995_v6 = vsel %vm431_vm1, %v2010_v5, 0  ;;  %v2021_v5 = vld [vmem:[%s2655_s3 + $0x18] sm:$0xff]  }
 0x367   : > { %1824 = vmatprep.subr.bf16.mxu0 %v2111_v1 }
 0x36e   : > { %1825 = vmatpush3.bf16.xpose.msra.mxu0 %v719_v8  ;;  %v998_v8 = vsel %vm431_vm1, %v2011_v7, 0  ;;  %v2022_v7 = vld [vmem:[%s2655_s3 + $0x20] sm:$0xff]  }
 0x36f   : > { %1826 = vmatprep.subr.bf16.mxu0 %v2111_v1 }
 0x376   : > { %1827 = vmatpush3.bf16.xpose.msra.mxu0 %v722_v10  ;;  %v1001_v10 = vsel %vm431_vm1, %v2012_v9, 0  ;;  %v2023_v9 = vld [vmem:[%s2655_s3 + $0x28] sm:$0xff]  }
 0x377   : > { %1828 = vmatprep.subr.bf16.mxu0 %v2111_v1 }
 0x37e   : > { %1829 = vmatpush3.bf16.xpose.msra.mxu0 %v725_v12  ;;  %v1004_v12 = vsel %vm431_vm1, %v2013_v11, 0  ;;  %v2024_v11 = vld [vmem:[%s2655_s3 + $0x30] sm:$0xff]  }
 0x37f   : > { %1830 = vmatprep.subr.bf16.mxu0 %v2111_v1 }
 0x386   : > { %1831 = vmatpush3.bf16.xpose.msra.mxu0 %v728_v14  ;;  %v1007_v14 = vsel %vm431_vm1, %v2014_v13, 0  ;;  %v2025_v13 = vld [vmem:[%s2655_s3 + $0x38] sm:$0xff]  }
 0x387   : > { %1832 = vmatprep.subr.bf16.mxu0 %v2111_v1 }
 0x38e   : > { %1833 = vmatpush3.bf16.xpose.msra.mxu0 %v731_v16  ;;  %v1010_v16 = vsel %vm431_vm1, %v2015_v15, 0 }
 0x38f   : > { %1834 = vmatprep.subr.bf16.mxu0 %v2111_v1 }
 0x396   : > { %1835 = vmatpush3.bf16.xpose.msra.mxu0 %v734_v18  ;;  %v1013_v18 = vsel %vm431_vm1, %v2016_v17, 0 }
 0x397   : > { %1836 = vmatprep.subr.bf16.mxu0 %v2111_v1 }
 0x39e   : > { %1837 = vmatpush3.bf16.xpose.msra.mxu0 %v737_v20 }
 0x39f   : > { %1874 = vmatprep.subr.bf16.mxu0 %v2111_v1 }
 0x3a5   : > { %1839 = vmatmul.mubr.msk.bf16.vlgmr.msra.gmra.mrb[12].mxu0 %vm431_vm1, %v671_v60 }
 0x3a6   : > { %1876 = vmatprep.mubr.msk.bf16.mxu0 %vm2112_vm0, %v2111_v1 }
 0x3aa   : > { %v851_v21 = vpop.f32.mrb[4].mxu1 }
 0x3ab   : > { %v1846_v22 = vpop.f32.mrb[5].mxu1 }
 0x3ac   : > { %v854_v23 = vpop.f32.mrb[6].mxu1 }
 0x3ad   : > { %v1847_v24 = vpop.f32.mrb[7].mxu1 }
 0x438   : > { %v2382_v25 = vpop.f32.mrb[8].mxu0 }
 0x439   : > { %v1820_v26 = vpop.f32.mrb[9].mxu0 }
 0x43a   : > { %v642_v27 = vpop.f32.mrb[10].mxu0 }
 0x43b   : > { %v1821_v28 = vpop.f32.mrb[11].mxu0 }
 0x43c   : > { %v2474_v28 = vld [vmem:[#allocation2] ss:$0 sps:$4 sm:$0xff]  }
 0x478   : > { %v773_v29 = vpop.f32.mrb[12].mxu0 }
 0x479   : > { %798 = vrot.lane.b32.xlu1 %v773_v29, %s2665_s26  ;;  %780 = vrot.lane.b32.xlu0 %v773_v29, %s2115_s21  ;;  %v1840_v30 = vpop.f32.mrb[13].mxu0  ;;  %s2675_s26 = smov 5  }
 0x47a   : > { %v776_v31 = vpop.f32.mrb[14].mxu0 }
 0x47b   : > { %v1841_v32 = vpop.f32.mrb[15].mxu0 }
 0x47d   : > { %867 = vrot.lane.b32.xlu1 %v2319_v54, %s2124_s17  ;;  %783 = vrot.lane.b32.xlu0 %v773_v29, %s2114_s19  ;;  %s2128_s17 = smov 104  }
 0x481   : > { %946 = vrot.lane.b32.xlu1 %v2388_v33, %s2125_s18  ;;  %786 = vrot.lane.b32.xlu0 %v773_v29, %s2670_s22  ;;  %s2676_s18 = smov 7  }
 0x485   : > { %1084 = vrot.lane.b32.xlu1 %v2388_v33, %s2126_s25  ;;  %789 = vrot.lane.b32.xlu0 %v773_v29, %s2669_s23  ;;  %s2130_s25 = smov 40  }
 0x489   : > { %792 = vrot.lane.b32.xlu0 %v773_v29, %s2667_s24  ;;  %s2129_s24 = smov 72  }
 0x48d   : > { %795 = vrot.lane.b32.xlu0 %v773_v29, %s2673_s10 }
 0x4eb   : > { %v799_v34 = vpop.permute.xlu1 %798  ;;  %v781_v35 = vpop.permute.xlu0 %780 }
 0x4ec   : > { %v801_v44 = vsel %vm521_vm4, %v773_v29, %v781_v35 }
 0x4ef   : > { %v868_v36 = vpop.permute.xlu1 %867  ;;  %v784_v37 = vpop.permute.xlu0 %783 }
 0x4f0   : > { %v873_v38 = vsel %vm527_vm7, %v868_v36, 0  ;;  %v802_v46 = vsel %vm523_vm5, %v801_v44, %v784_v37 }
 0x4f1   : > { %1849 = vmatpush3.bf16.msra.mxu1 %v873_v38 }
 0x4f2   : > { %1854 = vmatprep.subr.bf16.mxu1 %v2111_v1 }
 0x4f3   : > { %v2398_v39 = vpop.permute.xlu1 %946  ;;  %v787_v40 = vpop.permute.xlu0 %786 }
 0x4f4   : > { %v803_v47 = vsel %vm525_vm6, %v802_v46, %v787_v40 }
 0x4f7   : > { %v1085_v41 = vpop.permute.xlu1 %1084  ;;  %v790_v42 = vpop.permute.xlu0 %789 }
 0x4f8   : > { %v1091_v43 = vsel %vm431_vm1, %v1085_v41, 0  ;;  %v804_v48 = vsel %vm527_vm7, %v803_v47, %v790_v42 }
 0x4f9   : > { %1875 = vmatpush3.bf16.xpose.msra.mxu0 %v1091_v43 }
 0x4fa   : > { %1880 = vmatprep.subr.bf16.mxu0 %v2111_v1 }
 0x4fb   : > { %v793_v45 = vpop.permute.xlu0 %792 }
 0x4fc   : > { %v805_v49 = vsel %vm529_vm8, %v804_v48, %v793_v45 }
 0x4ff   : > { %v796_v50 = vpop.permute.xlu0 %795 }
 0x500   : > { %v806_v51 = vsel %vm531_vm9, %v805_v49, %v796_v50  ;;  %1877 = vmatmul.mubr.msk.bf16.vlgmr.msra.gmra.mrb[16].mxu0 %vm431_vm1, %v2398_v39 }
 0x501   : > { %v807_v52 = vsel %vm533_vm10, %v806_v51, %v799_v34  ;;  %1882 = vmatprep.mubr.msk.bf16.mxu0 %vm2112_vm0, %v2111_v1 }
 0x502   : > { %811 = vrot.lane.b32.xlu0 %v807_v52, %s2674_s12 }
 0x574   : > { %v812_v53 = vpop.permute.xlu0 %811 }
 0x575   : > { %v852_v54 = vadd.f32 %v851_v21, %v812_v53 }
 0x577   : > { %v857_v55 = vsel %vm431_vm1, %v852_v54, -inf }
 0x578   : > { %858 = vmax.xlane.f32.xlu0 %v857_v55 }
 0x5d3   : > { %v2415_v56 = vpop.f32.mrb[16].mxu0 }
 0x5d4   : > { %v1878_v57 = vpop.f32.mrb[17].mxu0 }
 0x5d5   : > { %v1130_v58 = vpop.f32.mrb[18].mxu0 }
 0x5d6   : > { %v1879_v59 = vpop.f32.mrb[19].mxu0 }
 0x5d7   : > { %v2018_v59 = vld [vmem:[%s2655_s3] sm:$0xff]  }
 0x605   : > { %v859_v60 = vpop.xlane.xlu0 %858 }
 0x606   : > { %v860_v61 = vsub.f32 %v852_v54, %v859_v60 }
 0x608   : > { %v861_v62 = vmul.f32 1.442695, %v860_v61  ;;  %v1268_v61 = vsel %vm431_vm1, %v2018_v59, 0 }
 0x60a   : > { %2030 = vpow2.f32 %v861_v62  ;;  %v2019_v62 = vld [vmem:[%s2655_s3 + $0x8] sm:$0xff]  }
 0x60b   : > { %v1271_v63 = vsel %vm431_vm1, %v2019_v62, 0 }
 0x614   : > { %v2420_v0 = vpop.eup %2030 }
 0x615   : > { %v866_v2 = vpack.c.bf16 %v2420_v0, %v2420_v0 }
 0x617   : > { %1851 = vmatmul.mubr.msk.bf16.vlgmr.msra.gmra.mrb[8].mxu1 %vm431_vm1, %v866_v2  ;;  %v2020_v2 = vld [vmem:[%s2655_s3 + $0x10] sm:$0xff]  }
 0x618   : > { %1855 = vmatpush3.bf16.xpose.msra.mxu1 %v992_v3  ;;  %1870 = vmatprep.mubr.msk.bf16.mxu1 %vm2112_vm0, %v2111_v1  ;;  %v1274_v3 = vsel %vm431_vm1, %v2020_v2, 0 }
 0x619   : > { %1856 = vmatprep.subr.bf16.mxu1 %v2111_v1 }
 0x620   : > { %1857 = vmatpush3.bf16.xpose.msra.mxu1 %v995_v6  ;;  %v1277_v6 = vsel %vm431_vm1, %v2021_v5, 0  ;;  %v2027_v5 = vld [vmem:[%s2656_s4 + $0x8] sm:$0xff]  }
 0x621   : > { %1858 = vmatprep.subr.bf16.mxu1 %v2111_v1 }
 0x628   : > { %1859 = vmatpush3.bf16.xpose.msra.mxu1 %v998_v8  ;;  %v1280_v8 = vsel %vm431_vm1, %v2022_v7, 0 }
 0x629   : > { %1860 = vmatprep.subr.bf16.mxu1 %v2111_v1 }
 0x630   : > { %1861 = vmatpush3.bf16.xpose.msra.mxu1 %v1001_v10  ;;  %v1283_v10 = vsel %vm431_vm1, %v2023_v9, 0 }
 0x631   : > { %1862 = vmatprep.subr.bf16.mxu1 %v2111_v1 }
 0x638   : > { %1863 = vmatpush3.bf16.xpose.msra.mxu1 %v1004_v12  ;;  %v1286_v12 = vsel %vm431_vm1, %v2024_v11, 0 }
 0x639   : > { %1864 = vmatprep.subr.bf16.mxu1 %v2111_v1 }
 0x640   : > { %1865 = vmatpush3.bf16.xpose.msra.mxu1 %v1007_v14  ;;  %v1289_v14 = vsel %vm431_vm1, %v2025_v13, 0 }
 0x641   : > { %1866 = vmatprep.subr.bf16.mxu1 %v2111_v1 }
 0x648   : > { %1867 = vmatpush3.bf16.xpose.msra.mxu1 %v1010_v16 }
 0x649   : > { %1868 = vmatprep.subr.bf16.mxu1 %v2111_v1 }
 0x650   : > { %1869 = vmatpush3.bf16.xpose.msra.mxu1 %v1013_v18 }
 0x651   : > { %1906 = vmatprep.subr.bf16.mxu1 %v2111_v1 }
 0x657   : > { %1871 = vmatmul.mubr.msk.bf16.vlgmr.msra.gmra.mrb[12].mxu1 %vm431_vm1, %v2398_v39 }
 0x658   : > { %1908 = vmatprep.mubr.msk.bf16.mxu1 %vm2112_vm0, %v2111_v1 }
 0x6ea   : > { %v2468_v19 = vpop.f32.mrb[8].mxu1 }
 0x6eb   : > { %v1852_v20 = vpop.f32.mrb[9].mxu1 }
 0x6ec   : > { %v912_v21 = vpop.f32.mrb[10].mxu1 }
 0x6ed   : > { %v1853_v22 = vpop.f32.mrb[11].mxu1 }
 0x72a   : > { %v1049_v23 = vpop.f32.mrb[12].mxu1 }
 0x72b   : > { %1065 = vrot.lane.b32.xlu0 %v1049_v23, %s2669_s23  ;;  %1056 = vrot.lane.b32.xlu1 %v1049_v23, %s2115_s21  ;;  %v1872_v24 = vpop.f32.mrb[13].mxu1  ;;  %s2133_s23 = smov 24  }
 0x72c   : > { %v1052_v26 = vpop.f32.mrb[14].mxu1  ;;  %v863_v24 = vsel %vm431_vm1, %v2420_v0, 0.0 }
 0x72d   : > { %v1873_v27 = vpop.f32.mrb[15].mxu1 }
 0x72f   : > { %1143 = vrot.lane.b32.xlu0 %v2388_v33, %s2127_s13  ;;  %1059 = vrot.lane.b32.xlu1 %v1049_v23, %s2114_s19  ;;  %s2677_s13 = smov 3  }
 0x733   : > { %1222 = vrot.lane.b32.xlu0 %v2474_v28, %s2128_s17  ;;  %1062 = vrot.lane.b32.xlu1 %v1049_v23, %s2670_s22  ;;  %s2678_s22 = smov 4  }
 0x737   : > { %1360 = vrot.lane.b32.xlu0 %v2474_v28, %s2129_s24  ;;  %1068 = vrot.lane.b32.xlu1 %v1049_v23, %s2675_s26 }
 0x73b   : > { %1071 = vrot.lane.b32.xlu1 %v1049_v23, %s2673_s10 }
 0x73f   : > { %1074 = vrot.lane.b32.xlu1 %v1049_v23, %s2676_s18 }
 0x79d   : > { %v1066_v29 = vpop.permute.xlu0 %1065  ;;  %v1057_v30 = vpop.permute.xlu1 %1056 }
 0x79e   : > { %v1077_v38 = vsel %vm521_vm4, %v1049_v23, %v1057_v30 }
 0x7a1   : > { %v1144_v31 = vpop.permute.xlu0 %1143  ;;  %v1060_v32 = vpop.permute.xlu1 %1059 }
 0x7a2   : > { %v1149_v33 = vsel %vm527_vm7, %v1144_v31, 0  ;;  %v1078_v40 = vsel %vm523_vm5, %v1077_v38, %v1060_v32 }
 0x7a3   : > { %1881 = vmatpush3.bf16.msra.mxu0 %v1149_v33 }
 0x7a4   : > { %1886 = vmatprep.subr.bf16.mxu0 %v2111_v1 }
 0x7a5   : > { %v2484_v34 = vpop.permute.xlu0 %1222  ;;  %v1063_v35 = vpop.permute.xlu1 %1062 }
 0x7a6   : > { %v1079_v41 = vsel %vm525_vm6, %v1078_v40, %v1063_v35 }
 0x7a7   : > { %v1080_v43 = vsel %vm527_vm7, %v1079_v41, %v1066_v29 }
 0x7a9   : > { %v1361_v36 = vpop.permute.xlu0 %1360  ;;  %v1069_v37 = vpop.permute.xlu1 %1068 }
 0x7aa   : > { %v1367_v39 = vsel %vm431_vm1, %v1361_v36, 0  ;;  %v1081_v44 = vsel %vm529_vm8, %v1080_v43, %v1069_v37 }
 0x7ab   : > { %1907 = vmatpush3.bf16.xpose.msra.mxu1 %v1367_v39 }
 0x7ac   : > { %1912 = vmatprep.subr.bf16.mxu1 %v2111_v1 }
 0x7ad   : > { %v1072_v42 = vpop.permute.xlu1 %1071 }
 0x7ae   : > { %v1082_v45 = vsel %vm531_vm9, %v1081_v44, %v1072_v42 }
 0x7b1   : > { %v1075_v46 = vpop.permute.xlu1 %1074 }
 0x7b2   : > { %1909 = vmatmul.mubr.msk.bf16.vlgmr.msra.gmra.mrb[16].mxu1 %vm431_vm1, %v2484_v34  ;;  %v1083_v47 = vsel %vm533_vm10, %v1082_v45, %v1075_v46 }
 0x7b3   : > { %1087 = vrot.lane.b32.xlu1 %v1083_v47, %s2674_s12  ;;  %1914 = vmatprep.mubr.msk.bf16.mxu1 %vm2112_vm0, %v2111_v1 }
 0x825   : > { %v1088_v48 = vpop.permute.xlu1 %1087 }
 0x826   : > { %v1128_v49 = vadd.f32 %v2415_v56, %v1088_v48 }
 0x828   : > { %v1133_v50 = vsel %vm431_vm1, %v1128_v49, -inf }
 0x829   : > { %1134 = vmax.xlane.f32.xlu1 %v1133_v50 }
 0x885   : > { %v2502_v51 = vpop.f32.mrb[16].mxu1 }
 0x886   : > { %v1910_v52 = vpop.f32.mrb[17].mxu1 }
 0x887   : > { %v1406_v53 = vpop.f32.mrb[18].mxu1 }
 0x888   : > { %v1911_v54 = vpop.f32.mrb[19].mxu1 }
 0x8b6   : > { %v1135_v55 = vpop.xlane.xlu1 %1134 }
 0x8b7   : > { %v1136_v57 = vsub.f32 %v1128_v49, %v1135_v55  ;;  %v593_v55 = vsel %vm431_vm1, %v2335_v4, 0.0 }
 0x8b9   : > { %v1137_v58 = vmul.f32 1.442695, %v1136_v57 }
 0x8bb   : > { %2032 = vpow2.f32 %v1137_v58 }
 0x8c5   : > { %v2507_v60 = vpop.eup %2032 }
 0x8c6   : > { %v1142_v56 = vpack.c.bf16 %v2507_v60, %v2507_v60  ;;  %v1139_v44 = vsel %vm431_vm1, %v2507_v60, 0.0 }
 0x8c8   : > { %1883 = vmatmul.mubr.msk.bf16.vlgmr.msra.gmra.mrb[20].mxu0 %vm431_vm1, %v1142_v56 }
 0x8c9   : > { %1887 = vmatpush3.bf16.xpose.msra.mxu0 %v1268_v61  ;;  %1902 = vmatprep.mubr.msk.bf16.mxu0 %vm2112_vm0, %v2111_v1 }
 0x8ca   : > { %1888 = vmatprep.subr.bf16.mxu0 %v2111_v1 }
 0x8d1   : > { %1889 = vmatpush3.bf16.xpose.msra.mxu0 %v1271_v63 }
 0x8d2   : > { %1890 = vmatprep.subr.bf16.mxu0 %v2111_v1 }
 0x8d9   : > { %1891 = vmatpush3.bf16.xpose.msra.mxu0 %v1274_v3 }
 0x8da   : > { %1892 = vmatprep.subr.bf16.mxu0 %v2111_v1 }
 0x8e1   : > { %1893 = vmatpush3.bf16.xpose.msra.mxu0 %v1277_v6 }
 0x8e2   : > { %1894 = vmatprep.subr.bf16.mxu0 %v2111_v1 }
 0x8e9   : > { %1895 = vmatpush3.bf16.xpose.msra.mxu0 %v1280_v8 }
 0x8ea   : > { %1896 = vmatprep.subr.bf16.mxu0 %v2111_v1 }
 0x8f1   : > { %1897 = vmatpush3.bf16.xpose.msra.mxu0 %v1283_v10 }
 0x8f2   : > { %1898 = vmatprep.subr.bf16.mxu0 %v2111_v1 }
 0x8f9   : > { %1899 = vmatpush3.bf16.xpose.msra.mxu0 %v1286_v12 }
 0x8fa   : > { %1900 = vmatprep.subr.bf16.mxu0 %v2111_v1 }
 0x901   : > { %1901 = vmatpush3.bf16.xpose.msra.mxu0 %v1289_v14 }
 0x908   : > { %1903 = vmatmul.mubr.msk.bf16.vlgmr.msra.gmra.mrb[24].mxu0 %vm431_vm1, %v2484_v34 }
 0x99b   : > { %v1185_v15 = vpop.f32.mrb[20].mxu0 }
 0x99c   : > { %v1884_v16 = vpop.f32.mrb[21].mxu0 }
 0x99d   : > { %v1188_v17 = vpop.f32.mrb[22].mxu0 }
 0x99e   : > { %v1885_v18 = vpop.f32.mrb[23].mxu0 }
 0x9db   : > { %v1325_v20 = vpop.f32.mrb[24].mxu0 }
 0x9dc   : > { %1350 = vrot.lane.b32.xlu1 %v1325_v20, %s2676_s18  ;;  %1332 = vrot.lane.b32.xlu0 %v1325_v20, %s2115_s21  ;;  %v1904_v21 = vpop.f32.mrb[25].mxu0  ;;  %s2132_s21 = smov 8  }
 0x9dd   : > { %v1328_v22 = vpop.f32.mrb[26].mxu0 }
 0x9de   : > { %v1905_v23 = vpop.f32.mrb[27].mxu0 }
 0x9e0   : > { %1419 = vrot.lane.b32.xlu1 %v2474_v28, %s2130_s25  ;;  %1335 = vrot.lane.b32.xlu0 %v1325_v20, %s2114_s19  ;;  %s2131_s19 = smov 16   ;;  %s294_s25 = sand.u32 1, %s2101_s28  }
 0x9e1   : > { %s1578_s24 = scalar_lea.sflag [#allocation5], %s294_s25 }
 0x9e4   : > { %1338 = vrot.lane.b32.xlu0 %v1325_v20, %s2677_s13  ;;  %s1654_s13 = sshll.u32 %s294_s25, 3 }
 0x9e8   : > { %1341 = vrot.lane.b32.xlu0 %v1325_v20, %s2678_s22 }
 0x9ec   : > { %1344 = vrot.lane.b32.xlu0 %v1325_v20, %s2675_s26 }
 0x9f0   : > { %1347 = vrot.lane.b32.xlu0 %v1325_v20, %s2673_s10  ;;  %s1718_s10 = sshll.u32 %s2201_s9, 7  ;;  %s2134_s9 = smov [#allocation4]  }
 0x9f1   : > { %s2609_s17 = scalar_lea.hbm %s2660_s8, %s1718_s10 }
 0xa04   : > { %864 = vadd.xlane.f32.xlu1 %v863_v24 }
 0xa4e   : > { %v1351_v26 = vpop.permute.xlu1 %1350  ;;  %v1333_v27 = vpop.permute.xlu0 %1332 }
 0xa4f   : > { %v1353_v33 = vsel %vm521_vm4, %v1325_v20, %v1333_v27  ;;  %v2046_v20 = vld [vmem:[%s2259_s20] sm:$0xff] }
 0xa52   : > { %v1420_v29 = vpop.permute.xlu1 %1419  ;;  %v1336_v30 = vpop.permute.xlu0 %1335 }
 0xa53   : > { %v1425_v28 = vsel %vm527_vm7, %v1420_v29, 0  ;;  %v1354_v35 = vsel %vm523_vm5, %v1353_v33, %v1336_v30  ;;  %v1715_v33 = vld [vmem:[%s2658_s6] ss:$0 sm:$0xff] }
 0xa54   : > { %1913 = vmatpush3.bf16.msra.mxu1 %v1425_v28 }
 0xa55   : > { %1918 = vmatprep.subr.bf16.mxu1 %v2111_v1 }
 0xa56   : > { %v1339_v31 = vpop.permute.xlu0 %1338 }
 0xa57   : > { %v1355_v36 = vsel %vm525_vm6, %v1354_v35, %v1339_v31  ;;  %v1716_v35 = vld [vmem:[%s2659_s7] ss:$0 sm:$0xff] }
 0xa5a   : > { %v1342_v32 = vpop.permute.xlu0 %1341 }
 0xa5b   : > { %v1356_v0 = vsel %vm527_vm7, %v1355_v36, %v1342_v32 }
 0xa5e   : > { %v1345_v34 = vpop.permute.xlu0 %1344 }
 0xa5f   : > { %v1357_v37 = vsel %vm529_vm8, %v1356_v0, %v1345_v34 }
 0xa62   : > { %v1348_v38 = vpop.permute.xlu0 %1347 }
 0xa63   : > { %v1358_v39 = vsel %vm531_vm9, %v1357_v37, %v1348_v38 }
 0xa64   : > { %v1359_v40 = vsel %vm533_vm10, %v1358_v39, %v1351_v26 }
 0xa65   : > { %1363 = vrot.lane.b32.xlu0 %v1359_v40, %s2674_s12  ;;  %s296_s12 = scalar_lea.vmem [#allocation4], %s1654_s13  ;;  %s2051_s13 = sshll.u32 %s2134_s9, 4  ;;  %s2052_s13 = int_to_ptr.vmem [resolvable:$false] %s2051_s13 }
 0xa66   : > { %s1591_s26 = sshll.u32 %s296_s12, 4  ;;  %s2053_s22 = scalar_lea.vmem %s2052_s13, 256  ;;  %s2611_s26 = int_to_ptr.vmem [resolvable:$true] %s1591_s26 }
 0xa67   : > { %s2047_s20 = scalar_lea.vmem %s2611_s26, 128  ;;  %p2054_p0 = scmp.lt.s32.totalorder %s2611_s26, %s2052_s13 }
 0xa68   : > { %p2048_p11 = scmp.ne.s32.totalorder %s2611_s26, %s2047_s20  ;;  %p2055_p1 = scmp.lt.s32.totalorder %s2053_s22, %s2047_s20 }
 0xa6a   : > { %p2049_p12 = pnand %p2048_p11, %p2218_p5  ;;  %p2056_p2 = por %p2055_p1, %p2054_p0 }
 0xa6c   : > { %p2050_p13 = pneg %p2049_p12 }
 0xa6e   : > { %p2057_p3 = pnand %p2056_p2, %p2050_p13 }
 0xa91   : > { %v865_v57 = vpop.xlane.xlu1 %864 }
 0xad7   : > { %v1364_v41 = vpop.permute.xlu0 %1363 }
 0xad8   : > { %v1404_v42 = vadd.f32 %v2502_v51, %v1364_v41 }
 0xada   : > { %v1409_v43 = vsel %vm431_vm1, %v1404_v42, -inf }
 0xadb   : > { %1410 = vmax.xlane.f32.xlu0 %v1409_v43 }
 0xadf   : > { %1140 = vadd.xlane.f32.xlu0 %v1139_v44 }
 0xb68   : > { %v1411_v45 = vpop.xlane.xlu0 %1410 }
 0xb69   : > { %v1412_v46 = vsub.f32 %v1404_v42, %v1411_v45 }
 0xb6b   : > { %v1413_v47 = vmul.f32 1.442695, %v1412_v46 }
 0xb6c   : > { %v1141_v48 = vpop.xlane.xlu0 %1140 }
 0xb6d   : > { %2034 = vpow2.f32 %v1413_v47 }
 0xb6e   : > { %2036 = vrcp.f32 %v1141_v48 }
 0xb6f   : > { %2038 = vrcp.f32 %v865_v57 }
 0xb77   : > { %v2035_v49 = vpop.eup %2034 }
 0xb78   : > { %v2037_v50 = vpop.eup %2036  ;;  %v1415_v52 = vsel %vm431_vm1, %v2035_v49, 0.0  ;;  %v1418_v53 = vpack.c.bf16 %v2035_v49, %v2035_v49 }
 0xb79   : > { %1416 = vadd.xlane.f32.xlu0 %v1415_v52  ;;  %v1192_v51 = vmul.f32 %v2037_v50, %v1185_v15  ;;  %v2039_v58 = vpop.eup %2038 }
 0xb7a   : > { %1915 = vmatmul.mubr.msk.bf16.vlgmr.msra.gmra.mrb[20].mxu1 %vm431_vm1, %v1418_v53  ;;  %v916_v59 = vmul.f32 %v2039_v58, %v2468_v19  ;;  %v2026_v19 = vld [vmem:[%s2656_s4] sm:$0xff]  }
 0xb7b   : > { %v1722_v54 = vpack.c.bf16 %v1192_v51, %v1192_v51  ;;  %1922 = vmatprep.mubr.msk.bf16.mxu1 %vm2112_vm0, %v2111_v1  ;;  %1919 = vmatpush3.bf16.msra.mxu1 %v2026_v19 }
 0xb7c   : > { %v1721_v60 = vpack.c.bf16 %v916_v59, %v916_v59  ;;  %1920 = vmatprep.subr.bf16.mxu1 %v2111_v1  ;;  %v1711_v1 = vld [vmem:[%s2657_s5] ss:$0 sm:$0xff] }
 0xb7d   : > { %1197 = vrot.lane.b32.xlu1 %v1722_v54, %s2131_s19  ;;  %594 = vadd.xlane.f32.xlu0 %v593_v55 }
 0xb7f   : > { %1921 = vmatpush3.bf16.msra.mxu1 %v2027_v5 }
 0xb93   : > { %921 = vrot.lane.b32.xlu0 %v1721_v60, %s2132_s21 }
 0xbef   : > { %v1198_v3 = vpop.permute.xlu1 %1197 }
 0xc06   : > { %v1417_v56 = vpop.xlane.xlu0 %1416 }
 0xc0a   : > { %v595_v61 = vpop.xlane.xlu0 %594 }
 0xc0b   : > { %2040 = vrcp.f32 %v595_v61 }
 0xc0c   : > { %2042 = vrcp.f32 %v1417_v56 }
 0xc0e   : > { %v922_v4 = vpop.permute.xlu0 %921 }
 0xc15   : > { %v2041_v62 = vpop.eup %2040 }
 0xc16   : > { %v646_v63 = vmul.f32 %v2041_v62, %v2382_v25  ;;  %v2043_v25 = vpop.eup %2042 }
 0xc18   : > { %v647_v2 = vpack.c.bf16 %v646_v63, %v646_v63 }
 0xc1a   : > { %649 = vst.msk [vmem:[#allocation3] sm:$0xf] %vm648_vm11, %v647_v2 }
 0xc1b   : > { %925 = vst.msk [vmem:[#allocation3] sm:$0xf] %vm924_vm12, %v922_v4 }
 0xc1c   : > { %1201 = vst.msk [vmem:[#allocation3] sm:$0xf] %vm1200_vm13, %v1198_v3 }
 0xc4d   : > { %v1461_v6 = vpop.f32.mrb[20].mxu1 }
 0xc4e   : > { %v1468_v7 = vmul.f32 %v2043_v25, %v1461_v6  ;;  %v1916_v8 = vpop.f32.mrb[21].mxu1 }
 0xc4f   : > { %v1464_v9 = vpop.f32.mrb[22].mxu1 }
 0xc50   : > { %v1723_v10 = vpack.c.bf16 %v1468_v7, %v1468_v7  ;;  %v1917_v11 = vpop.f32.mrb[23].mxu1 }
 0xc52   : > { %1473 = vrot.lane.b32.xlu0 %v1723_v10, %s2133_s23 }
 0xcc4   : > { %v1474_v12 = vpop.permute.xlu0 %1473 }
 0xcc5   : > { %1477 = vst.msk [vmem:[#allocation3] sm:$0xf] %vm1476_vm14, %v1474_v12 }
 0xccc   : > { %v1478_v13 = vld [vmem:[#allocation3] sm:$0xf] }
 0xccd   : > { %1923 = vmatmul.mubr.msk.bf16.vlgmr.msra.gmra.mrb[24].mxu1 %vm327_vm2, %v1478_v13 }
 0xda0   : > { %v1539_v14 = vpop.f32.mrb[24].mxu1 }
 0xda1   : > { %v1540_v15 = vadd.f32 %v1711_v1, %v1539_v14  ;;  %v1924_v16 = vpop.f32.mrb[25].mxu1 }
 0xda2   : > { %v1542_v17 = vpop.f32.mrb[26].mxu1 }
 0xda3   : > { %v1925_v18 = vpop.f32.mrb[27].mxu1  ;;  %v1545_v21 = vadd.f32 %v2046_v20, %v1540_v15 }
 0xda5   : > { %v1546_v22 = vsel %vm327_vm2, %v1545_v21, 0.0 }
 0xda6   : > { %1547 = vadd.xlane.f32.xlu1 %v1546_v22 }
 0xe33   : > { %v1548_v23 = vpop.xlane.xlu1 %1547 }
 0xe34   : > { %v1550_v24 = vmul.f32 0.03125, %v1548_v23 }
 0xe36   : > { %v1551_v26 = vsub.f32 %v1545_v21, %v1550_v24 }
 0xe38   : > { %v1552_v27 = vmul.f32 %v1551_v26, %v1551_v26 }
 0xe3a   : > { %v1553_v29 = vsel %vm327_vm2, %v1552_v27, 0.0 }
 0xe3b   : > { %1554 = vadd.xlane.f32.xlu0 %v1553_v29 }
 0xec8   : > { %v1555_v30 = vpop.xlane.xlu0 %1554 }
 0xec9   : > { %v1556_v28 = vmul.f32 0.03125, %v1555_v30 }
 0xecb   : > { %v1557_v31 = vadd.f32 1e-05, %v1556_v28 }
 0xecd   : > { %2044 = vrsqrt.f32 %v1557_v31 }
 0xed7   : > { %v2045_v32 = vpop.eup %2044 }
 0xed8   : > { %v1559_v34 = vmul.f32 %v2045_v32, %v1551_v26 }
 0xeda   : > { %v1567_v36 = vmul.f32 %v1715_v33, %v1559_v34 }
 0xedc   : > { %v1575_v0 = vadd.f32 %v1716_v35, %v1567_v36 }
 0xede   : > { %1576 = vst.msk [vmem:[%s296_s12] sm:$0xff] %vm327_vm2, %v1575_v0 }
 0xedf   : > { %2060 = shalt.err (!%p2057_p3)
}
 0xee0   : > { %s2061_s25 = scalar_lea.hbm %s2609_s17, 128  ;;  %s2065_s10 = scalar_lea.hbm %s2660_s8, 256 }
 0xee1   : > { %p2062_p4 = scmp.ne.s32.totalorder %s2609_s17, %s2061_s25  ;;  %p2066_p9 = scmp.lt.u32.totalorder %s2609_s17, %s2660_s8 }
 0xee2   : > { %p2067_p10 = scmp.lt.u32.totalorder %s2065_s10, %s2061_s25  ;;  %p2069_p12 = scmp.lt.u32.totalorder %s2061_s25, %s2609_s17 }
 0xee3   : > { %p2063_p7 = pnand %p2062_p4, %p2218_p5 }
 0xee4   : > { %p2068_p11 = por %p2067_p10, %p2066_p9 }
 0xee5   : > { %p2064_p8 = pneg %p2063_p7 }
 0xee6   : > { %p2070_p13 = por %p2069_p12, %p2068_p11 }
 0xee8   : > { %p2071_p0 = pnand %p2070_p13, %p2064_p8 }
 0xeea   : > { %2074 = shalt.err (!%p2071_p0)
}
 0xeeb   : > { %1926 = dma.vmem_to_hbm [thread:$0]  (%p2218_p5), %s2611_s26, 128, %s2609_s17, %s1578_s24  }
 0xeec PF: > { %p1932_p1 = scmp.ge.s32.totalorder %s2109_s30, 2  ;;  %s1603_s23 = sand.u32 1, %s2097_s27  }
 0xeed   : > { %s1604_s20 = scalar_lea.sflag [#allocation5], %s1603_s23 }
 0xeee   : > { %p1929_p2 = pnand %p1932_p1, %p2222_p6 }
 0xef0   : > { %2092 = dma.done.wait (!%p1929_p2), %s1604_s20, 128  }
 0xef1   : > { %2094 = vsyncadd (!%p1929_p2), %s1604_s20, 4294967168  ;;  %p18_p3 = scmp.ge.s32.totalorder %s2205_s11, 4   ;;  %s2679_s27 = smov %s2101_s28 }
 0xef2   : > { %s2680_s28 = smov %s2105_s29  ;;  %s2681_s29 = smov %s2216_s14 }
 0xef3   : > { %s2682_s30 = smov %s2205_s11  ;;  %20 = sbr.rel (!%p18_p3) target bundleno = 3 (0x3), region = 87 }
 0xefa   :  { %1609 = vsyncpa [#allocation5], 1 }
 0xefb   :  { %1611 = vsyncpa [#allocation5 + $0x1], 1 }

</bundles_post_ra>
